<compile_context>
chip_gen: v7x
topology: tpu7x:2x2x1
jax: 0.10.0
libtpu: 0.0.40
codegen_flags: <defaults>
</compile_context>

<pallas_src>
import functools

import jax
import jax.numpy as jnp
from jax.experimental import pallas as pl
from jax.experimental.pallas import tpu as pltpu


def _round_up(x, m):
    return (x + m - 1) // m * m


def _masked_softmax(scores, pad_row, *, approx):
    # scores: (R, Sp) f32 ; pad_row: (1, Sp) bool, True = padded key (ignored).
    # NOTE: rows whose keys are ALL padded come out uniform (PyTorch would give NaN).
    scores = jnp.where(pad_row, -1e30, scores)          # f32 softmax -> -1e30 is safe
    m = jnp.max(scores, axis=-1, keepdims=True)
    e = jnp.exp(scores - m)
    denom = jnp.sum(e, axis=-1, keepdims=True)
    if approx:
        return e * pl.reciprocal(denom, approx=True)    # EUP slot; internal use only
    return e / denom                                    # exact: returned model output


def dep_parse_head_kernel(mask_ref, x_ref, w1_ref, b1_ref, *rest,
                          num_heads, head_dim, fold_out, out_rows):
    # rest unpacks differently depending on whether out_proj was folded into V host-side.
    if fold_out:
        (b_out_ref, w_qk_ref, b_qk_ref, w_proj_ref, b_proj_ref,
         attn_ref, label_ref) = rest
        w_out_ref = None
    else:
        (w_out_ref, b_out_ref, w_qk_ref, b_qk_ref, w_proj_ref, b_proj_ref,
         attn_ref, label_ref) = rest

    x = x_ref[0]                                        # (Sp, Hp), bf16 by default
    Sp, Hp = x.shape
    cdt = x.dtype
    d = head_dim
    pad = mask_ref[0] == 0                              # (1, Sp) bool, True = padding

    # ---- fused projection: [q | k | v'(per head) or v | dense] = x @ W1 + b1
    #      (single wide bf16 MXU call, f32 accumulation)
    y = jnp.dot(x, w1_ref[...], preferred_element_type=jnp.float32) + b1_ref[...]
    q = y[:, 0 * Hp:1 * Hp]
    k = y[:, 1 * Hp:2 * Hp]
    v_off = 2 * Hp
    n_v_sections = num_heads if fold_out else 1
    dense_off = v_off + n_v_sections * Hp
    h1 = jnp.maximum(y[:, dense_off:dense_off + Hp], 0.0)       # relu(dense(x)), f32

    # ---- classifier path first: shortens h1's live range and starts the label
    #      writeback DMA while the attention matmuls run.
    lbl = (jnp.dot(h1[:out_rows].astype(cdt), w_proj_ref[...],
                   preferred_element_type=jnp.float32) + b_proj_ref[...])
    label_ref[0] = lbl.astype(label_ref.dtype)                  # (Sr, Lp)

    # ---- head_attn_pre: per-head attention; query scale pre-folded into Wq.
    x3 = b_out_ref[...].astype(jnp.float32)                     # (1, Hp), broadcasts
    for h in range(num_heads):                                  # static unrolled loop
        lo, hi = h * d, (h + 1) * d
        # NOTE: for d < 128 these column slices are sub-lane (relayout copies); audit in
        # the bundle dump if they ever dominate (acceptable at demo scale).
        qh = q[:, lo:hi].astype(cdt)                            # bf16 MXU operands
        kh = k[:, lo:hi].astype(cdt)
        s = jax.lax.dot_general(qh, kh, (((1,), (1,)), ((), ())),
                                preferred_element_type=jnp.float32)      # (Sp, Sp) f32
        p = _masked_softmax(s, pad, approx=True).astype(cdt)             # bf16 for MXU
        if fold_out:
            vh = y[:, v_off + h * Hp:v_off + (h + 1) * Hp].astype(cdt)   # (Sp, Hp)
            x3 = x3 + jnp.dot(p, vh, preferred_element_type=jnp.float32)
        else:
            vh = y[:, v_off + lo:v_off + hi].astype(cdt)                 # (Sp, d)
            ctx = jnp.dot(p, vh, preferred_element_type=jnp.float32)
            x3 = x3 + jnp.dot(ctx.astype(cdt), w_out_ref[lo:hi, :],
                              preferred_element_type=jnp.float32)        # (Sp, Hp)

    # ---- head_attn_post (num_heads=1): only the attention weights are needed.
    x3c = x3.astype(cdt)
    qk = (jnp.dot(x3c, w_qk_ref[...], preferred_element_type=jnp.float32)
          + b_qk_ref[...])                                               # (Sp, 2Hp) f32
    q2 = qk[:out_rows, 0 * Hp:1 * Hp].astype(cdt)   # queries: only the Sr rows we return
    k2 = qk[:, 1 * Hp:2 * Hp].astype(cdt)           # keys: all Sp rows
    s2 = jax.lax.dot_general(q2, k2, (((1,), (1,)), ((), ())),
                             preferred_element_type=jnp.float32)         # (Sr, Sp)
    # exact softmax for the returned output (rows must sum to 1)
    attn_ref[0] = _masked_softmax(s2, pad, approx=False).astype(attn_ref.dtype)


def prepare_params(params, *, num_heads, compute_dtype=jnp.bfloat16, fold_out=None):
    """One-time host-side weight relayout. Call once, reuse across forwards."""
    H = params["w_dense"].shape[0]
    L = params["w_proj"].shape[0]
    assert H % num_heads == 0
    d = H // num_heads
    if fold_out is None:
        fold_out = d < 64            # small heads: fold out_proj into V (fills the MXU)
    Hp = _round_up(H, 128)           # lane-aligned hidden size
    Lp = _round_up(L, 128)           # lane-dense label output
    cdt = jnp.dtype(compute_dtype)

    def pad_io(w, rows, cols):       # w in (in, out) layout -> zero-pad to (rows, cols)
        return jnp.pad(w, ((0, rows - w.shape[0]), (0, cols - w.shape[1])))

    def pad_vec(b, n):
        return jnp.pad(b, (0, n - b.shape[0]))

    # head_attn_pre in_proj, (in, out) layout, 1/sqrt(d) folded into Q weight + bias
    wq = params["w_in_pre"][0:H].T * (d ** -0.5)
    wk = params["w_in_pre"][H:2 * H].T
    wv = params["w_in_pre"][2 * H:3 * H].T
    bq = params["b_in_pre"][0:H] * (d ** -0.5)
    bk = params["b_in_pre"][H:2 * H]
    bv = params["b_in_pre"][2 * H:3 * H]
    w_out = params["w_out_pre"].T                       # (H, H) (in, out)
    b_out = params["b_out_pre"]
    w_dense = params["w_dense"].T
    b_dense = params["b_dense"]

    # fused projection layout: [q | k | (v'_0..v'_{nh-1} or v) | dense], each Hp wide
    sec_w = [pad_io(wq, Hp, Hp), pad_io(wk, Hp, Hp)]
    sec_b = [pad_vec(bq, Hp), pad_vec(bk, Hp)]
    if fold_out:
        for h in range(num_heads):
            lo, hi = h * d, (h + 1) * d
            wv_h = wv[:, lo:hi] @ w_out[lo:hi, :]       # (H, H): V_h folded with out_proj
            bv_h = bv[lo:hi] @ w_out[lo:hi, :]          # (H,)
            sec_w.append(pad_io(wv_h, Hp, Hp))
            sec_b.append(pad_vec(bv_h, Hp))
    else:
        sec_w.append(pad_io(wv, Hp, Hp))
        sec_b.append(pad_vec(bv, Hp))
    sec_w.append(pad_io(w_dense, Hp, Hp))
    sec_b.append(pad_vec(b_dense, Hp))

    w1 = jnp.concatenate(sec_w, axis=1).astype(cdt)                    # (Hp, W1c)
    b1 = jnp.concatenate(sec_b).reshape(1, -1).astype(jnp.float32)     # (1, W1c)
    b_out_p = pad_vec(b_out, Hp).reshape(1, Hp).astype(jnp.float32)

    # head_attn_post: only Q/K rows matter for the returned weights; 1/sqrt(H) folded in
    wq2 = params["w_in_post"][0:H].T * (H ** -0.5)
    wk2 = params["w_in_post"][H:2 * H].T
    bq2 = params["b_in_post"][0:H] * (H ** -0.5)
    bk2 = params["b_in_post"][H:2 * H]
    w_qk = jnp.concatenate([pad_io(wq2, Hp, Hp), pad_io(wk2, Hp, Hp)],
                           axis=1).astype(cdt)                          # (Hp, 2Hp)
    b_qk = jnp.concatenate([pad_vec(bq2, Hp), pad_vec(bk2, Hp)]
                           ).reshape(1, 2 * Hp).astype(jnp.float32)

    w_proj = pad_io(params["w_proj"].T, Hp, Lp).astype(cdt)             # (Hp, Lp)
    b_proj = pad_vec(params["b_proj"], Lp).reshape(1, Lp).astype(jnp.float32)

    prep = {"w1": w1, "b1": b1, "b_out": b_out_p, "w_qk": w_qk, "b_qk": b_qk,
            "w_proj": w_proj, "b_proj": b_proj,
            "meta": {"H": H, "L": L, "Hp": Hp, "Lp": Lp, "num_heads": num_heads,
                     "head_dim": d, "fold_out": fold_out, "compute_dtype": cdt}}
    if not fold_out:
        prep["w_out"] = pad_io(w_out, Hp, Hp).astype(cdt)
    return prep


def dependency_parse_head(features, masks, prep):
    meta = prep["meta"]
    H, L, Hp, Lp = meta["H"], meta["L"], meta["Hp"], meta["Lp"]
    num_heads, head_dim = meta["num_heads"], meta["head_dim"]
    fold_out, cdt = meta["fold_out"], meta["compute_dtype"]

    B, S, Hf = features.shape
    assert Hf == H
    Sp = _round_up(S, 128)          # key / lane axis: lane-dense, MXU-native M
    Sr = _round_up(S, 8)            # query / output rows: sublane-aligned, trims writeback

    # per-call activation padding only (weights were prepared once in prepare_params)
    x = features.astype(cdt)
    if Sp != S or Hp != H:
        x = jnp.pad(x, ((0, 0), (0, Sp - S), (0, Hp - H)))
    m = masks.astype(jnp.int32)
    if Sp != S:
        m = jnp.pad(m, ((0, 0), (0, Sp - S)))            # pad tokens -> masked keys
    masks3 = m.reshape(B, 1, Sp)

    weight_args = [prep["w1"], prep["b1"]]
    if not fold_out:
        weight_args.append(prep["w_out"])
    weight_args += [prep["b_out"], prep["w_qk"], prep["b_qk"],
                    prep["w_proj"], prep["b_proj"]]

    def const_spec(shape):
        zeros = (0,) * len(shape)
        return pl.BlockSpec(shape, lambda b, _z=zeros: _z)

    weight_specs = [const_spec(tuple(w.shape)) for w in weight_args]

    # VMEM budget derived from actual block + intermediate sizes (v7x has 64 MiB/TC).
    W1c = prep["w1"].shape[1]
    csz = jnp.dtype(cdt).itemsize
    blk_bytes = (Sp * 4 + Sp * Hp * csz
                 + sum(int(w.size) * w.dtype.itemsize for w in weight_args)
                 + Sr * Sp * 4 + Sr * Lp * 4)
    interm_bytes = (Sp * W1c * 4            # y (f32)
                    + 2 * Sp * Sp * 4       # scores + probs (f32)
                    + 3 * Sp * Hp * 4       # x3 / h1 / temps (f32)
                    + Sp * 2 * Hp * 4)      # qk (f32)
    vmem_limit = max(16 << 20, min(2 * blk_bytes + interm_bytes + (4 << 20), 48 << 20))

    kernel = functools.partial(dep_parse_head_kernel, num_heads=num_heads,
                               head_dim=head_dim, fold_out=fold_out, out_rows=Sr)

    attn, label = pl.pallas_call(
        kernel,
        out_shape=(jax.ShapeDtypeStruct((B, Sr, Sp), jnp.float32),
                   jax.ShapeDtypeStruct((B, Sr, Lp), jnp.float32)),
        grid=(B,),
        in_specs=[pl.BlockSpec((1, 1, Sp), lambda b: (b, 0, 0)),     # masks
                  pl.BlockSpec((1, Sp, Hp), lambda b: (b, 0, 0))]    # features
                 + weight_specs,
        out_specs=(pl.BlockSpec((1, Sr, Sp), lambda b: (b, 0, 0)),
                   pl.BlockSpec((1, Sr, Lp), lambda b: (b, 0, 0))),
        compiler_params=pltpu.CompilerParams(
            dimension_semantics=("parallel",),   # B >= 2 keeps both v7x TCs busy
            vmem_limit_bytes=int(vmem_limit)),
    )(masks3, x, *weight_args)

    # strip lane/sublane-density padding outside the kernel
    return attn[:, :S, :S], label[:, :S, :L]


def init_params(key, hidden, num_labels):
    ks = jax.random.split(key, 12)
    s = 0.02
    return {
        # head_attn_pre (nn.MultiheadAttention): in_proj (3H,H)+(3H,), out_proj (H,H)+(H,)
        "w_in_pre": s * jax.random.normal(ks[0], (3 * hidden, hidden), jnp.float32),
        "b_in_pre": s * jax.random.normal(ks[1], (3 * hidden,), jnp.float32),
        "w_out_pre": s * jax.random.normal(ks[2], (hidden, hidden), jnp.float32),
        "b_out_pre": s * jax.random.normal(ks[3], (hidden,), jnp.float32),
        # head_attn_post (num_heads=1): only Q/K rows affect the returned attn weights
        "w_in_post": s * jax.random.normal(ks[4], (3 * hidden, hidden), jnp.float32),
        "b_in_post": s * jax.random.normal(ks[5], (3 * hidden,), jnp.float32),
        # dense (H,H), out_proj (L,H)
        "w_dense": s * jax.random.normal(ks[6], (hidden, hidden), jnp.float32),
        "b_dense": s * jax.random.normal(ks[7], (hidden,), jnp.float32),
        "w_proj": s * jax.random.normal(ks[8], (num_labels, hidden), jnp.float32),
        "b_proj": s * jax.random.normal(ks[9], (num_labels,), jnp.float32),
    }


if __name__ == "__main__":
    B, S, H = 2, 8, 32
    NUM_HEADS = 4          # config.classifier_num_attention_heads
    NUM_LABELS = 8         # config.num_labels

    key = jax.random.PRNGKey(0)
    k_feat, k_param = jax.random.split(key)
    features = jax.random.normal(k_feat, (B, S, H), jnp.float32)
    # nonzero = valid token, 0 = padding (at least one valid token per row)
    masks = jnp.array([[1, 1, 1, 1, 1, 1, 0, 0],
                       [1, 1, 1, 1, 1, 1, 1, 1]], dtype=jnp.int32)

    params = init_params(k_param, H, NUM_LABELS)

    # one-time weight relayout (transpose / fuse / scale-fold / pad); bf16 compute default.
    # Pass compute_dtype=jnp.float32 for exact f32 parity with the PyTorch reference.
    prep = prepare_params(params, num_heads=NUM_HEADS)

    attn, label = dependency_parse_head(features, masks, prep)
    jax.block_until_ready((attn, label))
    assert attn.shape == (B, S, S) and label.shape == (B, S, NUM_LABELS)
    # returned attention rows use the exact-reciprocal softmax -> must sum to ~1
    row_sums = jnp.sum(attn, axis=-1)
    assert bool(jnp.all(jnp.abs(row_sums - 1.0) < 1e-3))
    print("KERNEL_OK")
</pallas_src>

<mosaic_0001>
module attributes {stable_mosaic.version = 11 : i64} {
  func.func @dep_parse_head_kernel(%arg0: i32, %arg1: memref<1x1x128xi32, #tpu.memory_space<vmem>>, %arg2: memref<1x128x128xbf16, #tpu.memory_space<vmem>>, %arg3: memref<128x896xbf16, #tpu.memory_space<vmem>>, %arg4: memref<1x896xf32, #tpu.memory_space<vmem>>, %arg5: memref<1x128xf32, #tpu.memory_space<vmem>>, %arg6: memref<128x256xbf16, #tpu.memory_space<vmem>>, %arg7: memref<1x256xf32, #tpu.memory_space<vmem>>, %arg8: memref<128x128xbf16, #tpu.memory_space<vmem>>, %arg9: memref<1x128xf32, #tpu.memory_space<vmem>>, %arg10: memref<1x8x128xf32, #tpu.memory_space<vmem>>, %arg11: memref<1x8x128xf32, #tpu.memory_space<vmem>>) attributes {dimension_semantics = [#tpu.dimension_semantics<parallel>], iteration_bounds = array<i64: 2>, scalar_prefetch = 0 : i64, scratch_operands = 0 : i64, tpu.core_type = #tpu.core_type<tc>, window_params = [{transform_indices = @transform_0, window_bounds = array<i64: 1, 1, 128>}, {transform_indices = @transform_1, window_bounds = array<i64: 1, 128, 128>}, {pipeline_mode = #tpu.pipeline_mode<synchronous>, transform_indices = @transform_2, window_bounds = array<i64: 128, 896>}, {pipeline_mode = #tpu.pipeline_mode<synchronous>, transform_indices = @transform_3, window_bounds = array<i64: 1, 896>}, {pipeline_mode = #tpu.pipeline_mode<synchronous>, transform_indices = @transform_4, window_bounds = array<i64: 1, 128>}, {pipeline_mode = #tpu.pipeline_mode<synchronous>, transform_indices = @transform_5, window_bounds = array<i64: 128, 256>}, {pipeline_mode = #tpu.pipeline_mode<synchronous>, transform_indices = @transform_6, window_bounds = array<i64: 1, 256>}, {pipeline_mode = #tpu.pipeline_mode<synchronous>, transform_indices = @transform_7, window_bounds = array<i64: 128, 128>}, {pipeline_mode = #tpu.pipeline_mode<synchronous>, transform_indices = @transform_8, window_bounds = array<i64: 1, 128>}, {transform_indices = @transform_9, window_bounds = array<i64: 1, 8, 128>}, {transform_indices = @transform_10, window_bounds = array<i64: 1, 8, 128>}]} {
    %c0 = arith.constant 0 : index
    %c0_0 = arith.constant 0 : index
    %c0_1 = arith.constant 0 : index
    %0 = vector.load %arg2[%c0, %c0_0, %c0_1] : memref<1x128x128xbf16, #tpu.memory_space<vmem>>, vector<1x128x128xbf16>
    %1 = vector.shape_cast %0 : vector<1x128x128xbf16> to vector<128x128xbf16>
    %c0_2 = arith.constant 0 : index
    %c0_3 = arith.constant 0 : index
    %c0_4 = arith.constant 0 : index
    %2 = vector.load %arg1[%c0_2, %c0_3, %c0_4] : memref<1x1x128xi32, #tpu.memory_space<vmem>>, vector<1x1x128xi32>
    %3 = vector.shape_cast %2 : vector<1x1x128xi32> to vector<1x128xi32>
    %c0_i32 = arith.constant 0 : i32
    %4 = vector.broadcast %c0_i32 : i32 to vector<1x128xi32>
    %5 = arith.cmpi eq, %3, %4 : vector<1x128xi32>
    %c0_5 = arith.constant 0 : index
    %c0_6 = arith.constant 0 : index
    %6 = vector.load %arg3[%c0_5, %c0_6] : memref<128x896xbf16, #tpu.memory_space<vmem>>, vector<128x896xbf16>
    %cst = arith.constant dense<0.000000e+00> : vector<128x896xf32>
    %7 = tpu.matmul %1, %6, %cst {dimension_numbers = #tpu.dot_dimension_numbers<[1], [0], [0], [1], [0, 0, 1, 1], [], []>} : vector<128x128xbf16>, vector<128x896xbf16>, vector<128x896xf32> -> vector<128x896xf32>
    %c0_7 = arith.constant 0 : index
    %c0_8 = arith.constant 0 : index
    %8 = vector.load %arg4[%c0_7, %c0_8] : memref<1x896xf32, #tpu.memory_space<vmem>>, vector<1x896xf32>
    %9 = vector.broadcast %8 : vector<1x896xf32> to vector<128x896xf32>
    %10 = arith.addf %7, %9 : vector<128x896xf32>
    %11 = vector.extract_strided_slice %10 {offsets = [0, 0], sizes = [128, 128], strides = [1, 1]} : vector<128x896xf32> to vector<128x128xf32>
    %12 = vector.extract_strided_slice %10 {offsets = [0, 128], sizes = [128, 128], strides = [1, 1]} : vector<128x896xf32> to vector<128x128xf32>
    %13 = vector.extract_strided_slice %10 {offsets = [0, 768], sizes = [128, 128], strides = [1, 1]} : vector<128x896xf32> to vector<128x128xf32>
    %cst_9 = arith.constant 0.000000e+00 : f32
    %14 = vector.broadcast %cst_9 : f32 to vector<128x128xf32>
    %15 = arith.maximumf %13, %14 : vector<128x128xf32>
    %16 = vector.extract_strided_slice %15 {offsets = [0, 0], sizes = [8, 128], strides = [1, 1]} : vector<128x128xf32> to vector<8x128xf32>
    %17 = arith.truncf %16 : vector<8x128xf32> to vector<8x128xbf16>
    %c0_10 = arith.constant 0 : index
    %c0_11 = arith.constant 0 : index
    %18 = vector.load %arg8[%c0_10, %c0_11] : memref<128x128xbf16, #tpu.memory_space<vmem>>, vector<128x128xbf16>
    %cst_12 = arith.constant dense<0.000000e+00> : vector<8x128xf32>
    %19 = tpu.matmul %17, %18, %cst_12 {dimension_numbers = #tpu.dot_dimension_numbers<[1], [0], [0], [1], [0, 0, 1, 1], [], []>} : vector<8x128xbf16>, vector<128x128xbf16>, vector<8x128xf32> -> vector<8x128xf32>
    %c0_13 = arith.constant 0 : index
    %c0_14 = arith.constant 0 : index
    %20 = vector.load %arg9[%c0_13, %c0_14] : memref<1x128xf32, #tpu.memory_space<vmem>>, vector<1x128xf32>
    %21 = vector.broadcast %20 : vector<1x128xf32> to vector<8x128xf32>
    %22 = arith.addf %19, %21 : vector<8x128xf32>
    %c0_15 = arith.constant 0 : index
    %c0_16 = arith.constant 0 : index
    %c0_17 = arith.constant 0 : index
    %23 = vector.load %arg11[%c0_15, %c0_16, %c0_17] : memref<1x8x128xf32, #tpu.memory_space<vmem>>, vector<1x8x128xf32>
    %24 = vector.shape_cast %23 : vector<1x8x128xf32> to vector<8x128xf32>
    %25 = vector.shape_cast %22 : vector<8x128xf32> to vector<1x8x128xf32>
    tpu.vector_store %arg11[%c0_15, %c0_16, %c0_17], %25 {strides = array<i32>} : memref<1x8x128xf32, #tpu.memory_space<vmem>>, vector<1x8x128xf32>,
    %c0_18 = arith.constant 0 : index
    %c0_19 = arith.constant 0 : index
    %26 = vector.load %arg5[%c0_18, %c0_19] : memref<1x128xf32, #tpu.memory_space<vmem>>, vector<1x128xf32>
    %27 = vector.extract_strided_slice %11 {offsets = [0, 0], sizes = [128, 8], strides = [1, 1]} : vector<128x128xf32> to vector<128x8xf32>
    %28 = arith.truncf %27 : vector<128x8xf32> to vector<128x8xbf16>
    %29 = vector.extract_strided_slice %12 {offsets = [0, 0], sizes = [128, 8], strides = [1, 1]} : vector<128x128xf32> to vector<128x8xf32>
    %30 = arith.truncf %29 : vector<128x8xf32> to vector<128x8xbf16>
    %cst_20 = arith.constant dense<0.000000e+00> : vector<128x128xf32>
    %31 = tpu.matmul %28, %30, %cst_20 {dimension_numbers = #tpu.dot_dimension_numbers<[1], [1], [0], [0], [0, 0, 1, 0], [], []>} : vector<128x8xbf16>, vector<128x8xbf16>, vector<128x128xf32> -> vector<128x128xf32>
    %cst_21 = arith.constant -1.000000e+30 : f32
    %32 = vector.shape_cast %5 : vector<1x128xi1> to vector<1x128xi1>
    %33 = vector.broadcast %32 : vector<1x128xi1> to vector<128x128xi1>
    %34 = vector.broadcast %cst_21 : f32 to vector<128x128xf32>
    %35 = arith.select %33, %34, %31 : vector<128x128xi1>, vector<128x128xf32>
    %cst_22 = arith.constant dense<0xFF800000> : vector<128xf32>
    %36 = vector.multi_reduction <maximumf>, %35, %cst_22 [1] : vector<128x128xf32> to vector<128xf32>
    %37 = vector.shape_cast %36 : vector<128xf32> to vector<128x1xf32>
    %38 = vector.broadcast %37 : vector<128x1xf32> to vector<128x128xf32>
    %39 = arith.subf %35, %38 : vector<128x128xf32>
    %40 = math.exp %39 : vector<128x128xf32>
    %cst_23 = arith.constant dense<0.000000e+00> : vector<128xf32>
    %41 = vector.multi_reduction <add>, %40, %cst_23 [1] : vector<128x128xf32> to vector<128xf32>
    %42 = vector.shape_cast %41 : vector<128xf32> to vector<128x1xf32>
    %43 = tpu.reciprocal %42 {approx = true} : vector<128x1xf32> -> vector<128x1xf32>
    %44 = vector.broadcast %43 : vector<128x1xf32> to vector<128x128xf32>
    %45 = arith.mulf %40, %44 : vector<128x128xf32>
    %46 = arith.truncf %45 : vector<128x128xf32> to vector<128x128xbf16>
    %47 = vector.extract_strided_slice %10 {offsets = [0, 256], sizes = [128, 128], strides = [1, 1]} : vector<128x896xf32> to vector<128x128xf32>
    %48 = arith.truncf %47 : vector<128x128xf32> to vector<128x128xbf16>
    %cst_24 = arith.constant dense<0.000000e+00> : vector<128x128xf32>
    %49 = tpu.matmul %46, %48, %cst_24 {dimension_numbers = #tpu.dot_dimension_numbers<[1], [0], [0], [1], [0, 0, 1, 1], [], []>} : vector<128x128xbf16>, vector<128x128xbf16>, vector<128x128xf32> -> vector<128x128xf32>
    %50 = vector.broadcast %26 : vector<1x128xf32> to vector<128x128xf32>
    %51 = arith.addf %50, %49 : vector<128x128xf32>
    %52 = vector.extract_strided_slice %11 {offsets = [0, 8], sizes = [128, 8], strides = [1, 1]} : vector<128x128xf32> to vector<128x8xf32>
    %53 = arith.truncf %52 : vector<128x8xf32> to vector<128x8xbf16>
    %54 = vector.extract_strided_slice %12 {offsets = [0, 8], sizes = [128, 8], strides = [1, 1]} : vector<128x128xf32> to vector<128x8xf32>
    %55 = arith.truncf %54 : vector<128x8xf32> to vector<128x8xbf16>
    %cst_25 = arith.constant dense<0.000000e+00> : vector<128x128xf32>
    %56 = tpu.matmul %53, %55, %cst_25 {dimension_numbers = #tpu.dot_dimension_numbers<[1], [1], [0], [0], [0, 0, 1, 0], [], []>} : vector<128x8xbf16>, vector<128x8xbf16>, vector<128x128xf32> -> vector<128x128xf32>
    %cst_26 = arith.constant -1.000000e+30 : f32
    %57 = vector.shape_cast %5 : vector<1x128xi1> to vector<1x128xi1>
    %58 = vector.broadcast %57 : vector<1x128xi1> to vector<128x128xi1>
    %59 = vector.broadcast %cst_26 : f32 to vector<128x128xf32>
    %60 = arith.select %58, %59, %56 : vector<128x128xi1>, vector<128x128xf32>
    %cst_27 = arith.constant dense<0xFF800000> : vector<128xf32>
    %61 = vector.multi_reduction <maximumf>, %60, %cst_27 [1] : vector<128x128xf32> to vector<128xf32>
    %62 = vector.shape_cast %61 : vector<128xf32> to vector<128x1xf32>
    %63 = vector.broadcast %62 : vector<128x1xf32> to vector<128x128xf32>
    %64 = arith.subf %60, %63 : vector<128x128xf32>
    %65 = math.exp %64 : vector<128x128xf32>
    %cst_28 = arith.constant dense<0.000000e+00> : vector<128xf32>
    %66 = vector.multi_reduction <add>, %65, %cst_28 [1] : vector<128x128xf32> to vector<128xf32>
    %67 = vector.shape_cast %66 : vector<128xf32> to vector<128x1xf32>
    %68 = tpu.reciprocal %67 {approx = true} : vector<128x1xf32> -> vector<128x1xf32>
    %69 = vector.broadcast %68 : vector<128x1xf32> to vector<128x128xf32>
    %70 = arith.mulf %65, %69 : vector<128x128xf32>
    %71 = arith.truncf %70 : vector<128x128xf32> to vector<128x128xbf16>
    %72 = vector.extract_strided_slice %10 {offsets = [0, 384], sizes = [128, 128], strides = [1, 1]} : vector<128x896xf32> to vector<128x128xf32>
    %73 = arith.truncf %72 : vector<128x128xf32> to vector<128x128xbf16>
    %cst_29 = arith.constant dense<0.000000e+00> : vector<128x128xf32>
    %74 = tpu.matmul %71, %73, %cst_29 {dimension_numbers = #tpu.dot_dimension_numbers<[1], [0], [0], [1], [0, 0, 1, 1], [], []>} : vector<128x128xbf16>, vector<128x128xbf16>, vector<128x128xf32> -> vector<128x128xf32>
    %75 = arith.addf %51, %74 : vector<128x128xf32>
    %76 = vector.extract_strided_slice %11 {offsets = [0, 16], sizes = [128, 8], strides = [1, 1]} : vector<128x128xf32> to vector<128x8xf32>
    %77 = arith.truncf %76 : vector<128x8xf32> to vector<128x8xbf16>
    %78 = vector.extract_strided_slice %12 {offsets = [0, 16], sizes = [128, 8], strides = [1, 1]} : vector<128x128xf32> to vector<128x8xf32>
    %79 = arith.truncf %78 : vector<128x8xf32> to vector<128x8xbf16>
    %cst_30 = arith.constant dense<0.000000e+00> : vector<128x128xf32>
    %80 = tpu.matmul %77, %79, %cst_30 {dimension_numbers = #tpu.dot_dimension_numbers<[1], [1], [0], [0], [0, 0, 1, 0], [], []>} : vector<128x8xbf16>, vector<128x8xbf16>, vector<128x128xf32> -> vector<128x128xf32>
    %cst_31 = arith.constant -1.000000e+30 : f32
    %81 = vector.shape_cast %5 : vector<1x128xi1> to vector<1x128xi1>
    %82 = vector.broadcast %81 : vector<1x128xi1> to vector<128x128xi1>
    %83 = vector.broadcast %cst_31 : f32 to vector<128x128xf32>
    %84 = arith.select %82, %83, %80 : vector<128x128xi1>, vector<128x128xf32>
    %cst_32 = arith.constant dense<0xFF800000> : vector<128xf32>
    %85 = vector.multi_reduction <maximumf>, %84, %cst_32 [1] : vector<128x128xf32> to vector<128xf32>
    %86 = vector.shape_cast %85 : vector<128xf32> to vector<128x1xf32>
    %87 = vector.broadcast %86 : vector<128x1xf32> to vector<128x128xf32>
    %88 = arith.subf %84, %87 : vector<128x128xf32>
    %89 = math.exp %88 : vector<128x128xf32>
    %cst_33 = arith.constant dense<0.000000e+00> : vector<128xf32>
    %90 = vector.multi_reduction <add>, %89, %cst_33 [1] : vector<128x128xf32> to vector<128xf32>
    %91 = vector.shape_cast %90 : vector<128xf32> to vector<128x1xf32>
    %92 = tpu.reciprocal %91 {approx = true} : vector<128x1xf32> -> vector<128x1xf32>
    %93 = vector.broadcast %92 : vector<128x1xf32> to vector<128x128xf32>
    %94 = arith.mulf %89, %93 : vector<128x128xf32>
    %95 = arith.truncf %94 : vector<128x128xf32> to vector<128x128xbf16>
    %96 = vector.extract_strided_slice %10 {offsets = [0, 512], sizes = [128, 128], strides = [1, 1]} : vector<128x896xf32> to vector<128x128xf32>
    %97 = arith.truncf %96 : vector<128x128xf32> to vector<128x128xbf16>
    %cst_34 = arith.constant dense<0.000000e+00> : vector<128x128xf32>
    %98 = tpu.matmul %95, %97, %cst_34 {dimension_numbers = #tpu.dot_dimension_numbers<[1], [0], [0], [1], [0, 0, 1, 1], [], []>} : vector<128x128xbf16>, vector<128x128xbf16>, vector<128x128xf32> -> vector<128x128xf32>
    %99 = arith.addf %75, %98 : vector<128x128xf32>
    %100 = vector.extract_strided_slice %11 {offsets = [0, 24], sizes = [128, 8], strides = [1, 1]} : vector<128x128xf32> to vector<128x8xf32>
    %101 = arith.truncf %100 : vector<128x8xf32> to vector<128x8xbf16>
    %102 = vector.extract_strided_slice %12 {offsets = [0, 24], sizes = [128, 8], strides = [1, 1]} : vector<128x128xf32> to vector<128x8xf32>
    %103 = arith.truncf %102 : vector<128x8xf32> to vector<128x8xbf16>
    %cst_35 = arith.constant dense<0.000000e+00> : vector<128x128xf32>
    %104 = tpu.matmul %101, %103, %cst_35 {dimension_numbers = #tpu.dot_dimension_numbers<[1], [1], [0], [0], [0, 0, 1, 0], [], []>} : vector<128x8xbf16>, vector<128x8xbf16>, vector<128x128xf32> -> vector<128x128xf32>
    %cst_36 = arith.constant -1.000000e+30 : f32
    %105 = vector.shape_cast %5 : vector<1x128xi1> to vector<1x128xi1>
    %106 = vector.broadcast %105 : vector<1x128xi1> to vector<128x128xi1>
    %107 = vector.broadcast %cst_36 : f32 to vector<128x128xf32>
    %108 = arith.select %106, %107, %104 : vector<128x128xi1>, vector<128x128xf32>
    %cst_37 = arith.constant dense<0xFF800000> : vector<128xf32>
    %109 = vector.multi_reduction <maximumf>, %108, %cst_37 [1] : vector<128x128xf32> to vector<128xf32>
    %110 = vector.shape_cast %109 : vector<128xf32> to vector<128x1xf32>
    %111 = vector.broadcast %110 : vector<128x1xf32> to vector<128x128xf32>
    %112 = arith.subf %108, %111 : vector<128x128xf32>
    %113 = math.exp %112 : vector<128x128xf32>
    %cst_38 = arith.constant dense<0.000000e+00> : vector<128xf32>
    %114 = vector.multi_reduction <add>, %113, %cst_38 [1] : vector<128x128xf32> to vector<128xf32>
    %115 = vector.shape_cast %114 : vector<128xf32> to vector<128x1xf32>
    %116 = tpu.reciprocal %115 {approx = true} : vector<128x1xf32> -> vector<128x1xf32>
    %117 = vector.broadcast %116 : vector<128x1xf32> to vector<128x128xf32>
    %118 = arith.mulf %113, %117 : vector<128x128xf32>
    %119 = arith.truncf %118 : vector<128x128xf32> to vector<128x128xbf16>
    %120 = vector.extract_strided_slice %10 {offsets = [0, 640], sizes = [128, 128], strides = [1, 1]} : vector<128x896xf32> to vector<128x128xf32>
    %121 = arith.truncf %120 : vector<128x128xf32> to vector<128x128xbf16>
    %cst_39 = arith.constant dense<0.000000e+00> : vector<128x128xf32>
    %122 = tpu.matmul %119, %121, %cst_39 {dimension_numbers = #tpu.dot_dimension_numbers<[1], [0], [0], [1], [0, 0, 1, 1], [], []>} : vector<128x128xbf16>, vector<128x128xbf16>, vector<128x128xf32> -> vector<128x128xf32>
    %123 = arith.addf %99, %122 : vector<128x128xf32>
    %124 = arith.truncf %123 : vector<128x128xf32> to vector<128x128xbf16>
    %c0_40 = arith.constant 0 : index
    %c0_41 = arith.constant 0 : index
    %125 = vector.load %arg6[%c0_40, %c0_41] : memref<128x256xbf16, #tpu.memory_space<vmem>>, vector<128x256xbf16>
    %cst_42 = arith.constant dense<0.000000e+00> : vector<128x256xf32>
    %126 = tpu.matmul %124, %125, %cst_42 {dimension_numbers = #tpu.dot_dimension_numbers<[1], [0], [0], [1], [0, 0, 1, 1], [], []>} : vector<128x128xbf16>, vector<128x256xbf16>, vector<128x256xf32> -> vector<128x256xf32>
    %c0_43 = arith.constant 0 : index
    %c0_44 = arith.constant 0 : index
    %127 = vector.load %arg7[%c0_43, %c0_44] : memref<1x256xf32, #tpu.memory_space<vmem>>, vector<1x256xf32>
    %128 = vector.broadcast %127 : vector<1x256xf32> to vector<128x256xf32>
    %129 = arith.addf %126, %128 : vector<128x256xf32>
    %130 = vector.extract_strided_slice %129 {offsets = [0, 0], sizes = [8, 128], strides = [1, 1]} : vector<128x256xf32> to vector<8x128xf32>
    %131 = arith.truncf %130 : vector<8x128xf32> to vector<8x128xbf16>
    %132 = vector.extract_strided_slice %129 {offsets = [0, 128], sizes = [128, 128], strides = [1, 1]} : vector<128x256xf32> to vector<128x128xf32>
    %133 = arith.truncf %132 : vector<128x128xf32> to vector<128x128xbf16>
    %cst_45 = arith.constant dense<0.000000e+00> : vector<8x128xf32>
    %134 = tpu.matmul %131, %133, %cst_45 {dimension_numbers = #tpu.dot_dimension_numbers<[1], [1], [0], [0], [0, 0, 1, 0], [], []>} : vector<8x128xbf16>, vector<128x128xbf16>, vector<8x128xf32> -> vector<8x128xf32>
    %cst_46 = arith.constant -1.000000e+30 : f32
    %135 = vector.shape_cast %5 : vector<1x128xi1> to vector<1x128xi1>
    %136 = vector.broadcast %135 : vector<1x128xi1> to vector<8x128xi1>
    %137 = vector.broadcast %cst_46 : f32 to vector<8x128xf32>
    %138 = arith.select %136, %137, %134 : vector<8x128xi1>, vector<8x128xf32>
    %cst_47 = arith.constant dense<0xFF800000> : vector<8xf32>
    %139 = vector.multi_reduction <maximumf>, %138, %cst_47 [1] : vector<8x128xf32> to vector<8xf32>
    %140 = vector.shape_cast %139 : vector<8xf32> to vector<8x1xf32>
    %141 = vector.broadcast %140 : vector<8x1xf32> to vector<8x128xf32>
    %142 = arith.subf %138, %141 : vector<8x128xf32>
    %143 = math.exp %142 : vector<8x128xf32>
    %cst_48 = arith.constant dense<0.000000e+00> : vector<8xf32>
    %144 = vector.multi_reduction <add>, %143, %cst_48 [1] : vector<8x128xf32> to vector<8xf32>
    %145 = vector.shape_cast %144 : vector<8xf32> to vector<8x1xf32>
    %146 = vector.broadcast %145 : vector<8x1xf32> to vector<8x128xf32>
    %147 = arith.divf %143, %146 : vector<8x128xf32>
    %c0_49 = arith.constant 0 : index
    %c0_50 = arith.constant 0 : index
    %c0_51 = arith.constant 0 : index
    %148 = vector.load %arg10[%c0_49, %c0_50, %c0_51] : memref<1x8x128xf32, #tpu.memory_space<vmem>>, vector<1x8x128xf32>
    %149 = vector.shape_cast %148 : vector<1x8x128xf32> to vector<8x128xf32>
    %150 = vector.shape_cast %147 : vector<8x128xf32> to vector<1x8x128xf32>
    tpu.vector_store %arg10[%c0_49, %c0_50, %c0_51], %150 {strides = array<i32>} : memref<1x8x128xf32, #tpu.memory_space<vmem>>, vector<1x8x128xf32>,
    return
  }
  func.func @transform_0(%arg0: i32) -> (i32, i32, i32) {
    %c0_i32 = arith.constant 0 : i32
    %c0_i32_0 = arith.constant 0 : i32
    %c0_i32_1 = arith.constant 0 : i32
    return %arg0, %c0_i32, %c0_i32_0 : i32, i32, i32
  }
  func.func @transform_1(%arg0: i32) -> (i32, i32, i32) {
    %c0_i32 = arith.constant 0 : i32
    %c0_i32_0 = arith.constant 0 : i32
    %c0_i32_1 = arith.constant 0 : i32
    return %arg0, %c0_i32, %c0_i32_0 : i32, i32, i32
  }
  func.func @transform_2(%arg0: i32) -> (i32, i32) {
    %c0_i32 = arith.constant 0 : i32
    %c0_i32_0 = arith.constant 0 : i32
    %c0_i32_1 = arith.constant 0 : i32
    return %c0_i32, %c0_i32_0 : i32, i32
  }
  func.func @transform_3(%arg0: i32) -> (i32, i32) {
    %c0_i32 = arith.constant 0 : i32
    %c0_i32_0 = arith.constant 0 : i32
    %c0_i32_1 = arith.constant 0 : i32
    return %c0_i32, %c0_i32_0 : i32, i32
  }
  func.func @transform_4(%arg0: i32) -> (i32, i32) {
    %c0_i32 = arith.constant 0 : i32
    %c0_i32_0 = arith.constant 0 : i32
    %c0_i32_1 = arith.constant 0 : i32
    return %c0_i32, %c0_i32_0 : i32, i32
  }
  func.func @transform_5(%arg0: i32) -> (i32, i32) {
    %c0_i32 = arith.constant 0 : i32
    %c0_i32_0 = arith.constant 0 : i32
    %c0_i32_1 = arith.constant 0 : i32
    return %c0_i32, %c0_i32_0 : i32, i32
  }
  func.func @transform_6(%arg0: i32) -> (i32, i32) {
    %c0_i32 = arith.constant 0 : i32
    %c0_i32_0 = arith.constant 0 : i32
    %c0_i32_1 = arith.constant 0 : i32
    return %c0_i32, %c0_i32_0 : i32, i32
  }
  func.func @transform_7(%arg0: i32) -> (i32, i32) {
    %c0_i32 = arith.constant 0 : i32
    %c0_i32_0 = arith.constant 0 : i32
    %c0_i32_1 = arith.constant 0 : i32
    return %c0_i32, %c0_i32_0 : i32, i32
  }
  func.func @transform_8(%arg0: i32) -> (i32, i32) {
    %c0_i32 = arith.constant 0 : i32
    %c0_i32_0 = arith.constant 0 : i32
    %c0_i32_1 = arith.constant 0 : i32
    return %c0_i32, %c0_i32_0 : i32, i32
  }
  func.func @transform_9(%arg0: i32) -> (i32, i32, i32) {
    %c0_i32 = arith.constant 0 : i32
    %c0_i32_0 = arith.constant 0 : i32
    %c0_i32_1 = arith.constant 0 : i32
    return %arg0, %c0_i32, %c0_i32_0 : i32, i32, i32
  }
  func.func @transform_10(%arg0: i32) -> (i32, i32, i32) {
    %c0_i32 = arith.constant 0 : i32
    %c0_i32_0 = arith.constant 0 : i32
    %c0_i32_1 = arith.constant 0 : i32
    return %arg0, %c0_i32, %c0_i32_0 : i32, i32, i32
  }
}

</mosaic_0001>

<bundles_post_ra>
// kernel: tpu_custom_call.1
= control target key start
LH: loop header
LB: loop body
LE: loop exit
PB: predicated region body
PF: predicated region fallthrough
CT: control target
= control target key end

     0   :  { %s7064_s0 = inlined_call_operand.hbm [shape: s32[2,1,128], index: 0, kind: input, shape index: {}]   ;;  %s7065_s1 = inlined_call_operand.hbm [shape: bf16[2,128,128], index: 1, kind: input, shape index: {}]   ;;  %s7066_s2 = inlined_call_operand.hbm [shape: bf16[128,896], index: 2, kind: input, shape index: {}]   ;;  %s7067_s3 = inlined_call_operand.vmem [shape: f32[1,896], index: 3, kind: input, shape index: {}]   ;;  %s7068_s4 = inlined_call_operand.vmem [shape: f32[1,128], index: 4, kind: input, shape index: {}]   ;;  %s7069_s5 = inlined_call_operand.hbm [shape: bf16[128,256], index: 5, kind: input, shape index: {}]   ;;  %s7070_s6 = inlined_call_operand.vmem [shape: f32[1,256], index: 6, kind: input, shape index: {}]   ;;  %s7071_s7 = inlined_call_operand.hbm [shape: bf16[128,128], index: 7, kind: input, shape index: {}]   ;;  %s7072_s8 = inlined_call_operand.vmem [shape: f32[1,128], index: 8, kind: input, shape index: {}]   ;;  %s7073_s9 = inlined_call_operand.hbm [shape: f32[2,8,128], index: 9, kind: output, shape index: {0}]   ;;  %s7074_s10 = inlined_call_operand.hbm [shape: f32[2,8,128], index: 10, kind: output, shape index: {1}]  }
   0x1   :  { %7135 = sst [smem:[#allocation60_spill]] %s7064_s0 }
   0x2   :  { %7136 = sst [smem:[#allocation61_spill]] %s7066_s2 }
   0x3   :  { %7137 = sst [smem:[#allocation62_spill]] %s7069_s5 }
   0x4   :  { %7138 = sst [smem:[#allocation63_spill]] %s7073_s9 }
   0x5   :  { %16 = vsyncpa [#allocation3], 0 }
   0x6   :  { %18 = vsyncpa [#allocation3 + $0x1], 0 }
   0x7   :  { %19 = vsyncpa [#allocation6], 0 }
   0x8   :  { %21 = vsyncpa [#allocation6 + $0x1], 0 }
   0x9   :  { %22 = vsyncpa [#allocation9], 0 }
   0xa   :  { %23 = vsyncpa [#allocation4], 0 }
   0xb   :  { %25 = vsyncpa [#allocation4 + $0x1], 0 }
   0xc   :  { %26 = vsyncpa [#allocation13], 0 }
   0xd   :  { %28 = vsyncpa [#allocation13 + $0x1], 0  ;;  %s5349_s13 = smov 0   ;;  %s5351_s14 = smov 0  }
   0xe   :  { %s5353_s15 = smov 0   ;;  %s5355_s16 = smov 0  }
   0xf LB: > { %7139 = sst [smem:[#allocation20_spill]] %s5261_s13  ;;  %s5370_s17 = sadd.s32 4294967295, %s5273_s16   ;;  %s5273_s16 = sphi %s5355_s16, %s7251_s16   ;;  %s5269_s15 = sphi %s5353_s15, %s7250_s15   ;;  %s5265_s14 = sphi %s5351_s14, %s7249_s14   ;;  %s5261_s13 = sphi %s5349_s13, %s7248_s13  }
  0x10   : > { %s3791_s18 = sadd.s32 4294967294, %s5273_s16   ;;  %p54_p0 = scmp.ne.s32.totalorder %s5265_s14, %s5261_s13 }
  0x11   : > { %p7075_p1 = scmp.eq.s32.totalorder %s5370_s17, 0  ;;  %p257_p3 = scmp.eq.s32.totalorder %s3791_s18, 1 }
  0x12   : > { %p3792_p5 = scmp.ge.s32.totalorder %s5273_s16, 1  ;;  %p290_p7 = scmp.lt.s32.totalorder %s5273_s16, 3 }
  0x13   : > { %p5379_p4 = por %p7075_p1, %p54_p0  ;;  %p5384_p6 = por %p257_p3, %p54_p0 }
  0x14   : > { %p5389_p8 = pnand %p3792_p5, %p290_p7  ;;  %s5275_s22 = smov [#allocation7]  }
  0x15   : > { %s7140_s19 = scalar_select %p5379_p4, 1, 0 }
  0x16   : > { %s7141_s20 = scalar_select %p5384_p6, 1, 0 }
  0x17   : > { %s7143_s21 = scalar_select %p5389_p8, 1, 0 }
  0x18   : > { %7142 = sst [smem:[#allocation21_spill]] %s7141_s20  ;;  %s302_s23 = sshll.u32 %s5275_s22, 4  ;;  %s5393_s23 = int_to_ptr.vmem [resolvable:$true] %s302_s23 }
  0x19   : > { %p4559_p9 = pneg %p5389_p8  ;;  %s5276_s25 = smov [#allocation8]  }
  0x1a   : > { %s321_s26 = sshll.u32 %s5276_s25, 4  ;;  %s7145_s2 = sld [smem:[#allocation61_spill]]  ;;  %s5404_s26 = int_to_ptr.vmem [resolvable:$true] %s321_s26 }
  0x1b   : > { %p5400_p11 = pnand %p4559_p9, %p7075_p1 }
  0x1d   : > { %p5414_p13 = pneg %p5400_p11 }
  0x20   : > { %s5019_s29 = scalar_lea.hbm %s7145_s2, 7168 }
  0x21   : > { %p5020_p12 = scmp.ne.s32.totalorder %s7145_s2, %s5019_s29  ;;  %p5026_p5 = scmp.lt.u32.totalorder %s5019_s29, %s7145_s2 }
  0x23   : > { %p5022_p0 = pnand %p5414_p13, %p5020_p12 }
  0x25   : > { %p5023_p3 = pneg %p5022_p0 }
  0x27   : > { %p5028_p7 = pnand %p5026_p5, %p5023_p3 }
  0x29   : > { %5031 = shalt.err (!%p5028_p7)
}
  0x2a   : > { %s5032_s25 = scalar_lea.vmem %s5393_s23, 7168  ;;  %p5040_p2 = scmp.lt.s32.totalorder %s5393_s23, %s5393_s23 }
  0x2b   : > { %p5033_p9 = scmp.ne.s32.totalorder %s5393_s23, %s5032_s25  ;;  %p5041_p6 = scmp.lt.s32.totalorder %s5032_s25, %s5032_s25 }
  0x2d   : > { %p5035_p10 = pnand %p5033_p9, %p5414_p13  ;;  %p5042_p12 = por %p5041_p6, %p5040_p2 }
  0x2f   : > { %p5036_p1 = pneg %p5035_p10 }
  0x31   : > { %p5043_p0 = pnand %p5042_p12, %p5036_p1 }
  0x33   : > { %5046 = shalt.err (!%p5043_p0)
}
  0x34   : > { %s5277_s27 = smov 448   ;;  %s5278_s28 = smov 28  }
  0x35   : > { %4562 = dma.hbm_to_vmem [thread:$0]  (!%p5400_p11), %s7145_s2, 7168, %s5393_s23, [#allocation6], %s5277_s27, %s5277_s27, %s5278_s28  }
  0x36   : > { %s7147_s5 = sld [smem:[#allocation62_spill]] }
  0x3c   : > { %s5047_s22 = scalar_lea.hbm %s7147_s5, 2048 }
  0x3d   : > { %p5048_p2 = scmp.ne.s32.totalorder %s7147_s5, %s5047_s22  ;;  %p5054_p10 = scmp.lt.u32.totalorder %s5047_s22, %s7147_s5 }
  0x3f   : > { %p5050_p1 = pnand %p5048_p2, %p5414_p13 }
  0x41   : > { %p5051_p6 = pneg %p5050_p1 }
  0x43   : > { %p5056_p3 = pnand %p5054_p10, %p5051_p6 }
  0x45   : > { %5059 = shalt.err (!%p5056_p3)
}
  0x46   : > { %s5060_s23 = scalar_lea.vmem %s5404_s26, 2048  ;;  %p5068_p12 = scmp.lt.s32.totalorder %s5404_s26, %s5404_s26 }
  0x47   : > { %p5061_p5 = scmp.ne.s32.totalorder %s5404_s26, %s5060_s23  ;;  %p5069_p0 = scmp.lt.s32.totalorder %s5060_s23, %s5060_s23 }
  0x49   : > { %p5063_p7 = pnand %p5061_p5, %p5414_p13  ;;  %p5070_p2 = por %p5069_p0, %p5068_p12 }
  0x4b   : > { %p5064_p9 = pneg %p5063_p7 }
  0x4d   : > { %p5071_p1 = pnand %p5070_p2, %p5064_p9 }
  0x4f   : > { %5074 = shalt.err (!%p5071_p1)
}
  0x50   : > { %s5279_s13 = smov 128   ;;  %s5280_s9 = smov 8  }
  0x51   : > { %4565 = dma.hbm_to_vmem [thread:$0]  (!%p5400_p11), %s7147_s5, 2048, %s5404_s26, [#allocation9], %s5279_s13, %s5279_s13, %s5280_s9  }
  0x52   : > { %s5281_s28 = smov [#allocation10]   ;;  %s5075_s18 = scalar_lea.hbm %s7071_s7, 1024 }
  0x53   : > { %s337_s29 = sshll.u32 %s5281_s28, 4  ;;  %p5076_p6 = scmp.ne.s32.totalorder %s7071_s7, %s5075_s18  ;;  %s338_s29 = int_to_ptr.vmem [resolvable:$true] %s337_s29 }
  0x54   : > { %p5082_p5 = scmp.lt.u32.totalorder %s5075_s18, %s7071_s7 }
  0x55   : > { %p5078_p10 = pnand %p5076_p6, %p5414_p13 }
  0x57   : > { %p5079_p3 = pneg %p5078_p10 }
  0x59   : > { %p5084_p7 = pnand %p5082_p5, %p5079_p3 }
  0x5b   : > { %5087 = shalt.err (!%p5084_p7)
}
  0x5c   : > { %s5088_s26 = scalar_lea.vmem %s338_s29, 1024  ;;  %p5096_p2 = scmp.lt.s32.totalorder %s338_s29, %s338_s29 }
  0x5d   : > { %p5089_p9 = scmp.ne.s32.totalorder %s338_s29, %s5088_s26  ;;  %p5097_p1 = scmp.lt.s32.totalorder %s5088_s26, %s5088_s26 }
  0x5f   : > { %p5091_p12 = pnand %p5089_p9, %p5414_p13  ;;  %p5098_p4 = por %p5097_p1, %p5096_p2 }
  0x61   : > { %p5092_p0 = pneg %p5091_p12 }
  0x63   : > { %p5099_p8 = pnand %p5098_p4, %p5092_p0 }
  0x65   : > { %5102 = shalt.err (!%p5099_p8)
}
  0x66   : > { %s7081_s13 = smov 64   ;;  %s7082_s2 = smov 4  }
  0x67   : > { %4568 = dma.hbm_to_vmem [thread:$0]  (!%p5400_p11), %s7071_s7, 1024, %s338_s29, [#allocation9], %s7081_s13, %s7081_s13, %s7082_s2  }
  0x68   : > { %s5480_s20 = sadd.s32 1, %s5273_s16   ;;  %s41_s28 = sadd.s32 1, %s5269_s15 }
  0x69   : > { %s38_s27 = ssub.s32 %s5273_s16, %s5480_s20  ;;  %p48_p8 = scmp.ne.s32.totalorder %s5269_s15, %s5265_s14 }
  0x6a   : > { %p39_p4 = scmp.eq.s32.totalorder %s38_s27, 0  ;;  %p49_p13 = scmp.eq.s32.totalorder %s5273_s16, 0 }
  0x6b   : > { %p4586_p6 = scmp.lt.s32.totalorder %s5273_s16, 2  ;;  %p7148_p3 = scmp.eq.s32.totalorder %s5370_s17, 1 }
  0x6c   : > { %s5490_s30 = scalar_select %p39_p4, %s5269_s15, %s41_s28  }
  0x6d   : > { %p50_p10 = por %p49_p13, %p48_p8  ;;  %p5494_p5 = por %p7148_p3, %p48_p8 }
  0x6e   : > { %s5499_s11 = sand.u32 1, %s5269_s15   ;;  %s3797_s29 = sshll.u32 %s5273_s16, 4 }
  0x6f   : > { %s7150_s0 = sld [smem:[#allocation60_spill]]  ;;  %s357_s23 = scalar_lea.vmem [#allocation2], %s5499_s11 }
  0x70   : > { %s364_s26 = sshll.u32 %s357_s23, 4  ;;  %p5510_p11 = pnand %p4586_p6, %p50_p10  ;;  %s5508_s26 = int_to_ptr.vmem [resolvable:$true] %s364_s26 }
  0x71   : > { %s3798_s9 = sshll.u32 %s5499_s11, 6  ;;  %s355_s28 = scalar_lea.sflag [#allocation3], %s5499_s11 }
  0x72   : > { %p5105_p9 = pneg %p5510_p11 }
  0x75   : > { %s5505_s25 = scalar_lea.hbm %s7150_s0, %s3797_s29  ;;  %s5108_s23 = scalar_lea.hbm %s7150_s0, 32 }
  0x76   : > { %s5103_s18 = scalar_lea.hbm %s5505_s25, 16  ;;  %p5109_p2 = scmp.lt.u32.totalorder %s5505_s25, %s7150_s0 }
  0x77   : > { %p5104_p7 = scmp.ne.s32.totalorder %s5505_s25, %s5103_s18  ;;  %p5110_p1 = scmp.lt.u32.totalorder %s5108_s23, %s5103_s18 }
  0x78   : > { %p5112_p8 = scmp.lt.u32.totalorder %s5103_s18, %s5505_s25 }
  0x79   : > { %p5106_p12 = pnand %p5105_p9, %p5104_p7  ;;  %p5111_p4 = por %p5110_p1, %p5109_p2 }
  0x7b   : > { %p5107_p0 = pneg %p5106_p12  ;;  %p5113_p13 = por %p5112_p8, %p5111_p4 }
  0x7d   : > { %p5114_p6 = pnand %p5113_p13, %p5107_p0 }
  0x7f   : > { %5117 = shalt.err (!%p5114_p6)
}
  0x80   : > { %s5118_s27 = scalar_lea.vmem %s5508_s26, 16  ;;  %s5284_s29 = smov [#allocation2]  }
  0x81   : > { %p5119_p10 = scmp.ne.s32.totalorder %s5508_s26, %s5118_s27  ;;  %s5123_s22 = sshll.u32 %s5284_s29, 4  ;;  %s5124_s22 = int_to_ptr.vmem [resolvable:$false] %s5123_s22 }
  0x82   : > { %s5125_s13 = scalar_lea.vmem %s5124_s22, 32  ;;  %p5126_p12 = scmp.lt.s32.totalorder %s5508_s26, %s5124_s22 }
  0x83   : > { %p5121_p3 = pnand %p5119_p10, %p5105_p9  ;;  %p5127_p2 = scmp.lt.s32.totalorder %s5125_s13, %s5118_s27 }
  0x85   : > { %p5122_p7 = pneg %p5121_p3  ;;  %p5128_p1 = por %p5127_p2, %p5126_p12 }
  0x87   : > { %p5129_p4 = pnand %p5128_p1, %p5122_p7 }
  0x89   : > { %5132 = shalt.err (!%p5129_p4)
}
  0x8a   : > { %4572 = dma.hbm_to_vmem [thread:$0]  (!%p5510_p11), %s5505_s25, 16, %s5508_s26, %s355_s28  }
  0x8b   : > { %s375_s2 = scalar_lea.vmem [#allocation5], %s3798_s9  ;;  %s3936_s23 = sshll.u32 %s5273_s16, 10 }
  0x8c   : > { %s382_s18 = sshll.u32 %s375_s2, 4  ;;  %s5550_s22 = scalar_lea.hbm %s7065_s1, %s3936_s23  ;;  %s5544_s18 = int_to_ptr.vmem [resolvable:$true] %s382_s18 }
  0x8d   : > { %s7152_s13 = sand.u32 1, %s5273_s16   ;;  %s5133_s5 = scalar_lea.hbm %s5550_s22, 1024 }
  0x8e   : > { %s5554_s0 = scalar_lea.sflag [#allocation6], %s7152_s13  ;;  %p5134_p0 = scmp.ne.s32.totalorder %s5550_s22, %s5133_s5 }
  0x8f   : > { %s5138_s26 = scalar_lea.hbm %s7065_s1, 2048  ;;  %p5139_p6 = scmp.lt.u32.totalorder %s5550_s22, %s7065_s1 }
  0x90   : > { %p5136_p8 = pnand %p5134_p0, %p5105_p9  ;;  %p5140_p10 = scmp.lt.u32.totalorder %s5138_s26, %s5133_s5 }
  0x91   : > { %p5142_p7 = scmp.lt.u32.totalorder %s5133_s5, %s5550_s22 }
  0x92   : > { %p5137_p13 = pneg %p5136_p8  ;;  %p5141_p3 = por %p5140_p10, %p5139_p6 }
  0x94   : > { %p5143_p12 = por %p5142_p7, %p5141_p3 }
  0x96   : > { %p5144_p2 = pnand %p5143_p12, %p5137_p13 }
  0x98   : > { %5147 = shalt.err (!%p5144_p2)
}
  0x99   : > { %s5148_s2 = scalar_lea.vmem %s5544_s18, 1024  ;;  %s5285_s23 = smov [#allocation5]  }
  0x9a   : > { %p5149_p1 = scmp.ne.s32.totalorder %s5544_s18, %s5148_s2  ;;  %s5153_s29 = sshll.u32 %s5285_s23, 4  ;;  %s5154_s29 = int_to_ptr.vmem [resolvable:$false] %s5153_s29 }
  0x9b   : > { %s5155_s27 = scalar_lea.vmem %s5154_s29, 2048  ;;  %p5156_p8 = scmp.lt.s32.totalorder %s5544_s18, %s5154_s29 }
  0x9c   : > { %p5151_p4 = pnand %p5149_p1, %p5105_p9  ;;  %p5157_p6 = scmp.lt.s32.totalorder %s5155_s27, %s5148_s2 }
  0x9e   : > { %p5152_p0 = pneg %p5151_p4  ;;  %p5158_p10 = por %p5157_p6, %p5156_p8 }
  0xa0   : > { %p5159_p3 = pnand %p5158_p10, %p5152_p0 }
  0xa2   : > { %5162 = shalt.err (!%p5159_p3)
}
  0xa3   : > { %s7153_s5 = smov 4   ;;  %s7154_s13 = smov 64  }
  0xa4   : > { %4575 = dma.hbm_to_vmem [thread:$0]  (!%p5510_p11), %s5550_s22, 1024, %s5544_s18, %s5554_s0, %s7154_s13, %s7154_s13, %s7153_s5  }
  0xa5   : > { %p7155_p9 = scmp.ne.s32.totalorder %s7143_s21, 0 }
  0xa7   : > { %394 = sbr.rel (%p7155_p9) target bundleno = 2876 (0xb3c), region = 56 }
  0xae   : > { %s5586_s11 = sand.u32 1, %s5265_s14   ;;  %p7156_p13 = scmp.ne.s32.totalorder %s7140_s19, 0 }
  0xaf   : > { %s397_s25 = scalar_lea.sflag [#allocation3], %s5586_s11  ;;  %s399_s26 = scalar_lea.vmem [#allocation2], %s5586_s11 }
  0xb0   : > { %5236 = dma.done.wait (%p7156_p13), %s397_s25, 16  }
  0xb1   : > { %5238 = vsyncadd (%p7156_p13), %s397_s25, 4294967280  ;;  %s404_s0 = sand.u32 1, %s5370_s17   ;;  %s3802_s12 = sshll.u32 %s5586_s11, 6 }
  0xb2   : > { %s405_s21 = scalar_lea.sflag [#allocation6], %s404_s0  ;;  %s5596_s18 = scalar_lea.vmem [#allocation5], %s3802_s12 }
  0xb3   : > { %5240 = dma.done.wait (%p7156_p13), %s405_s21, 1024  }
  0xb4   : > { %5242 = vsyncadd (%p7156_p13), %s405_s21, 4294966272  ;;  %p7157_p11 = scmp.eq.s32.totalorder %s5370_s17, 0 }
  0xb6   : > { %5244 = dma.done.wait (%p7157_p11), [#allocation6], 7168   ;;  %p7158_p7 = pmov %p7157_p11 }
  0xb8   : > { %5246 = vsyncadd (%p7158_p7), [#allocation6], 4294960128  ;;  %p7159_p12 = pmov %p7158_p7 }
  0xb9   : > { %p7160_p2 = pmov %p7158_p7 }
  0xba   : > { %5248 = dma.done.wait (%p7159_p12), [#allocation9], 3072  }
  0xbb   : > { %5250 = vsyncadd (%p7160_p2), [#allocation9], 4294964224  ;;  %v7084_v0 = vmov 0   ;;  %v4638_v1 = vld [vmem:[#allocation7 + $0x4] ss:$28 sps:$4 sm:$0xff]   ;;  %v5623_v24 = vld [vmem:[%s5596_s18 + $0x8] sm:$0xff]   ;;  %v551_v41 = vlaneseq }
  0xbc   : > { %954 = vmatprep.mubr.bf16.mxu0 %v7084_v0  ;;  %994 = vmatprep.mubr.bf16.mxu1 %v7084_v0  ;;  %v4640_v2 = vld [vmem:[#allocation7] ss:$28 sps:$4 sm:$0xff]   ;;  %v4643_v4 = vld [vmem:[#allocation7 + $0x38] ss:$28 sps:$4 sm:$0xff]   ;;  %v4646_v6 = vld [vmem:[#allocation7 + $0x70] ss:$28 sps:$4 sm:$0xff]  }
  0xbd   : > { %922 = vmatprep.subr.bf16.mxu0 %v4638_v1  ;;  %4427 = vmatprep.subr.bf16.mxu1 %v4638_v1  ;;  %v4641_v3 = vld [vmem:[#allocation7 + $0x3c] ss:$28 sps:$4 sm:$0xff]   ;;  %v4644_v5 = vld [vmem:[#allocation7 + $0x74] ss:$28 sps:$4 sm:$0xff]   ;;  %v4647_v7 = vld [vmem:[#allocation7 + $0xac] ss:$28 sps:$4 sm:$0xff]  }
  0xbe   : > { %923 = vmatpush1.bf16.msra.mxu0 %v4640_v2  ;;  %4435 = vmatpush1.bf16.msra.mxu1 %v4640_v2  ;;  %v4649_v8 = vld [vmem:[#allocation7 + $0xa8] ss:$28 sps:$4 sm:$0xff]   ;;  %v4652_v10 = vld [vmem:[#allocation7 + $0xe0] ss:$28 sps:$4 sm:$0xff]   ;;  %v4655_v12 = vld [vmem:[#allocation7 + $0x118] ss:$28 sps:$4 sm:$0xff]  }
  0xbf   : > { %924 = vmatprep.subr.bf16.mxu0 %v4641_v3  ;;  %4428 = vmatprep.subr.bf16.mxu1 %v4641_v3  ;;  %v4650_v9 = vld [vmem:[#allocation7 + $0xe4] ss:$28 sps:$4 sm:$0xff]   ;;  %v4653_v11 = vld [vmem:[#allocation7 + $0x11c] ss:$28 sps:$4 sm:$0xff]   ;;  %v4656_v13 = vld [vmem:[#allocation7 + $0x154] ss:$28 sps:$4 sm:$0xff]  }
  0xc0   : > { %v4658_v14 = vld [vmem:[#allocation7 + $0x150] ss:$28 sps:$4 sm:$0xff]   ;;  %v4661_v16 = vld [vmem:[#allocation7 + $0x188] ss:$28 sps:$4 sm:$0xff]   ;;  %v4676_v26 = vld [vmem:[#allocation7 + $0x80] ss:$28 sps:$4 sm:$0xff]  }
  0xc1   : > { %v4659_v15 = vld [vmem:[#allocation7 + $0x18c] ss:$28 sps:$4 sm:$0xff]   ;;  %v4672_v17 = vld [vmem:[#allocation7 + $0x14] ss:$28 sps:$4 sm:$0xff]   ;;  %v5613_v18 = vld [vmem:[%s5596_s18] sm:$0xff]   ;;  %v5667_v42 = vshrl.u32 %v551_v41, 7 }
  0xc2   : > { %925 = vmatpush1.bf16.msra.mxu0 %v4643_v4  ;;  %4436 = vmatpush1.bf16.msra.mxu1 %v4643_v4  ;;  %v5616_v19 = vld [vmem:[%s5596_s18 + $0x20] sm:$0xff]   ;;  %v4670_v20 = vld [vmem:[#allocation7 + $0x10] ss:$28 sps:$4 sm:$0xff]   ;;  %v4681_v27 = vld [vmem:[#allocation7 + $0xbc] ss:$28 sps:$4 sm:$0xff]   ;;  %vm1474_vm0 = vcmask 64512  }
  0xc3   : > { %926 = vmatprep.subr.bf16.mxu0 %v4644_v5  ;;  %4429 = vmatprep.subr.bf16.mxu1 %v4644_v5  ;;  %v4675_v21 = vld [vmem:[#allocation7 + $0x4c] ss:$28 sps:$4 sm:$0xff]   ;;  %v4678_v23 = vld [vmem:[#allocation7 + $0x84] ss:$28 sps:$4 sm:$0xff]   ;;  %v4679_v28 = vld [vmem:[#allocation7 + $0xb8] ss:$28 sps:$4 sm:$0xff]  }
  0xc4   : > { %v4673_v22 = vld [vmem:[#allocation7 + $0x48] ss:$28 sps:$4 sm:$0xff]   ;;  %v4684_v29 = vld [vmem:[#allocation7 + $0xf4] ss:$28 sps:$4 sm:$0xff]   ;;  %v5643_v36 = vld [vmem:[%s5596_s18 + $0x18] sm:$0xff]   ;;  %7161 = vst [vmem:[#allocation22_spill] sm:$0xff] %v5667_v42 }
  0xc5   : > { %v5626_v25 = vld [vmem:[%s5596_s18 + $0x28] sm:$0xff]   ;;  %v5633_v30 = vld [vmem:[%s5596_s18 + $0x10] sm:$0xff]   ;;  %v4690_v35 = vld [vmem:[#allocation7 + $0x164] ss:$28 sps:$4 sm:$0xff]   ;;  %v5670_v43 = vsub.s32 0, %v5667_v42  ;;  %v7083_v45 = vsub.s32 1, %v5667_v42 }
  0xc6   : > { %927 = vmatpush1.bf16.msra.mxu0 %v4646_v6  ;;  %4437 = vmatpush1.bf16.msra.mxu1 %v4646_v6  ;;  %v5636_v31 = vld [vmem:[%s5596_s18 + $0x30] sm:$0xff]   ;;  %v4687_v33 = vld [vmem:[#allocation7 + $0x12c] ss:$28 sps:$4 sm:$0xff]   ;;  %v5646_v37 = vld [vmem:[%s5596_s18 + $0x38] sm:$0xff]   ;;  %s5287_s9 = smov 120   ;;  %s5288_s28 = smov 112  }
  0xc7   : > { %928 = vmatprep.subr.bf16.mxu0 %v4647_v7  ;;  %4430 = vmatprep.subr.bf16.mxu1 %v4647_v7  ;;  %v4682_v32 = vld [vmem:[#allocation7 + $0xf0] ss:$28 sps:$4 sm:$0xff]   ;;  %v4685_v34 = vld [vmem:[#allocation7 + $0x128] ss:$28 sps:$4 sm:$0xff]   ;;  %v4688_v38 = vld [vmem:[#allocation7 + $0x160] ss:$28 sps:$4 sm:$0xff]  }
  0xc8   : > { %v4693_v39 = vld [vmem:[#allocation7 + $0x19c] ss:$28 sps:$4 sm:$0xff]   ;;  %7162 = vst [vmem:[#allocation23_spill] sm:$0xff] %v5670_v43  ;;  %s5289_s2 = smov 104   ;;  %vm5291_vm3 = vmmov 0   ;;  %s3806_s27 = sshll.u32 %s5586_s11, 3 }
  0xc9   : > { %v4691_v40 = vld [vmem:[#allocation7 + $0x198] ss:$28 sps:$4 sm:$0xff]   ;;  %s6527_s25 = scalar_lea.vmem [#allocation12], %s3806_s27  ;;  %s3932_s18 = sshll.u32 %s5370_s17, 7 }
  0xca   : > { %929 = vmatpush1.bf16.msra.mxu0 %v4649_v8  ;;  %4438 = vmatpush1.bf16.msra.mxu1 %v4649_v8  ;;  %v5675_v44 = vld [vmem:[%s7067_s3] sm:$0xff]  ;;  %s5292_s29 = smov [#allocation12]  }
  0xcb   : > { %930 = vmatprep.subr.bf16.mxu0 %v4650_v9  ;;  %4431 = vmatprep.subr.bf16.mxu1 %v4650_v9  ;;  %v5680_v46 = vrot.slane %v5675_v44, %v5670_v43  ;;  %v5685_v48 = vrot.slane %v5675_v44, %v7083_v45  ;;  %s5167_s5 = sshll.u32 %s5292_s29, 4  ;;  %s5168_s5 = int_to_ptr.vmem [resolvable:$false] %s5167_s5 }
  0xcc   : > { %s5169_s13 = scalar_lea.vmem %s5168_s5, 256 }
  0xce   : > { %931 = vmatpush1.bf16.msra.mxu0 %v4652_v10  ;;  %4439 = vmatpush1.bf16.msra.mxu1 %v4652_v10 }
  0xcf   : > { %932 = vmatprep.subr.bf16.mxu0 %v4653_v11  ;;  %4432 = vmatprep.subr.bf16.mxu1 %v4653_v11 }
  0xd2   : > { %933 = vmatpush1.bf16.msra.mxu0 %v4655_v12  ;;  %4440 = vmatpush1.bf16.msra.mxu1 %v4655_v12 }
  0xd3   : > { %934 = vmatprep.subr.bf16.mxu0 %v4656_v13  ;;  %4433 = vmatprep.subr.bf16.mxu1 %v4656_v13 }
  0xd6   : > { %935 = vmatpush1.bf16.msra.mxu0 %v4658_v14  ;;  %4441 = vmatpush1.bf16.msra.mxu1 %v4658_v14 }
  0xd7   : > { %936 = vmatprep.subr.bf16.mxu0 %v4659_v15  ;;  %4434 = vmatprep.subr.bf16.mxu1 %v4659_v15 }
  0xda   : > { %937 = vmatpush1.bf16.msra.mxu0 %v4661_v16  ;;  %4442 = vmatpush1.bf16.msra.mxu1 %v4661_v16 }
  0xdb   : > { %1148 = vmatprep.subr.bf16.mxu0 %v4672_v17 }
  0xdd   : > { %955 = vmatmul.mubr.bf16.vlgmr.msra.gmra.mrb[0].mxu0 %v5613_v18  ;;  %995 = vmatmul.mubr.bf16.vlgmr.msra.gmra.mrb[0].mxu1 %v5616_v19 }
  0xde   : > { %964 = vmatprep.mubr.bf16.mxu0 %v7084_v0  ;;  %1004 = vmatprep.mubr.bf16.mxu1 %v7084_v0 }
  0xdf   : > { %1149 = vmatpush1.bf16.msra.mxu0 %v4670_v20 }
  0xe0   : > { %1150 = vmatprep.subr.bf16.mxu0 %v4675_v21 }
  0xe3   : > { %1151 = vmatpush1.bf16.msra.mxu0 %v4673_v22 }
  0xe4   : > { %1152 = vmatprep.subr.bf16.mxu0 %v4678_v23 }
  0xe5   : > { %965 = vmatmul.mubr.bf16.gmra.mrb[4].mxu0 %v5623_v24  ;;  %1005 = vmatmul.mubr.bf16.gmra.mrb[4].mxu1 %v5626_v25 }
  0xe6   : > { %974 = vmatprep.mubr.bf16.mxu0 %v7084_v0  ;;  %1014 = vmatprep.mubr.bf16.mxu1 %v7084_v0 }
  0xe7   : > { %1153 = vmatpush1.bf16.msra.mxu0 %v4676_v26 }
  0xe8   : > { %1154 = vmatprep.subr.bf16.mxu0 %v4681_v27 }
  0xeb   : > { %1155 = vmatpush1.bf16.msra.mxu0 %v4679_v28 }
  0xec   : > { %1156 = vmatprep.subr.bf16.mxu0 %v4684_v29 }
  0xed   : > { %975 = vmatmul.mubr.bf16.gmra.mrb[8].mxu0 %v5633_v30  ;;  %1015 = vmatmul.mubr.bf16.gmra.mrb[8].mxu1 %v5636_v31 }
  0xee   : > { %984 = vmatprep.mubr.bf16.mxu0 %v7084_v0  ;;  %1024 = vmatprep.mubr.bf16.mxu1 %v7084_v0 }
  0xef   : > { %1157 = vmatpush1.bf16.msra.mxu0 %v4682_v32 }
  0xf0   : > { %1158 = vmatprep.subr.bf16.mxu0 %v4687_v33 }
  0xf3   : > { %1159 = vmatpush1.bf16.msra.mxu0 %v4685_v34 }
  0xf4   : > { %1160 = vmatprep.subr.bf16.mxu0 %v4690_v35 }
  0xf5   : > { %985 = vmatmul.mubr.bf16.gmra.mrb[12].mxu0 %v5643_v36  ;;  %1025 = vmatmul.mubr.bf16.gmra.mrb[12].mxu1 %v5646_v37 }
  0xf6   : > { %1180 = vmatprep.mubr.bf16.mxu0 %v7084_v0  ;;  %1067 = vmatprep.mubr.bf16.mxu1 %v7084_v0 }
  0xf7   : > { %1161 = vmatpush1.bf16.msra.mxu0 %v4688_v38 }
  0xf8   : > { %1162 = vmatprep.subr.bf16.mxu0 %v4693_v39 }
  0xfb   : > { %1163 = vmatpush1.bf16.msra.mxu0 %v4691_v40 }
  0xfe   : > { %1181 = vmatmul.mubr.bf16.vlgmr.msra.gmra.mrb[16].mxu0 %v5613_v18 }
  0xff   : > { %1190 = vmatprep.mubr.bf16.mxu0 %v7084_v0 }
 0x106   : > { %1191 = vmatmul.mubr.bf16.gmra.mrb[20].mxu0 %v5623_v24 }
 0x107   : > { %1200 = vmatprep.mubr.bf16.mxu0 %v7084_v0 }
 0x10e   : > { %1201 = vmatmul.mubr.bf16.gmra.mrb[24].mxu0 %v5633_v30 }
 0x10f   : > { %1210 = vmatprep.mubr.bf16.mxu0 %v7084_v0 }
 0x116   : > { %1211 = vmatmul.mubr.bf16.gmra.mrb[28].mxu0 %v5643_v36 }
 0x117   : > { %1220 = vmatprep.mubr.bf16.mxu0 %v7084_v0 }
 0x11e   : > { %1221 = vmatmul.mubr.bf16.gmra.mrb[32].mxu0 %v5616_v19 }
 0x11f   : > { %1230 = vmatprep.mubr.bf16.mxu0 %v7084_v0 }
 0x126   : > { %1231 = vmatmul.mubr.bf16.gmra.mrb[36].mxu0 %v5626_v25 }
 0x127   : > { %1240 = vmatprep.mubr.bf16.mxu0 %v7084_v0 }
 0x12e   : > { %1241 = vmatmul.mubr.bf16.gmra.mrb[40].mxu0 %v5636_v31 }
 0x12f   : > { %1250 = vmatprep.mubr.bf16.mxu0 %v7084_v0 }
 0x136   : > { %1251 = vmatmul.mubr.bf16.gmra.mrb[44].mxu0 %v5646_v37 }
 0x1b0   : > { %v956_v47 = vpop.f32.mrb[0].mxu0  ;;  %v996_v49 = vpop.f32.mrb[0].mxu1 }
 0x1b1   : > { %v958_v50 = vpop.f32.mrb[1].mxu0  ;;  %v997_v51 = vadd.f32 %v996_v49, %v5680_v46  ;;  %v998_v52 = vpop.f32.mrb[1].mxu1  ;;  %v957_v56 = vadd.f32 %v956_v47, %v5680_v46 }
 0x1b2   : > { %v960_v53 = vpop.f32.mrb[2].mxu0  ;;  %v999_v54 = vadd.f32 %v998_v52, %v5685_v48  ;;  %v1000_v55 = vpop.f32.mrb[2].mxu1  ;;  %v959_v61 = vadd.f32 %v958_v50, %v5685_v48 }
 0x1b3   : > { %v961_v57 = vadd.f32 %v960_v53, %v5680_v46  ;;  %v962_v58 = vpop.f32.mrb[3].mxu0  ;;  %v1001_v59 = vadd.f32 %v1000_v55, %v5680_v46  ;;  %v1002_v60 = vpop.f32.mrb[3].mxu1 }
 0x1b4   : > { %v963_v62 = vadd.f32 %v962_v58, %v5685_v48  ;;  %v1003_v63 = vadd.f32 %v1002_v60, %v5685_v48 }
 0x1b5   : > { %v5695_v1 = vpack.c.bf16 %v961_v57, %v957_v56  ;;  %v5697_v2 = vpack.c.bf16 %v1001_v59, %v997_v51 }
 0x1b6   : > { %v5699_v3 = vpack.c.bf16 %v963_v62, %v959_v61  ;;  %v5701_v4 = vpack.c.bf16 %v1003_v63, %v999_v54 }
 0x1b7   : > { %7163 = vst [vmem:[#allocation24_spill] sm:$0xff] %v5695_v1  ;;  %7164 = vst [vmem:[#allocation25_spill] sm:$0xff] %v5697_v2  ;;  %4167 = vmatprep.mubr.msk.bf16.mxu0 %vm1474_vm0, %v5695_v1 }
 0x1b8   : > { %7165 = vst [vmem:[#allocation26_spill] sm:$0xff] %v5701_v4  ;;  %v966_v5 = vpop.f32.mrb[4].mxu0  ;;  %1953 = vrot.lane.b32.xlu0 %v5699_v3, %s5287_s9  ;;  %4507 = vmatprep.subr.msk.bf16.mxu0 %vm1474_vm0, %v5699_v3  ;;  %v1500_v6 = vsel %vm1474_vm0, %v5699_v3, 0  ;;  %v1006_v7 = vpop.f32.mrb[4].mxu1 }
 0x1b9   : > { %v968_v8 = vpop.f32.mrb[5].mxu0  ;;  %4152 = vmatpush3.bf16.xpose.msra.mxu0 %v1500_v6  ;;  %v1007_v9 = vadd.f32 %v1006_v7, %v5680_v46  ;;  %v1008_v10 = vpop.f32.mrb[5].mxu1  ;;  %v967_v14 = vadd.f32 %v966_v5, %v5680_v46 }
 0x1ba   : > { %v970_v11 = vpop.f32.mrb[6].mxu0  ;;  %v1009_v12 = vadd.f32 %v1008_v10, %v5685_v48  ;;  %v1010_v13 = vpop.f32.mrb[6].mxu1  ;;  %v969_v21 = vadd.f32 %v968_v8, %v5685_v48 }
 0x1bb   : > { %v971_v15 = vadd.f32 %v970_v11, %v5680_v46  ;;  %v972_v16 = vpop.f32.mrb[7].mxu0  ;;  %v1011_v17 = vadd.f32 %v1010_v13, %v5680_v46  ;;  %v1012_v20 = vpop.f32.mrb[7].mxu1 }
 0x1bc   : > { %v973_v22 = vadd.f32 %v972_v16, %v5685_v48  ;;  %v1013_v23 = vadd.f32 %v1012_v20, %v5685_v48 }
 0x1bd   : > { %v5719_v26 = vpack.c.bf16 %v971_v15, %v967_v14  ;;  %v5721_v27 = vpack.c.bf16 %v1011_v17, %v1007_v9 }
 0x1be   : > { %v5723_v28 = vpack.c.bf16 %v973_v22, %v969_v21  ;;  %v5725_v29 = vpack.c.bf16 %v1013_v23, %v1009_v12 }
 0x1bf   : > { %7166 = vst [vmem:[#allocation27_spill] sm:$0xff] %v5719_v26  ;;  %7167 = vst [vmem:[#allocation28_spill] sm:$0xff] %v5721_v27 }
 0x1c0   : > { %7168 = vst [vmem:[#allocation29_spill] sm:$0xff] %v5725_v29  ;;  %v976_v32 = vpop.f32.mrb[8].mxu0  ;;  %v1016_v33 = vpop.f32.mrb[8].mxu1  ;;  %1955 = vrot.lane.b32.xlu0 %v5723_v28, %s5287_s9  ;;  %4508 = vmatprep.subr.msk.bf16.mxu0 %vm1474_vm0, %v5723_v28  ;;  %v1503_v34 = vsel %vm1474_vm0, %v5723_v28, 0 }
 0x1c1   : > { %v1017_v35 = vadd.f32 %v1016_v33, %v5680_v46  ;;  %v978_v38 = vpop.f32.mrb[9].mxu0  ;;  %v1018_v39 = vpop.f32.mrb[9].mxu1  ;;  %4154 = vmatpush3.bf16.xpose.msra.mxu0 %v1503_v34  ;;  %v977_v49 = vadd.f32 %v976_v32, %v5680_v46  ;;  %v1515_v33 = vsel %vm1474_vm0, %v5725_v29, 0 }
 0x1c2   : > { %v1019_v40 = vadd.f32 %v1018_v39, %v5685_v48  ;;  %v980_v41 = vpop.f32.mrb[10].mxu0  ;;  %v1020_v47 = vpop.f32.mrb[10].mxu1  ;;  %v979_v54 = vadd.f32 %v978_v38, %v5685_v48  ;;  %v569_v38 = vsub.s32 4, %v5667_v42 }
 0x1c3   : > { %v981_v50 = vadd.f32 %v980_v41, %v5680_v46  ;;  %v1021_v51 = vadd.f32 %v1020_v47, %v5680_v46  ;;  %v982_v52 = vpop.f32.mrb[11].mxu0  ;;  %v1022_v53 = vpop.f32.mrb[11].mxu1 }
 0x1c4   : > { %v983_v55 = vadd.f32 %v982_v52, %v5685_v48  ;;  %v1023_v56 = vadd.f32 %v1022_v53, %v5685_v48  ;;  %1961 = vrot.lane.b32.xlu0 %v5701_v4, %s5287_s9  ;;  %v5834_v47 = vrot.slane %v5675_v44, %v569_v38 }
 0x1c5   : > { %v5743_v57 = vpack.c.bf16 %v981_v50, %v977_v49  ;;  %v5745_v58 = vpack.c.bf16 %v1021_v51, %v1017_v35 }
 0x1c6   : > { %v5747_v59 = vpack.c.bf16 %v983_v55, %v979_v54  ;;  %v5749_v60 = vpack.c.bf16 %v1023_v56, %v1019_v40  ;;  %v573_v40 = vsub.s32 5, %v5667_v42 }
 0x1c7   : > { %7169 = vst [vmem:[#allocation30_spill] sm:$0xff] %v5743_v57  ;;  %7170 = vst [vmem:[#allocation31_spill] sm:$0xff] %v5745_v58 }
 0x1c8   : > { %v986_v61 = vpop.f32.mrb[12].mxu0  ;;  %1957 = vrot.lane.b32.xlu1 %v5747_v59, %s5287_s9  ;;  %1965 = vrot.lane.b32.xlu0 %v5749_v60, %s5287_s9  ;;  %v1506_v62 = vsel %vm1474_vm0, %v5747_v59, 0  ;;  %v1026_v63 = vpop.f32.mrb[12].mxu1  ;;  %v1518_v34 = vsel %vm1474_vm0, %v5749_v60, 0  ;;  %v5837_v49 = vrot.slane %v5675_v44, %v573_v40 }
 0x1c9   : > { %4509 = vmatprep.subr.msk.bf16.mxu0 %vm1474_vm0, %v5747_v59  ;;  %v988_v5 = vpop.f32.mrb[13].mxu0  ;;  %v1027_v6 = vadd.f32 %v1026_v63, %v5680_v46  ;;  %v1028_v7 = vpop.f32.mrb[13].mxu1  ;;  %v987_v11 = vadd.f32 %v986_v61, %v5680_v46 }
 0x1ca   : > { %4156 = vmatpush3.bf16.xpose.msra.mxu0 %v1506_v62  ;;  %v990_v8 = vpop.f32.mrb[14].mxu0  ;;  %v1029_v9 = vadd.f32 %v1028_v7, %v5685_v48  ;;  %v1030_v10 = vpop.f32.mrb[14].mxu1  ;;  %v989_v16 = vadd.f32 %v988_v5, %v5685_v48 }
 0x1cb   : > { %v991_v12 = vadd.f32 %v990_v8, %v5680_v46  ;;  %v992_v13 = vpop.f32.mrb[15].mxu0  ;;  %v1031_v14 = vadd.f32 %v1030_v10, %v5680_v46  ;;  %v1032_v15 = vpop.f32.mrb[15].mxu1 }
 0x1cc   : > { %v993_v17 = vadd.f32 %v992_v13, %v5685_v48  ;;  %1929 = vrot.lane.b32.xlu0 %v5695_v1, %s5287_s9  ;;  %v1033_v20 = vadd.f32 %v1032_v15, %v5685_v48  ;;  %v1512_v48 = vsel %vm1474_vm0, %v5701_v4, 0 }
 0x1cd   : > { %v5769_v21 = vpack.c.bf16 %v991_v12, %v987_v11  ;;  %v5771_v22 = vpack.c.bf16 %v1031_v14, %v1027_v6 }
 0x1ce   : > { %v5773_v23 = vpack.c.bf16 %v993_v17, %v989_v16  ;;  %v5775_v32 = vpack.c.bf16 %v1033_v20, %v1029_v9 }
 0x1cf   : > { %7171 = vst [vmem:[#allocation32_spill] sm:$0xff] %v5769_v21  ;;  %7172 = vst [vmem:[#allocation33_spill] sm:$0xff] %v5771_v22 }
 0x1d0   : > { %7173 = vst [vmem:[#allocation34_spill] sm:$0xff] %v5773_v23  ;;  %1959 = vrot.lane.b32.xlu1 %v5773_v23, %s5287_s9  ;;  %4510 = vmatprep.subr.msk.bf16.mxu0 %vm1474_vm0, %v5773_v23  ;;  %v1509_v46 = vsel %vm1474_vm0, %v5773_v23, 0  ;;  %v1521_v35 = vsel %vm1474_vm0, %v5775_v32, 0 }
 0x1d1   : > { %1933 = vrot.lane.b32.xlu0 %v5743_v57, %s5287_s9  ;;  %v1182_v39 = vpop.f32.mrb[16].mxu0 }
 0x1d2   : > { %4158 = vmatpush3.bf16.xpose.msra.mxu0 %v1509_v46  ;;  %v1184_v41 = vpop.f32.mrb[17].mxu0  ;;  %v1183_v52 = vadd.f32 %v1182_v39, %v5834_v47 }
 0x1d3   : > { %4511 = vmatprep.subr.msk.bf16.mxu0 %vm1474_vm0, %v5701_v4  ;;  %v1186_v50 = vpop.f32.mrb[18].mxu0  ;;  %v1185_v53 = vadd.f32 %v1184_v41, %v5837_v49 }
 0x1d4   : > { %1963 = vrot.lane.b32.xlu1 %v5725_v29, %s5287_s9  ;;  %v1188_v51 = vpop.f32.mrb[19].mxu0  ;;  %v1187_v54 = vadd.f32 %v1186_v50, %v5834_v47 }
 0x1d5   : > { %1937 = vrot.lane.b32.xlu0 %v5697_v2, %s5287_s9  ;;  %v1189_v55 = vadd.f32 %v1188_v51, %v5837_v49 }
 0x1d6   : > { %v5846_v63 = vpack.c.bf16 %v1187_v54, %v1183_v52 }
 0x1d7   : > { %v5848_v5 = vpack.c.bf16 %v1189_v55, %v1185_v53 }
 0x1d8   : > { %1967 = vrot.lane.b32.xlu1 %v5775_v32, %s5287_s9  ;;  %7174 = vst [vmem:[#allocation35_spill] sm:$0xff] %v5846_v63 }
 0x1d9   : > { %1941 = vrot.lane.b32.xlu0 %v5745_v58, %s5287_s9  ;;  %v1192_v56 = vpop.f32.mrb[20].mxu0  ;;  %7175 = vst [vmem:[#allocation36_spill] sm:$0xff] %v5848_v5 }
 0x1da   : > { %4160 = vmatpush3.bf16.xpose.msra.mxu0 %v1512_v48  ;;  %v1193_v61 = vadd.f32 %v1192_v56, %v5834_v47  ;;  %v1194_v62 = vpop.f32.mrb[21].mxu0 }
 0x1db   : > { %4512 = vmatprep.subr.msk.bf16.mxu0 %vm1474_vm0, %v5725_v29  ;;  %v1195_v6 = vadd.f32 %v1194_v62, %v5837_v49  ;;  %v1196_v7 = vpop.f32.mrb[22].mxu0 }
 0x1dc   : > { %1931 = vrot.lane.b32.xlu1 %v5719_v26, %s5287_s9  ;;  %v1197_v8 = vadd.f32 %v1196_v7, %v5834_v47  ;;  %v1198_v9 = vpop.f32.mrb[23].mxu0 }
 0x1dd   : > { %2421 = vrot.lane.b32.xlu0 %v5723_v28, %s5288_s28  ;;  %v1199_v10 = vadd.f32 %v1198_v9, %v5837_v49 }
 0x1de   : > { %v5855_v12 = vpack.c.bf16 %v1197_v8, %v1193_v61 }
 0x1df   : > { %v5858_v15 = vpack.c.bf16 %v1199_v10, %v1195_v6 }
 0x1e0   : > { %1935 = vrot.lane.b32.xlu1 %v5769_v21, %s5287_s9  ;;  %7176 = vst [vmem:[#allocation37_spill] sm:$0xff] %v5855_v12 }
 0x1e1   : > { %v1202_v11 = vpop.f32.mrb[24].mxu0  ;;  %7177 = vst [vmem:[#allocation38_spill] sm:$0xff] %v5858_v15 }
 0x1e2   : > { %4162 = vmatpush3.bf16.xpose.msra.mxu0 %v1515_v33  ;;  %v1203_v13 = vadd.f32 %v1202_v11, %v5834_v47  ;;  %v1204_v14 = vpop.f32.mrb[25].mxu0 }
 0x1e3   : > { %4513 = vmatprep.subr.msk.bf16.mxu0 %vm1474_vm0, %v5749_v60  ;;  %v1205_v16 = vadd.f32 %v1204_v14, %v5837_v49  ;;  %v1206_v17 = vpop.f32.mrb[26].mxu0 }
 0x1e4   : > { %1939 = vrot.lane.b32.xlu1 %v5721_v27, %s5287_s9  ;;  %v1207_v20 = vadd.f32 %v1206_v17, %v5834_v47  ;;  %v1208_v46 = vpop.f32.mrb[27].mxu0 }
 0x1e5   : > { %v1209_v48 = vadd.f32 %v1208_v46, %v5837_v49 }
 0x1e7   : > { %v5868_v39 = vpack.c.bf16 %v1209_v48, %v1205_v16 }
 0x1e8   : > { %1943 = vrot.lane.b32.xlu1 %v5771_v22, %s5287_s9  ;;  %s6992_s9 = scalar_lea.hbm %s7074_s10, %s3932_s18 }
 0x1e9   : > { %v1212_v33 = vpop.f32.mrb[28].mxu0  ;;  %7179 = vst [vmem:[#allocation40_spill] sm:$0xff] %v5868_v39 }
 0x1ea   : > { %4164 = vmatpush3.bf16.xpose.msra.mxu0 %v1518_v34  ;;  %v5863_v34 = vpack.c.bf16 %v1207_v20, %v1203_v13  ;;  %v1214_v38 = vpop.f32.mrb[29].mxu0 }
 0x1eb   : > { %4514 = vmatprep.subr.msk.bf16.mxu0 %vm1474_vm0, %v5775_v32  ;;  %v1215_v40 = vadd.f32 %v1214_v38, %v5837_v49  ;;  %v1216_v41 = vpop.f32.mrb[30].mxu0 }
 0x1ec   : > { %2419 = vrot.lane.b32.xlu1 %v5699_v3, %s5288_s28  ;;  %7178 = vst [vmem:[#allocation39_spill] sm:$0xff] %v5863_v34  ;;  %v1217_v50 = vadd.f32 %v1216_v41, %v5834_v47  ;;  %v1218_v51 = vpop.f32.mrb[31].mxu0 }
 0x1ed   : > { %v1219_v52 = vadd.f32 %v1218_v51, %v5837_v49 }
 0x1ef   : > { %v5876_v61 = vpack.c.bf16 %v1219_v52, %v1215_v40 }
 0x1f0   : > { %2423 = vrot.lane.b32.xlu1 %v5747_v59, %s5288_s28 }
 0x1f1   : > { %v1222_v53 = vpop.f32.mrb[32].mxu0  ;;  %7181 = vst [vmem:[#allocation42_spill] sm:$0xff] %v5876_v61 }
 0x1f2   : > { %4166 = vmatpush3.bf16.xpose.msra.mxu0 %v1521_v35  ;;  %v1213_v35 = vadd.f32 %v1212_v33, %v5834_v47  ;;  %v1223_v55 = vadd.f32 %v1222_v53, %v5834_v47  ;;  %v1224_v56 = vpop.f32.mrb[33].mxu0 }
 0x1f3   : > { %v1225_v62 = vadd.f32 %v1224_v56, %v5837_v49  ;;  %v1226_v6 = vpop.f32.mrb[34].mxu0 }
 0x1f4   : > { %v5873_v54 = vpack.c.bf16 %v1217_v50, %v1213_v35  ;;  %v1227_v7 = vadd.f32 %v1226_v6, %v5834_v47  ;;  %v1228_v8 = vpop.f32.mrb[35].mxu0 }
 0x1f5   : > { %v1229_v9 = vadd.f32 %v1228_v8, %v5837_v49 }
 0x1f6   : > { %7180 = vst [vmem:[#allocation41_spill] sm:$0xff] %v5873_v54  ;;  %v5881_v11 = vpack.c.bf16 %v1227_v7, %v1223_v55 }
 0x1f7   : > { %v5884_v16 = vpack.c.bf16 %v1229_v9, %v1225_v62 }
 0x1f8   : > { %7182 = vst [vmem:[#allocation43_spill] sm:$0xff] %v5881_v11 }
 0x1f9   : > { %4168 = vmatmul.mubr.msk.bf16.vlgmr.msra.gmra.mrb[48].mxu0 %vm1474_vm0, %v5719_v26  ;;  %v1232_v10 = vpop.f32.mrb[36].mxu0  ;;  %7183 = vst [vmem:[#allocation44_spill] sm:$0xff] %v5884_v16 }
 0x1fa   : > { %4171 = vmatprep.mubr.msk.bf16.mxu0 %vm1474_vm0, %v5743_v57  ;;  %v1233_v13 = vadd.f32 %v1232_v10, %v5834_v47  ;;  %v1234_v14 = vpop.f32.mrb[37].mxu0 }
 0x1fb   : > { %v1235_v17 = vadd.f32 %v1234_v14, %v5837_v49  ;;  %v1236_v20 = vpop.f32.mrb[38].mxu0 }
 0x1fc   : > { %v1237_v46 = vadd.f32 %v1236_v20, %v5834_v47  ;;  %v1238_v48 = vpop.f32.mrb[39].mxu0 }
 0x1fd   : > { %v1239_v33 = vadd.f32 %v1238_v48, %v5837_v49 }
 0x1fe   : > { %v5889_v38 = vpack.c.bf16 %v1237_v46, %v1233_v13 }
 0x1ff   : > { %v5892_v50 = vpack.c.bf16 %v1239_v33, %v1235_v17 }
 0x200   : > { %7184 = vst [vmem:[#allocation45_spill] sm:$0xff] %v5889_v38 }
 0x201   : > { %4172 = vmatmul.mubr.msk.bf16.gmra.mrb[52].mxu0 %vm1474_vm0, %v5769_v21  ;;  %v1242_v35 = vpop.f32.mrb[40].mxu0  ;;  %7185 = vst [vmem:[#allocation46_spill] sm:$0xff] %v5892_v50 }
 0x202   : > { %4175 = vmatprep.mubr.msk.bf16.mxu0 %vm1474_vm0, %v5697_v2  ;;  %v1243_v40 = vadd.f32 %v1242_v35, %v5834_v47  ;;  %v1244_v41 = vpop.f32.mrb[41].mxu0 }
 0x203   : > { %v1245_v51 = vadd.f32 %v1244_v41, %v5837_v49  ;;  %v1246_v52 = vpop.f32.mrb[42].mxu0 }
 0x204   : > { %v1247_v53 = vadd.f32 %v1246_v52, %v5834_v47  ;;  %v1248_v55 = vpop.f32.mrb[43].mxu0 }
 0x205   : > { %v1249_v56 = vadd.f32 %v1248_v55, %v5837_v49 }
 0x206   : > { %v5897_v6 = vpack.c.bf16 %v1247_v53, %v1243_v40 }
 0x207   : > { %v5900_v9 = vpack.c.bf16 %v1249_v56, %v1245_v51 }
 0x208   : > { %7186 = vst [vmem:[#allocation47_spill] sm:$0xff] %v5897_v6 }
 0x209   : > { %4176 = vmatmul.mubr.msk.bf16.gmra.mrb[56].mxu0 %vm1474_vm0, %v5721_v27  ;;  %v1252_v62 = vpop.f32.mrb[44].mxu0  ;;  %7187 = vst [vmem:[#allocation48_spill] sm:$0xff] %v5900_v9 }
 0x20a   : > { %4179 = vmatprep.mubr.msk.bf16.mxu0 %vm1474_vm0, %v5745_v58  ;;  %v1253_v7 = vadd.f32 %v1252_v62, %v5834_v47  ;;  %v1254_v8 = vpop.f32.mrb[45].mxu0  ;;  %v565_v58 = vsub.s32 3, %v5667_v42 }
 0x20b   : > { %v1255_v10 = vadd.f32 %v1254_v8, %v5837_v49  ;;  %v1256_v13 = vpop.f32.mrb[46].mxu0 }
 0x20c   : > { %v1257_v14 = vadd.f32 %v1256_v13, %v5834_v47  ;;  %v1258_v17 = vpop.f32.mrb[47].mxu0  ;;  %v4694_v13 = vld [vmem:[#allocation7 + $0x8] ss:$28 sps:$4 sm:$0xff]  }
 0x20d   : > { %v1259_v20 = vadd.f32 %v1258_v17, %v5837_v49  ;;  %v4697_v17 = vld [vmem:[#allocation7 + $0x40] ss:$28 sps:$4 sm:$0xff]  }
 0x20e   : > { %v5905_v46 = vpack.c.bf16 %v1257_v14, %v1253_v7  ;;  %v4699_v14 = vld [vmem:[#allocation7 + $0x44] ss:$28 sps:$4 sm:$0xff]  }
 0x20f   : > { %v5907_v48 = vpack.c.bf16 %v1259_v20, %v1255_v10  ;;  %v4696_v10 = vld [vmem:[#allocation7 + $0xc] ss:$28 sps:$4 sm:$0xff]  }
 0x210   : > { %7188 = vst [vmem:[#allocation49_spill] sm:$0xff] %v5905_v46  ;;  %1035 = vmatprep.subr.bf16.mxu1 %v4696_v10  ;;  %v4717_v10 = vld [vmem:[#allocation7 + $0x194] ss:$28 sps:$4 sm:$0xff]  }
 0x211   : > { %4180 = vmatmul.mubr.msk.bf16.gmra.mrb[60].mxu0 %vm1474_vm0, %v5771_v22  ;;  %7189 = vst [vmem:[#allocation50_spill] sm:$0xff] %v5907_v48  ;;  %1036 = vmatpush1.bf16.msra.mxu1 %v4694_v13  ;;  %v4715_v13 = vld [vmem:[#allocation7 + $0x190] ss:$28 sps:$4 sm:$0xff]   ;;  %v561_v22 = vsub.s32 2, %v5667_v42 }
 0x212   : > { %1037 = vmatprep.subr.bf16.mxu1 %v4699_v14 }
 0x215   : > { %1038 = vmatpush1.bf16.msra.mxu1 %v4697_v17 }
 0x22a   : > { %v1954_v33 = vpop.permute.xlu0 %1953 }
 0x22b   : > { %4515 = vmatprep.subr.msk.bf16.mxu0 %vm1474_vm0, %v1954_v33  ;;  %v1994_v35 = vsel %vm1474_vm0, %v1954_v33, 0 }
 0x22c   : > { %4216 = vmatpush3.bf16.xpose.msra.mxu0 %v1994_v35  ;;  %v4702_v35 = vld [vmem:[#allocation7 + $0x7c] ss:$28 sps:$4 sm:$0xff]  }
 0x22d   : > { %1039 = vmatprep.subr.bf16.mxu1 %v4702_v35 }
 0x232   : > { %v1956_v40 = vpop.permute.xlu0 %1955 }
 0x233   : > { %4516 = vmatprep.subr.msk.bf16.mxu0 %vm1474_vm0, %v1956_v40  ;;  %v1997_v41 = vsel %vm1474_vm0, %v1956_v40, 0  ;;  %v4700_v40 = vld [vmem:[#allocation7 + $0x78] ss:$28 sps:$4 sm:$0xff]  }
 0x234   : > { %4218 = vmatpush3.bf16.xpose.msra.mxu0 %v1997_v41  ;;  %1040 = vmatpush1.bf16.msra.mxu1 %v4700_v40  ;;  %v4705_v41 = vld [vmem:[#allocation7 + $0xb4] ss:$28 sps:$4 sm:$0xff]  }
 0x235   : > { %1041 = vmatprep.subr.bf16.mxu1 %v4705_v41  ;;  %v4718_v40 = vld [vmem:[#allocation7 + $0x18] ss:$28 sps:$4 sm:$0xff]   ;;  %v4719_v41 = vld [vmem:[#allocation7 + $0x50] ss:$28 sps:$4 sm:$0xff]  }
 0x236   : > { %v1962_v47 = vpop.permute.xlu0 %1961 }
 0x237   : > { %v2006_v62 = vsel %vm1474_vm0, %v1962_v47, 0 }
 0x23a   : > { %v1958_v51 = vpop.permute.xlu1 %1957  ;;  %v1966_v52 = vpop.permute.xlu0 %1965 }
 0x23b   : > { %4517 = vmatprep.subr.msk.bf16.mxu0 %vm1474_vm0, %v1958_v51  ;;  %v2000_v49 = vsel %vm1474_vm0, %v1958_v51, 0  ;;  %v2012_v20 = vsel %vm1474_vm0, %v1966_v52, 0 }
 0x23c   : > { %4220 = vmatpush3.bf16.xpose.msra.mxu0 %v2000_v49  ;;  %v4708_v49 = vld [vmem:[#allocation7 + $0xec] ss:$28 sps:$4 sm:$0xff]  }
 0x23e   : > { %v1930_v53 = vpop.permute.xlu0 %1929 }
 0x23f   : > { %4231 = vmatprep.mubr.msk.bf16.mxu0 %vm1474_vm0, %v1930_v53  ;;  %v4706_v53 = vld [vmem:[#allocation7 + $0xe8] ss:$28 sps:$4 sm:$0xff]  }
 0x242   : > { %v1960_v55 = vpop.permute.xlu1 %1959 }
 0x243   : > { %4518 = vmatprep.subr.msk.bf16.mxu0 %vm1474_vm0, %v1960_v55  ;;  %v2003_v56 = vsel %vm1474_vm0, %v1960_v55, 0 }
 0x244   : > { %4222 = vmatpush3.bf16.xpose.msra.mxu0 %v2003_v56  ;;  %v4709_v56 = vld [vmem:[#allocation7 + $0x120] ss:$28 sps:$4 sm:$0xff]  }
 0x245   : > { %4519 = vmatprep.subr.msk.bf16.mxu0 %vm1474_vm0, %v1962_v47  ;;  %v4703_v47 = vld [vmem:[#allocation7 + $0xb0] ss:$28 sps:$4 sm:$0xff]  }
 0x246   : > { %v1964_v7 = vpop.permute.xlu1 %1963  ;;  %1042 = vmatpush1.bf16.msra.mxu1 %v4703_v47  ;;  %v4720_v47 = vld [vmem:[#allocation7 + $0x88] ss:$28 sps:$4 sm:$0xff]  }
 0x247   : > { %v2009_v8 = vsel %vm1474_vm0, %v1964_v7, 0  ;;  %1043 = vmatprep.subr.bf16.mxu1 %v4708_v49  ;;  %v4722_v49 = vld [vmem:[#allocation7 + $0xf8] ss:$28 sps:$4 sm:$0xff]  }
 0x24a   : > { %v1968_v33 = vpop.permute.xlu1 %1967  ;;  %1044 = vmatpush1.bf16.msra.mxu1 %v4706_v53  ;;  %v4723_v53 = vld [vmem:[#allocation7 + $0x130] ss:$28 sps:$4 sm:$0xff]  }
 0x24b   : > { %v2015_v51 = vsel %vm1474_vm0, %v1968_v33, 0 }
 0x24c   : > { %4224 = vmatpush3.bf16.xpose.msra.mxu0 %v2006_v62  ;;  %v1934_v62 = vpop.permute.xlu0 %1933 }
 0x24d   : > { %4520 = vmatprep.subr.msk.bf16.mxu0 %vm1474_vm0, %v1964_v7  ;;  %v4714_v7 = vld [vmem:[#allocation7 + $0x15c] ss:$28 sps:$4 sm:$0xff]  }
 0x24e   : > { %v1932_v55 = vpop.permute.xlu1 %1931 }
 0x250   : > { %v1938_v17 = vpop.permute.xlu0 %1937 }
 0x252   : > { %v1936_v14 = vpop.permute.xlu1 %1935 }
 0x254   : > { %4226 = vmatpush3.bf16.xpose.msra.mxu0 %v2009_v8  ;;  %v4712_v8 = vld [vmem:[#allocation7 + $0x158] ss:$28 sps:$4 sm:$0xff]  }
 0x255   : > { %4521 = vmatprep.subr.msk.bf16.mxu0 %vm1474_vm0, %v1966_v52  ;;  %v4711_v52 = vld [vmem:[#allocation7 + $0x124] ss:$28 sps:$4 sm:$0xff]  }
 0x256   : > { %1045 = vmatprep.subr.bf16.mxu1 %v4711_v52  ;;  %v4724_v52 = vld [vmem:[#allocation7 + $0x168] ss:$28 sps:$4 sm:$0xff]  }
 0x257   : > { %1046 = vmatpush1.bf16.msra.mxu1 %v4709_v56  ;;  %v483_v56 = vld [vmem:[%s399_s26] sm:$0x1] }
 0x258   : > { %1047 = vmatprep.subr.bf16.mxu1 %v4714_v7  ;;  %vm484_vm1 = vcmp.eq.s32.totalorder %v483_v56, 0 }
 0x25b   : > { %1048 = vmatpush1.bf16.msra.mxu1 %v4712_v8 }
 0x25c   : > { %4228 = vmatpush3.bf16.xpose.msra.mxu0 %v2012_v20  ;;  %1049 = vmatprep.subr.bf16.mxu1 %v4717_v10  ;;  %v1940_v20 = vpop.permute.xlu1 %1939 }
 0x25d   : > { %4522 = vmatprep.subr.msk.bf16.mxu0 %vm1474_vm0, %v1968_v33  ;;  %v1942_v33 = vpop.permute.xlu0 %1941 }
 0x25f   : > { %1050 = vmatpush1.bf16.msra.mxu1 %v4715_v13 }
 0x260   : > { %v1944_v35 = vpop.permute.xlu1 %1943  ;;  %4099 = vmatprep.subr.bf16.mxu1 %v4718_v40 }
 0x262   : > { %1068 = vmatmul.mubr.bf16.vlgmr.msra.gmra.mrb[16].mxu1 %v5613_v18 }
 0x263   : > { %1077 = vmatprep.mubr.bf16.mxu1 %v7084_v0  ;;  %4100 = vmatpush3.bf16.msra.mxu1 %v4718_v40 }
 0x264   : > { %4230 = vmatpush3.bf16.xpose.msra.mxu0 %v2015_v51  ;;  %4101 = vmatprep.subr.bf16.mxu1 %v4719_v41  ;;  %v4721_v51 = vld [vmem:[#allocation7 + $0xc0] ss:$28 sps:$4 sm:$0xff]   ;;  %v6104_v50 = vpop.permute.xlu1 %2419 }
 0x265   : > { %7194 = vst [vmem:[#allocation53_spill] sm:$0xff] %v6104_v50 }
 0x267   : > { %4102 = vmatpush3.bf16.msra.mxu1 %v4719_v41 }
 0x268   : > { %4103 = vmatprep.subr.bf16.mxu1 %v4720_v47  ;;  %v6115_v15 = vpop.permute.xlu1 %2423 }
 0x269   : > { %7195 = vst [vmem:[#allocation54_spill] sm:$0xff] %v6115_v15 }
 0x26a   : > { %1078 = vmatmul.mubr.bf16.gmra.mrb[20].mxu1 %v5623_v24 }
 0x26b   : > { %4232 = vmatmul.mubr.msk.bf16.vlgmr.msra.gmra.mrb[64].mxu0 %vm1474_vm0, %v1932_v55  ;;  %1087 = vmatprep.mubr.bf16.mxu1 %v7084_v0  ;;  %v4725_v55 = vld [vmem:[#allocation7 + $0x1a0] ss:$28 sps:$4 sm:$0xff]  }
 0x26c   : > { %4235 = vmatprep.mubr.msk.bf16.mxu0 %vm1474_vm0, %v1934_v62  ;;  %4104 = vmatpush3.bf16.msra.mxu1 %v4720_v47  ;;  %v1620_v62 = vsel %vm484_vm1, 1, %v7084_v0 }
 0x26d   : > { %4105 = vmatprep.subr.bf16.mxu1 %v4721_v51  ;;  %v1624_v7 = vrot.slane %v1620_v62, %v5670_v43 }
 0x26f   : > { %vm5959_vm2 = vcmp.eq.s32.totalorder %v1624_v7, 1 }
 0x270   : > { %4106 = vmatpush3.bf16.msra.mxu1 %v4721_v51 }
 0x271   : > { %4107 = vmatprep.subr.bf16.mxu1 %v4722_v49 }
 0x272   : > { %1088 = vmatmul.mubr.bf16.gmra.mrb[24].mxu1 %v5633_v30 }
 0x273   : > { %4236 = vmatmul.mubr.msk.bf16.gmra.mrb[68].mxu0 %vm1474_vm0, %v1936_v14  ;;  %1097 = vmatprep.mubr.bf16.mxu1 %v7084_v0 }
 0x274   : > { %4239 = vmatprep.mubr.msk.bf16.mxu0 %vm1474_vm0, %v1938_v17  ;;  %4108 = vmatpush3.bf16.msra.mxu1 %v4722_v49 }
 0x275   : > { %4109 = vmatprep.subr.bf16.mxu1 %v4723_v53 }
 0x278   : > { %4110 = vmatpush3.bf16.msra.mxu1 %v4723_v53 }
 0x279   : > { %4111 = vmatprep.subr.bf16.mxu1 %v4724_v52 }
 0x27a   : > { %1098 = vmatmul.mubr.bf16.gmra.mrb[28].mxu1 %v5643_v36 }
 0x27b   : > { %4240 = vmatmul.mubr.msk.bf16.gmra.mrb[72].mxu0 %vm1474_vm0, %v1940_v20  ;;  %1107 = vmatprep.mubr.bf16.mxu1 %v7084_v0 }
 0x27c   : > { %4243 = vmatprep.mubr.msk.bf16.mxu0 %vm1474_vm0, %v1942_v33  ;;  %4112 = vmatpush3.bf16.msra.mxu1 %v4724_v52 }
 0x27d   : > { %4113 = vmatprep.subr.bf16.mxu1 %v4725_v55 }
 0x280   : > { %4114 = vmatpush3.bf16.msra.mxu1 %v4725_v55 }
 0x282   : > { %1108 = vmatmul.mubr.bf16.gmra.mrb[32].mxu1 %v5616_v19 }
 0x283   : > { %4244 = vmatmul.mubr.msk.bf16.gmra.mrb[76].mxu0 %vm1474_vm0, %v1944_v35  ;;  %1117 = vmatprep.mubr.bf16.mxu1 %v7084_v0 }
 0x28a   : > { %1118 = vmatmul.mubr.bf16.gmra.mrb[36].mxu1 %v5626_v25 }
 0x28b   : > { %1127 = vmatprep.mubr.bf16.mxu1 %v7084_v0 }
 0x292   : > { %1128 = vmatmul.mubr.bf16.gmra.mrb[40].mxu1 %v5636_v31 }
 0x293   : > { %1137 = vmatprep.mubr.bf16.mxu1 %v7084_v0 }
 0x29a   : > { %1138 = vmatmul.mubr.bf16.gmra.mrb[44].mxu1 %v5646_v37 }
 0x29b   : > { %4115 = vmatprep.mubr.bf16.mxu1 %v5613_v18  ;;  %v7190_v18 = vmov 0 }
 0x29c   : > { %v7191_v18 = vsel %vm5959_vm2, 4294967295, %v7190_v18 }
 0x29d   : > { %7192 = vst [vmem:[#allocation51_spill] sm:$0xff] %v7191_v18 }
 0x2a2   : > { %4116 = vmatmul.mubr.bf16.vlgmr.msra.gmra.mrb[48].mxu1 %v5623_v24 }
 0x2a3   : > { %4119 = vmatprep.mubr.bf16.mxu1 %v5633_v30 }
 0x2aa   : > { %4120 = vmatmul.mubr.bf16.gmra.mrb[52].mxu1 %v5643_v36 }
 0x2ab   : > { %4123 = vmatprep.mubr.bf16.mxu1 %v5616_v19 }
 0x2b2   : > { %4124 = vmatmul.mubr.bf16.gmra.mrb[56].mxu1 %v5626_v25 }
 0x2b3   : > { %4127 = vmatprep.mubr.bf16.mxu1 %v5636_v31 }
 0x2ba   : > { %4128 = vmatmul.mubr.bf16.gmra.mrb[60].mxu1 %v5646_v37 }
 0x2cc   : > { %v4169_v24 = vpop.f32.mrb[48].mxu0 }
 0x2cd   : > { %v1557_v30 = vpop.f32.mrb[49].mxu0  ;;  %v5965_v36 = vsel %vm5959_vm2, -1e+30, %v4169_v24 }
 0x2ce   : > { %1646 = vmax.xlane.f32.xlu0 %v5965_v36  ;;  %v4170_v19 = vpop.f32.mrb[50].mxu0  ;;  %v5976_v31 = vsel %vm5959_vm2, -1e+30, %v1557_v30 }
 0x2cf   : > { %v1560_v8 = vpop.f32.mrb[51].mxu0  ;;  %v5981_v14 = vsel %vm5959_vm2, -1e+30, %v4170_v19 }
 0x2d0   : > { %v5971_v25 = vsel %vm5959_vm2, -1e+30, %v1560_v8 }
 0x2d1   : > { %1644 = vmax.xlane.f32.xlu1 %v5971_v25 }
 0x2d2   : > { %1642 = vmax.xlane.f32.xlu0 %v5976_v31 }
 0x2d4   : > { %v4173_v10 = vpop.f32.mrb[52].mxu0 }
 0x2d5   : > { %v1573_v13 = vpop.f32.mrb[53].mxu0  ;;  %v5985_v37 = vsel %vm5959_vm2, -1e+30, %v4173_v10 }
 0x2d6   : > { %1648 = vmax.xlane.f32.xlu0 %v5981_v14  ;;  %1654 = vmax.xlane.f32.xlu1 %v5985_v37  ;;  %v4174_v17 = vpop.f32.mrb[54].mxu0  ;;  %v5991_v33 = vsel %vm5959_vm2, -1e+30, %v1573_v13 }
 0x2d7   : > { %v1576_v20 = vpop.f32.mrb[55].mxu0  ;;  %v5995_v35 = vsel %vm5959_vm2, -1e+30, %v4174_v17 }
 0x2d8   : > { %v6001_v47 = vsel %vm5959_vm2, -1e+30, %v1576_v20 }
 0x2da   : > { %1650 = vmax.xlane.f32.xlu1 %v5991_v33  ;;  %1656 = vmax.xlane.f32.xlu0 %v5995_v35 }
 0x2dc   : > { %v4177_v40 = vpop.f32.mrb[56].mxu0 }
 0x2dd   : > { %v1589_v41 = vpop.f32.mrb[57].mxu0  ;;  %v6005_v51 = vsel %vm5959_vm2, -1e+30, %v4177_v40 }
 0x2de   : > { %1652 = vmax.xlane.f32.xlu0 %v6001_v47  ;;  %1662 = vmax.xlane.f32.xlu1 %v6005_v51  ;;  %v4178_v49 = vpop.f32.mrb[58].mxu0  ;;  %v6011_v52 = vsel %vm5959_vm2, -1e+30, %v1589_v41 }
 0x2df   : > { %v1592_v53 = vpop.f32.mrb[59].mxu0  ;;  %v6015_v55 = vsel %vm5959_vm2, -1e+30, %v4178_v49 }
 0x2e0   : > { %v6021_v7 = vsel %vm5959_vm2, -1e+30, %v1592_v53 }
 0x2e2   : > { %1658 = vmax.xlane.f32.xlu1 %v6011_v52  ;;  %1664 = vmax.xlane.f32.xlu0 %v6015_v55 }
 0x2e4   : > { %v4181_v56 = vpop.f32.mrb[60].mxu0 }
 0x2e5   : > { %v1605_v62 = vpop.f32.mrb[61].mxu0  ;;  %v6025_v24 = vsel %vm5959_vm2, -1e+30, %v4181_v56 }
 0x2e6   : > { %1660 = vmax.xlane.f32.xlu0 %v6021_v7  ;;  %1670 = vmax.xlane.f32.xlu1 %v6025_v24  ;;  %v4182_v30 = vpop.f32.mrb[62].mxu0  ;;  %v6031_v8 = vsel %vm5959_vm2, -1e+30, %v1605_v62 }
 0x2e7   : > { %v1608_v19 = vpop.f32.mrb[63].mxu0  ;;  %v6035_v10 = vsel %vm5959_vm2, -1e+30, %v4182_v30 }
 0x2e8   : > { %v6041_v13 = vsel %vm5959_vm2, -1e+30, %v1608_v19 }
 0x2ea   : > { %1666 = vmax.xlane.f32.xlu1 %v6031_v8  ;;  %1672 = vmax.xlane.f32.xlu0 %v6035_v10 }
 0x2ee   : > { %1668 = vmax.xlane.f32.xlu0 %v6041_v13 }
 0x304   : > { %2427 = vrot.lane.b32.xlu0 %v5701_v4, %s5288_s28 }
 0x308   : > { %2885 = vrot.lane.b32.xlu0 %v5699_v3, %s5289_s2 }
 0x30c   : > { %2429 = vrot.lane.b32.xlu0 %v5725_v29, %s5288_s28  ;;  %v7196_v29 = vmov 0.0  }
 0x30d   : > { %4147 = vmatprep.mubr.msk.bf16.mxu1 %vm5291_vm3, %v7196_v29 }
 0x335   : > { %v1069_v2 = vpop.f32.mrb[16].mxu1 }
 0x336   : > { %v1071_v21 = vpop.f32.mrb[17].mxu1 }
 0x33e   : > { %v4233_v17 = vpop.f32.mrb[64].mxu0 }
 0x33f   : > { %v2051_v20 = vpop.f32.mrb[65].mxu0  ;;  %v6052_v40 = vsel %vm5959_vm2, -1e+30, %v4233_v17 }
 0x340   : > { %2134 = vmax.xlane.f32.xlu1 %v6052_v40  ;;  %v4234_v41 = vpop.f32.mrb[66].mxu0  ;;  %v6062_v3 = vsel %vm5959_vm2, -1e+30, %v2051_v20 }
 0x341   : > { %v2054_v49 = vpop.f32.mrb[67].mxu0  ;;  %v6057_v53 = vsel %vm5959_vm2, -1e+30, %v4234_v41 }
 0x342   : > { %2136 = vmax.xlane.f32.xlu0 %v6057_v53  ;;  %v6067_v56 = vsel %vm5959_vm2, -1e+30, %v2054_v49 }
 0x344   : > { %2130 = vmax.xlane.f32.xlu1 %v6062_v3 }
 0x346   : > { %v6069_v62 = vpop.f32.mrb[68].mxu0  ;;  %2132 = vmax.xlane.f32.xlu0 %v6067_v56 }
 0x347   : > { %v6072_v30 = vpop.f32.mrb[69].mxu0 }
 0x348   : > { %v4238_v19 = vpop.f32.mrb[70].mxu0 }
 0x349   : > { %v2070_v17 = vpop.f32.mrb[71].mxu0  ;;  %v6076_v41 = vsel %vm5959_vm2, -1e+30, %v4238_v19 }
 0x34a   : > { %2144 = vmax.xlane.f32.xlu0 %v6076_v41  ;;  %v6081_v20 = vsel %vm5959_vm2, -1e+30, %v2070_v17  ;;  %v6099_v17 = vpop.permute.xlu0 %2421 }
 0x34b   : > { %7193 = vst [vmem:[#allocation52_spill] sm:$0xff] %v6099_v17 }
 0x34e   : > { %v6083_v49 = vpop.f32.mrb[72].mxu0  ;;  %2140 = vmax.xlane.f32.xlu0 %v6081_v20 }
 0x34f   : > { %v6086_v45 = vpop.f32.mrb[73].mxu0 }
 0x350   : > { %v4242_v0 = vpop.f32.mrb[74].mxu0 }
 0x351   : > { %v2086_v43 = vpop.f32.mrb[75].mxu0  ;;  %v6090_v48 = vsel %vm5959_vm2, -1e+30, %v4242_v0 }
 0x352   : > { %2152 = vmax.xlane.f32.xlu0 %v6090_v48  ;;  %v6097_v19 = vsel %vm5959_vm2, -1e+30, %v2086_v43 }
 0x355   : > { %2425 = vrot.lane.b32.xlu1 %v5773_v23, %s5288_s28 }
 0x356   : > { %v6101_v9 = vpop.f32.mrb[76].mxu0  ;;  %2148 = vmax.xlane.f32.xlu0 %v6097_v19 }
 0x357   : > { %v6106_v16 = vpop.f32.mrb[77].mxu0 }
 0x358   : > { %v4246_v0 = vpop.f32.mrb[78].mxu0 }
 0x359   : > { %v2102_v61 = vpop.f32.mrb[79].mxu0  ;;  %v6110_v39 = vsel %vm5959_vm2, -1e+30, %v4246_v0 }
 0x35a   : > { %2160 = vmax.xlane.f32.xlu0 %v6110_v39  ;;  %v6119_v5 = vsel %vm5959_vm2, -1e+30, %v2102_v61 }
 0x35b   : > { %v6113_v43 = vpop.xlane.xlu0 %1646 }
 0x35e   : > { %2156 = vmax.xlane.f32.xlu0 %v6119_v5  ;;  %v1645_v6 = vpop.xlane.xlu1 %1644 }
 0x35f   : > { %v6122_v46 = vpop.xlane.xlu0 %1642  ;;  %v1675_v11 = vsub.f32 %v5971_v25, %v1645_v6  ;;  %v6131_v6 = vrot.slane %v5675_v44, %v561_v22 }
 0x361   : > { %v1692_v12 = vmul.f32 1.442695, %v1675_v11  ;;  %v4726_v11 = vld [vmem:[#allocation10] sm:$0xff]  }
 0x363   : > { %v1649_v38 = vpop.xlane.xlu0 %1648 }
 0x364   : > { %v1677_v0 = vsub.f32 %v5981_v14, %v1649_v38  ;;  %v1073_v38 = vpop.f32.mrb[18].mxu1 }
 0x366   : > { %v1696_v54 = vmul.f32 1.442695, %v1677_v0 }
 0x367   : > { %v1657_v34 = vpop.xlane.xlu0 %1656 }
 0x368   : > { %4758 = vpow2.f32 %v1696_v54  ;;  %v1681_v63 = vsub.f32 %v5995_v35, %v1657_v34  ;;  %v6134_v54 = vrot.slane %v5675_v44, %v565_v58  ;;  %v1074_v35 = vadd.f32 %v1073_v38, %v6131_v6 }
 0x369   : > { %4760 = vpow2.f32 %v1692_v12  ;;  %v1070_v12 = vadd.f32 %v1069_v2, %v6131_v6 }
 0x36a   : > { %v1704_v61 = vmul.f32 1.442695, %v1681_v63  ;;  %v1072_v14 = vadd.f32 %v1071_v21, %v6134_v54  ;;  %v7116_v21 = vmov 0.0  }
 0x36b   : > { %v1653_v15 = vpop.xlane.xlu0 %1652  ;;  %4131 = vmatprep.subr.bf16.mxu1 %v7116_v21 }
 0x36c   : > { %v1679_v17 = vsub.f32 %v6001_v47, %v1653_v15  ;;  %4762 = vpow2.f32 %v1704_v61  ;;  %v1075_v15 = vpop.f32.mrb[19].mxu1  ;;  %4132 = vmatpush3.bf16.msra.mxu1 %v4726_v11 }
 0x36d   : > { %v1076_v22 = vadd.f32 %v1075_v15, %v6134_v54  ;;  %v1079_v47 = vpop.f32.mrb[20].mxu1  ;;  %4133 = vmatprep.subr.bf16.mxu1 %v7116_v21 }
 0x36e   : > { %v1700_v34 = vmul.f32 1.442695, %v1679_v17  ;;  %v1080_v44 = vadd.f32 %v1079_v47, %v6131_v6  ;;  %v1081_v58 = vpop.f32.mrb[21].mxu1  ;;  %v4727_v47 = vld [vmem:[#allocation10 + $0x8] sm:$0xff]  }
 0x36f   : > { %v1665_v25 = vpop.xlane.xlu0 %1664  ;;  %v6147_v2 = vpack.c.bf16 %v1076_v22, %v1072_v14  ;;  %v1082_v17 = vadd.f32 %v1081_v58, %v6134_v54  ;;  %v1083_v15 = vpop.f32.mrb[22].mxu1 }
 0x370   : > { %v1685_v63 = vsub.f32 %v6015_v55, %v1665_v25  ;;  %v6145_v55 = vpack.c.bf16 %v1074_v35, %v1070_v12  ;;  %4764 = vpow2.f32 %v1700_v34  ;;  %v1084_v27 = vadd.f32 %v1083_v15, %v6131_v6  ;;  %v1085_v4 = vpop.f32.mrb[23].mxu1  ;;  %4134 = vmatpush3.bf16.msra.mxu1 %v4727_v47  ;;  %v4728_v15 = vld [vmem:[#allocation10 + $0x10] sm:$0xff]  }
 0x371   : > { %v1086_v14 = vadd.f32 %v1085_v4, %v6134_v54  ;;  %v1089_v35 = vpop.f32.mrb[24].mxu1  ;;  %4135 = vmatprep.subr.bf16.mxu1 %v7196_v29 }
 0x372   : > { %v6141_v0 = vpop.eup %4758  ;;  %v1712_v38 = vmul.f32 1.442695, %v1685_v63  ;;  %v6163_v34 = vpack.c.bf16 %v1084_v27, %v1080_v44  ;;  %v6165_v63 = vpop.xlane.xlu1 %1654  ;;  %v1090_v4 = vadd.f32 %v1089_v35, %v6131_v6 }
 0x373   : > { %v1661_v61 = vpop.xlane.xlu0 %1660  ;;  %1728 = vadd.xlane.f32.xlu0 %v6141_v0  ;;  %v6154_v12 = vpop.eup %4760 }
 0x374   : > { %v1683_v25 = vsub.f32 %v6021_v7, %v1661_v61  ;;  %v6161_v7 = vsel %vm5959_vm2, -1e+30, %v6069_v62  ;;  %4766 = vpow2.f32 %v1712_v38  ;;  %v6168_v61 = vpack.c.bf16 %v1086_v14, %v1082_v17  ;;  %4136 = vmatpush3.bf16.msra.mxu1 %v4728_v15 }
 0x375   : > { %v6181_v17 = vsel %vm5959_vm2, -1e+30, %v6072_v30  ;;  %4137 = vmatprep.subr.bf16.mxu1 %v7196_v29 }
 0x376   : > { %v1708_v22 = vmul.f32 1.442695, %v1683_v25  ;;  %v1091_v25 = vpop.f32.mrb[25].mxu1  ;;  %v6174_v27 = vpop.eup %4762 }
 0x377   : > { %v1673_v58 = vpop.xlane.xlu0 %1672  ;;  %1724 = vadd.xlane.f32.xlu0 %v6154_v12  ;;  %v1092_v21 = vadd.f32 %v1091_v25, %v6134_v54  ;;  %v1093_v62 = vpop.f32.mrb[26].mxu1 }
 0x378   : > { %v1689_v11 = vsub.f32 %v6035_v10, %v1673_v58  ;;  %v1094_v44 = vadd.f32 %v1093_v62, %v6131_v6  ;;  %v1095_v38 = vpop.f32.mrb[27].mxu1  ;;  %4768 = vpow2.f32 %v1708_v22  ;;  %v4729_v22 = vld [vmem:[#allocation10 + $0x18] sm:$0xff]  }
 0x379   : > { %2142 = vmax.xlane.f32.xlu1 %v6161_v7  ;;  %v1096_v47 = vadd.f32 %v1095_v38, %v6134_v54  ;;  %v1099_v14 = vpop.f32.mrb[28].mxu1  ;;  %4138 = vmatpush3.bf16.msra.mxu1 %v4729_v22 }
 0x37a   : > { %v1720_v35 = vmul.f32 1.442695, %v1689_v11  ;;  %v6185_v25 = vpack.c.bf16 %v1094_v44, %v1090_v4  ;;  %v1100_v62 = vadd.f32 %v1099_v14, %v6131_v6  ;;  %v1101_v1 = vpop.f32.mrb[29].mxu1  ;;  %v6193_v38 = vpop.eup %4764  ;;  %4139 = vmatprep.subr.bf16.mxu1 %v7196_v29 }
 0x37b   : > { %1736 = vadd.xlane.f32.xlu0 %v6174_v27  ;;  %v1669_v10 = vpop.xlane.xlu0 %1668  ;;  %v6189_v57 = vpack.c.bf16 %v1096_v47, %v1092_v21  ;;  %v1102_v30 = vadd.f32 %v1101_v1, %v6134_v54  ;;  %v1103_v26 = vpop.f32.mrb[30].mxu1  ;;  %v6206_v1 = vsel %vm5959_vm2, -1e+30, %v6083_v49  ;;  %v4730_v49 = vld [vmem:[#allocation10 + $0x20] sm:$0xff]  }
 0x37c   : > { %v1687_v58 = vsub.f32 %v6041_v13, %v1669_v10  ;;  %v1676_v13 = vsub.f32 %v5965_v36, %v6113_v43  ;;  %v6197_v11 = vpop.xlane.xlu1 %1650  ;;  %v1104_v4 = vadd.f32 %v1103_v26, %v6131_v6  ;;  %v1105_v15 = vpop.f32.mrb[31].mxu1  ;;  %4770 = vpow2.f32 %v1720_v35 }
 0x37d   : > { %2138 = vmax.xlane.f32.xlu1 %v6181_v17  ;;  %v1106_v21 = vadd.f32 %v1105_v15, %v6134_v54  ;;  %v1109_v10 = vpop.f32.mrb[32].mxu1  ;;  %4140 = vmatpush3.bf16.msra.mxu1 %v4730_v49 }
 0x37e   : > { %v1716_v47 = vmul.f32 1.442695, %v1687_v58  ;;  %v6209_v36 = vpack.c.bf16 %v1104_v4, %v1100_v62  ;;  %v1110_v43 = vadd.f32 %v1109_v10, %v6131_v6  ;;  %v1111_v26 = vpop.f32.mrb[33].mxu1  ;;  %v6217_v15 = vpop.eup %4766  ;;  %v1694_v35 = vmul.f32 1.442695, %v1676_v13  ;;  %4141 = vmatprep.subr.bf16.mxu1 %v7196_v29 }
 0x37f   : > { %1732 = vadd.xlane.f32.xlu0 %v6193_v38  ;;  %v6201_v44 = vpop.permute.xlu0 %2427  ;;  %v6213_v14 = vpack.c.bf16 %v1106_v21, %v1102_v30  ;;  %v1113_v23 = vpop.f32.mrb[34].mxu1  ;;  %7198 = vst [vmem:[#allocation56_spill] sm:$0xff] %v6217_v15  ;;  %v1674_v58 = vsub.f32 %v5976_v31, %v6122_v46  ;;  %v6226_v30 = vsel %vm5959_vm2, -1e+30, %v6086_v45 }
 0x380   : > { %7197 = vst [vmem:[#allocation55_spill] sm:$0xff] %v6201_v44  ;;  %v1112_v44 = vadd.f32 %v1111_v26, %v6134_v54  ;;  %v1114_v62 = vadd.f32 %v1113_v23, %v6131_v6  ;;  %v1115_v4 = vpop.f32.mrb[35].mxu1  ;;  %4772 = vpow2.f32 %v1716_v47  ;;  %v6236_v50 = vpop.xlane.xlu1 %1662 }
 0x381   : > { %2150 = vmax.xlane.f32.xlu1 %v6206_v1  ;;  %v1116_v21 = vadd.f32 %v1115_v4, %v6134_v54  ;;  %v1119_v10 = vpop.f32.mrb[36].mxu1  ;;  %4774 = vpow2.f32 %v1694_v35 }
 0x382   : > { %v6231_v46 = vpack.c.bf16 %v1114_v62, %v1110_v43  ;;  %v1120_v23 = vadd.f32 %v1119_v10, %v6131_v6  ;;  %v1121_v31 = vpop.f32.mrb[37].mxu1  ;;  %v6234_v26 = vpop.eup %4768  ;;  %v1690_v43 = vmul.f32 1.442695, %v1674_v58  ;;  %v1680_v62 = vsub.f32 %v5985_v37, %v6165_v63 }
 0x383   : > { %1744 = vadd.xlane.f32.xlu0 %v6217_v15  ;;  %v2886_v22 = vpop.permute.xlu0 %2885  ;;  %v6239_v45 = vpack.c.bf16 %v1116_v21, %v1112_v44  ;;  %v1122_v47 = vadd.f32 %v1121_v31, %v6134_v54  ;;  %v1123_v4 = vpop.f32.mrb[38].mxu1  ;;  %v4731_v15 = vld [vmem:[#allocation10 + $0x28] sm:$0xff]   ;;  %v6251_v21 = vsel %vm5959_vm2, -1e+30, %v6101_v9 }
 0x384   : > { %4531 = vmatprep.subr.msk.bf16.mxu0 %vm1474_vm0, %v2886_v22  ;;  %v2926_v13 = vsel %vm1474_vm0, %v2886_v22, 0  ;;  %v1124_v49 = vadd.f32 %v1123_v4, %v6131_v6  ;;  %v1125_v22 = vpop.f32.mrb[39].mxu1  ;;  %4142 = vmatpush3.bf16.msra.mxu1 %v4731_v15  ;;  %v4732_v4 = vld [vmem:[#allocation10 + $0x30] sm:$0xff]   ;;  %4776 = vpow2.f32 %v1690_v43 }
 0x385   : > { %4344 = vmatpush3.bf16.xpose.msra.mxu0 %v2926_v13  ;;  %2146 = vmax.xlane.f32.xlu1 %v6226_v30  ;;  %v1126_v10 = vadd.f32 %v1125_v22, %v6134_v54  ;;  %v1129_v44 = vpop.f32.mrb[40].mxu1  ;;  %v577_v22 = vsub.s32 6, %v5667_v42  ;;  %v6272_v42 = vsel %vm5959_vm2, -1e+30, %v6106_v16  ;;  %v4733_v16 = vld [vmem:[#allocation10 + $0x38] sm:$0xff]  }
 0x386   : > { %v6253_v35 = vpack.c.bf16 %v1124_v49, %v1120_v23  ;;  %v1130_v58 = vadd.f32 %v1129_v44, %v6131_v6  ;;  %v1131_v37 = vpop.f32.mrb[41].mxu1  ;;  %4143 = vmatprep.subr.bf16.mxu1 %v7196_v29  ;;  %v6262_v9 = vpop.eup %4770  ;;  %v1702_v23 = vmul.f32 1.442695, %v1680_v62  ;;  %v1678_v49 = vsub.f32 %v5991_v33, %v6197_v11 }
 0x387   : > { %1740 = vadd.xlane.f32.xlu0 %v6234_v26  ;;  %v6257_v63 = vpack.c.bf16 %v1126_v10, %v1122_v47  ;;  %v1132_v13 = vadd.f32 %v1131_v37, %v6134_v54  ;;  %v1133_v31 = vpop.f32.mrb[42].mxu1  ;;  %7200 = vst [vmem:[#allocation58_spill] sm:$0xff] %v6262_v9  ;;  %v1659_v47 = vpop.xlane.xlu1 %1658 }
 0x388   : > { %v1134_v15 = vadd.f32 %v1133_v31, %v6131_v6  ;;  %v1135_v44 = vpop.f32.mrb[43].mxu1  ;;  %4144 = vmatpush3.bf16.msra.mxu1 %v4732_v4  ;;  %4778 = vpow2.f32 %v1702_v23  ;;  %v1684_v4 = vsub.f32 %v6005_v51, %v6236_v50 }
 0x389   : > { %2158 = vmax.xlane.f32.xlu1 %v6251_v21  ;;  %7199 = vst [vmem:[#allocation57_spill] sm:$0xff] %v6257_v63  ;;  %v1136_v10 = vadd.f32 %v1135_v44, %v6134_v54  ;;  %v1139_v37 = vpop.f32.mrb[44].mxu1  ;;  %v5018_v44 = vld [vmem:[%s7067_s3] sm:$0xff]  ;;  %4145 = vmatprep.subr.bf16.mxu1 %v7196_v29 }
 0x38a   : > { %v6274_v63 = vpack.c.bf16 %v1134_v15, %v1130_v58  ;;  %v1140_v43 = vadd.f32 %v1139_v37, %v6131_v6  ;;  %v1141_v62 = vpop.f32.mrb[45].mxu1  ;;  %v578_v18 = vrot.slane %v5018_v44, %v577_v22  ;;  %v6285_v58 = vpop.eup %4772  ;;  %v1698_v15 = vmul.f32 1.442695, %v1678_v49 }
 0x38b   : > { %1752 = vadd.xlane.f32.xlu0 %v6262_v9  ;;  %v6278_v33 = vpack.c.bf16 %v1136_v10, %v1132_v13  ;;  %v1142_v11 = vadd.f32 %v1141_v62, %v6134_v54  ;;  %v1143_v31 = vpop.f32.mrb[46].mxu1  ;;  %v1671_v9 = vpop.xlane.xlu1 %1670 }
 0x38c   : > { %v1144_v13 = vadd.f32 %v1143_v31, %v6131_v6  ;;  %v1145_v10 = vpop.f32.mrb[47].mxu1  ;;  %4146 = vmatpush3.bf16.msra.mxu1 %v4733_v16  ;;  %4780 = vpow2.f32 %v1698_v15  ;;  %v1710_v6 = vmul.f32 1.442695, %v1684_v4  ;;  %v1688_v15 = vsub.f32 %v6025_v24, %v1671_v9 }
 0x38d   : > { %2154 = vmax.xlane.f32.xlu1 %v6272_v42  ;;  %7201 = vst [vmem:[#allocation59_spill] sm:$0xff] %v6278_v33  ;;  %v1146_v37 = vadd.f32 %v1145_v10, %v6134_v54  ;;  %v4117_v62 = vpop.f32.mrb[48].mxu1  ;;  %v6292_v33 = vpop.eup %4774  ;;  %4183 = vmatprep.subr.bf16.mxu1 %v6145_v55  ;;  %v1682_v54 = vsub.f32 %v6011_v52, %v1659_v47 }
 0x38e   : > { %v6294_v22 = vpack.c.bf16 %v1144_v13, %v1140_v43  ;;  %v1295_v44 = vpop.f32.mrb[49].mxu1  ;;  %v6303_v16 = vpop.eup %4776  ;;  %4782 = vpow2.f32 %v1710_v6 }
 0x38f   : > { %1748 = vadd.xlane.f32.xlu0 %v6285_v58  ;;  %v6297_v23 = vpack.c.bf16 %v1146_v37, %v1142_v11  ;;  %v1296_v50 = vadd.f32 %v1295_v44, %v578_v18  ;;  %v4118_v51 = vpop.f32.mrb[50].mxu1  ;;  %v1706_v10 = vmul.f32 1.442695, %v1682_v54  ;;  %v1667_v52 = vpop.xlane.xlu1 %1666  ;;  %v1718_v37 = vmul.f32 1.442695, %v1688_v15 }
 0x390   : > { %v1298_v49 = vpop.f32.mrb[51].mxu1  ;;  %v1686_v62 = vsub.f32 %v6031_v8, %v1667_v52 }
 0x391   : > { %1726 = vadd.xlane.f32.xlu1 %v6292_v33  ;;  %v1343_v43 = vmax.f32 %v1296_v50, 0.0  ;;  %v4121_v31 = vpop.f32.mrb[52].mxu1  ;;  %4784 = vpow2.f32 %v1706_v10 }
 0x392   : > { %v1308_v13 = vpop.f32.mrb[53].mxu1  ;;  %v6307_v47 = vpop.eup %4778  ;;  %4786 = vpow2.f32 %v1718_v37  ;;  %v1714_v9 = vmul.f32 1.442695, %v1686_v62 }
 0x393   : > { %v1344_v18 = vpack.c.bf16 %v1343_v43, %v1343_v43  ;;  %v4122_v11 = vpop.f32.mrb[54].mxu1 }
 0x394   : > { %v1310_v4 = vpop.f32.mrb[55].mxu1  ;;  %4788 = vpow2.f32 %v1714_v9 }
 0x395   : > { %1722 = vadd.xlane.f32.xlu1 %v6303_v16  ;;  %4148 = vmatmul.mubr.bf16.vlgmr.msra.gmra.mrb[64].mxu1 %v1344_v18  ;;  %v4125_v44 = vpop.f32.mrb[56].mxu1 }
 0x396   : > { %4184 = vmatpush3.bf16.msra.mxu1 %v6145_v55  ;;  %v1320_v50 = vpop.f32.mrb[57].mxu1  ;;  %v6313_v51 = vpop.eup %4780 }
 0x397   : > { %4185 = vmatprep.subr.bf16.mxu1 %v6163_v34  ;;  %v4126_v24 = vpop.f32.mrb[58].mxu1 }
 0x398   : > { %v1322_v55 = vpop.f32.mrb[59].mxu1  ;;  %v6318_v6 = vpop.eup %4782 }
 0x399   : > { %1734 = vadd.xlane.f32.xlu1 %v6307_v47  ;;  %v4129_v8 = vpop.f32.mrb[60].mxu1 }
 0x39a   : > { %4186 = vmatpush3.bf16.msra.mxu1 %v6163_v34  ;;  %v1332_v54 = vpop.f32.mrb[61].mxu1 }
 0x39b   : > { %4187 = vmatprep.subr.bf16.mxu1 %v6185_v25  ;;  %v6323_v34 = vpop.eup %4784  ;;  %v4130_v49 = vpop.f32.mrb[62].mxu1 }
 0x39c   : > { %v1334_v43 = vpop.f32.mrb[63].mxu1  ;;  %v6328_v31 = vpop.eup %4786 }
 0x39d   : > { %1730 = vadd.xlane.f32.xlu1 %v6313_v51 }
 0x39e   : > { %4188 = vmatpush3.bf16.msra.mxu1 %v6185_v25  ;;  %v6333_v25 = vpop.eup %4788 }
 0x39f   : > { %4189 = vmatprep.subr.bf16.mxu1 %v6209_v36 }
 0x3a1   : > { %1742 = vadd.xlane.f32.xlu1 %v6318_v6 }
 0x3a2   : > { %4190 = vmatpush3.bf16.msra.mxu1 %v6209_v36  ;;  %v6342_v36 = vpop.permute.xlu0 %2429 }
 0x3a3   : > { %4191 = vmatprep.subr.bf16.mxu1 %v6231_v46 }
 0x3a5   : > { %1738 = vadd.xlane.f32.xlu1 %v6323_v34 }
 0x3a6   : > { %4192 = vmatpush3.bf16.msra.mxu1 %v6231_v46 }
 0x3a7   : > { %4193 = vmatprep.subr.bf16.mxu1 %v6253_v35 }
 0x3a9   : > { %1750 = vadd.xlane.f32.xlu1 %v6328_v31 }
 0x3aa   : > { %4194 = vmatpush3.bf16.msra.mxu1 %v6253_v35 }
 0x3ab   : > { %4195 = vmatprep.subr.bf16.mxu1 %v6274_v63 }
 0x3ad   : > { %1746 = vadd.xlane.f32.xlu1 %v6333_v25 }
 0x3ae   : > { %4196 = vmatpush3.bf16.msra.mxu1 %v6274_v63 }
 0x3af   : > { %4197 = vmatprep.subr.bf16.mxu1 %v6294_v22 }
 0x3b2   : > { %4198 = vmatpush3.bf16.msra.mxu1 %v6294_v22 }
 0x3b3   : > { %4247 = vmatprep.subr.bf16.mxu1 %v6147_v2 }
 0x3cd   : > { %v2135_v46 = vpop.xlane.xlu1 %2134 }
 0x3ce   : > { %v2164_v13 = vsub.f32 %v6052_v40, %v2135_v46 }
 0x3cf   : > { %v2137_v18 = vpop.xlane.xlu0 %2136 }
 0x3d0   : > { %v2182_v11 = vmul.f32 1.442695, %v2164_v13  ;;  %v2165_v35 = vsub.f32 %v6057_v53, %v2137_v18 }
 0x3d1   : > { %v2131_v10 = vpop.xlane.xlu1 %2130 }
 0x3d2   : > { %4790 = vpow2.f32 %v2182_v11  ;;  %v2184_v15 = vmul.f32 1.442695, %v2165_v35  ;;  %v2162_v63 = vsub.f32 %v6062_v3, %v2131_v10 }
 0x3d3   : > { %v2133_v4 = vpop.xlane.xlu0 %2132 }
 0x3d4   : > { %4792 = vpow2.f32 %v2184_v15  ;;  %v2178_v52 = vmul.f32 1.442695, %v2162_v63  ;;  %v2163_v22 = vsub.f32 %v6067_v56, %v2133_v4 }
 0x3d5   : > { %v6366_v55 = vpop.permute.xlu1 %2425 }
 0x3d6   : > { %4794 = vpow2.f32 %v2178_v52  ;;  %v2180_v37 = vmul.f32 1.442695, %v2163_v22 }
 0x3d7   : > { %v2145_v56 = vpop.xlane.xlu0 %2144 }
 0x3d8   : > { %4796 = vpow2.f32 %v2180_v37 }
 0x3db   : > { %v2141_v44 = vpop.xlane.xlu0 %2140 }
 0x3dc   : > { %v6348_v62 = vpop.eup %4790  ;;  %v2167_v15 = vsub.f32 %v6081_v20, %v2141_v44 }
 0x3dd   : > { %2214 = vadd.xlane.f32.xlu1 %v6348_v62 }
 0x3de   : > { %v6351_v40 = vpop.eup %4792 }
 0x3df   : > { %2216 = vadd.xlane.f32.xlu0 %v6351_v40  ;;  %v2153_v50 = vpop.xlane.xlu0 %2152 }
 0x3e0   : > { %v6354_v53 = vpop.eup %4794  ;;  %v2173_v44 = vsub.f32 %v6090_v48, %v2153_v50 }
 0x3e1   : > { %2210 = vadd.xlane.f32.xlu1 %v6354_v53 }
 0x3e2   : > { %v6357_v3 = vpop.eup %4796 }
 0x3e3   : > { %2212 = vadd.xlane.f32.xlu0 %v6357_v3  ;;  %v2149_v24 = vpop.xlane.xlu0 %2148 }
 0x3e7   : > { %v6368_v9 = vpop.xlane.xlu0 %2160 }
 0x3eb   : > { %v6371_v49 = vpop.xlane.xlu0 %2156 }
 0x3f9   : > { %2431 = vrot.lane.b32.xlu0 %v5749_v60, %s5288_s28 }
 0x3fd   : > { %2889 = vrot.lane.b32.xlu0 %v5747_v59, %s5289_s2  ;;  %v2169_v59 = vsub.f32 %v6076_v41, %v2145_v56 }
 0x3ff   : > { %v2192_v10 = vmul.f32 1.442695, %v2169_v59  ;;  %v2200_v59 = vmul.f32 1.442695, %v2173_v44 }
 0x400   : > { %v1729_v18 = vpop.xlane.xlu0 %1728 }
 0x401   : > { %2433 = vrot.lane.b32.xlu0 %v5775_v32, %s5288_s28 }
 0x404   : > { %v1725_v63 = vpop.xlane.xlu0 %1724 }
 0x406   : > { %v2143_v8 = vpop.xlane.xlu1 %2142 }
 0x407   : > { %v2168_v54 = vsub.f32 %v6161_v7, %v2143_v8  ;;  %v2188_v7 = vmul.f32 1.442695, %v2167_v15 }
 0x409   : > { %v2190_v43 = vmul.f32 1.442695, %v2168_v54 }
 0x40a   : > { %v2139_v46 = vpop.xlane.xlu1 %2138 }
 0x40b   : > { %4798 = vpow2.f32 %v2190_v43  ;;  %v2166_v13 = vsub.f32 %v6181_v17, %v2139_v46  ;;  %v1737_v17 = vpop.xlane.xlu0 %1736 }
 0x40d   : > { %v2186_v11 = vmul.f32 1.442695, %v2166_v13  ;;  %v2171_v13 = vsub.f32 %v6097_v19, %v2149_v24 }
 0x40e   : > { %v2151_v35 = vpop.xlane.xlu1 %2150 }
 0x40f   : > { %4800 = vpow2.f32 %v2186_v11  ;;  %v2172_v22 = vsub.f32 %v6206_v1, %v2151_v35  ;;  %v1733_v43 = vpop.xlane.xlu0 %1732  ;;  %v2196_v35 = vmul.f32 1.442695, %v2171_v13 }
 0x410   : > { %4802 = vpow2.f32 %v2192_v10 }
 0x411   : > { %4804 = vpow2.f32 %v2188_v7  ;;  %v2198_v41 = vmul.f32 1.442695, %v2172_v22 }
 0x412   : > { %v2147_v4 = vpop.xlane.xlu1 %2146 }
 0x413   : > { %v2170_v56 = vsub.f32 %v6226_v30, %v2147_v4  ;;  %4806 = vpow2.f32 %v2198_v41  ;;  %v1745_v48 = vpop.xlane.xlu0 %1744  ;;  %v2177_v41 = vsub.f32 %v6110_v39, %v6368_v9 }
 0x414   : > { %4808 = vrcp.f32 %v1725_v63 }
 0x415   : > { %v6376_v52 = vpop.eup %4798  ;;  %v2194_v54 = vmul.f32 1.442695, %v2170_v56  ;;  %v2208_v9 = vmul.f32 1.442695, %v2177_v41 }
 0x416   : > { %v2159_v37 = vpop.xlane.xlu1 %2158  ;;  %2222 = vadd.xlane.f32.xlu1 %v6376_v52 }
 0x417   : > { %v2176_v50 = vsub.f32 %v6251_v21, %v2159_v37  ;;  %v1741_v4 = vpop.xlane.xlu0 %1740 }
 0x419   : > { %v6380_v8 = vpop.eup %4800 }
 0x41a   : > { %2218 = vadd.xlane.f32.xlu1 %v6380_v8  ;;  %v2155_v20 = vpop.xlane.xlu1 %2154  ;;  %v6385_v1 = vpop.eup %4802 }
 0x41b   : > { %v6389_v11 = vpop.eup %4804  ;;  %v2174_v15 = vsub.f32 %v6272_v42, %v2155_v20 }
 0x41d   : > { %v6393_v19 = vpop.eup %4806  ;;  %v2202_v56 = vmul.f32 1.442695, %v2174_v15 }
 0x41e   : > { %v1727_v46 = vpop.xlane.xlu1 %1726  ;;  %v4809_v24 = vpop.eup %4808 }
 0x41f   : > { %4810 = vrcp.f32 %v1727_v46  ;;  %v1771_v44 = vmul.f32 %v4809_v24, %v6154_v12 }
 0x420   : > { %2224 = vadd.xlane.f32.xlu0 %v6385_v1  ;;  %4812 = vpow2.f32 %v2194_v54 }
 0x421   : > { %4814 = vrcp.f32 %v1729_v18  ;;  %v2206_v18 = vmul.f32 1.442695, %v2176_v50 }
 0x422   : > { %v1723_v30 = vpop.xlane.xlu1 %1722 }
 0x423   : > { %4816 = vrcp.f32 %v1723_v30 }
 0x424   : > { %2220 = vadd.xlane.f32.xlu0 %v6389_v11  ;;  %4818 = vpow2.f32 %v2200_v59 }
 0x425   : > { %4820 = vpow2.f32 %v2196_v35 }
 0x426   : > { %v1735_v10 = vpop.xlane.xlu1 %1734 }
 0x427   : > { %4822 = vrcp.f32 %v1735_v10 }
 0x428   : > { %2230 = vadd.xlane.f32.xlu0 %v6393_v19  ;;  %4824 = vrcp.f32 %v1733_v43  ;;  %v1753_v43 = vpop.xlane.xlu0 %1752 }
 0x429   : > { %v4811_v63 = vpop.eup %4810  ;;  %4826 = vrcp.f32 %v1737_v17 }
 0x42a   : > { %v1731_v7 = vpop.xlane.xlu1 %1730  ;;  %v6397_v22 = vpop.eup %4812  ;;  %v1772_v42 = vmul.f32 %v4811_v63, %v6292_v33 }
 0x42b   : > { %4828 = vrcp.f32 %v1731_v7  ;;  %2887 = vrot.lane.b32.xlu1 %v5723_v28, %s5289_s2  ;;  %v4815_v21 = vpop.eup %4814 }
 0x42c   : > { %2226 = vadd.xlane.f32.xlu0 %v6397_v22  ;;  %4830 = vpow2.f32 %v2206_v18  ;;  %v1773_v28 = vmul.f32 %v4815_v21, %v6141_v0  ;;  %v1749_v35 = vpop.xlane.xlu0 %1748 }
 0x42d   : > { %v4817_v37 = vpop.eup %4816  ;;  %4832 = vrcp.f32 %v1741_v4 }
 0x42e   : > { %v1743_v17 = vpop.xlane.xlu1 %1742  ;;  %v1770_v20 = vmul.f32 %v4817_v37, %v6303_v16  ;;  %v6407_v54 = vpop.eup %4818  ;;  %v1787_v33 = vpack.c.bf16 %v1773_v28, %v1772_v42 }
 0x42f   : > { %4834 = vrcp.f32 %v1743_v17  ;;  %v6411_v39 = vpop.eup %4820 }
 0x430   : > { %2232 = vadd.xlane.f32.xlu0 %v6407_v54  ;;  %v1786_v46 = vpack.c.bf16 %v1771_v44, %v1770_v20  ;;  %4836 = vpow2.f32 %v2202_v56  ;;  %v7202_v56 = vld [vmem:[#allocation56_spill] sm:$0xff]  ;;  %v7203_v20 = vld [vmem:[#allocation57_spill] sm:$0xff] }
 0x431   : > { %v4823_v13 = vpop.eup %4822  ;;  %4838 = vrcp.f32 %v1745_v48 }
 0x432   : > { %v1739_v16 = vpop.xlane.xlu1 %1738  ;;  %4199 = vmatprep.mubr.bf16.mxu1 %v1786_v46  ;;  %v4825_v12 = vpop.eup %4824  ;;  %v1776_v30 = vmul.f32 %v4823_v13, %v6307_v47 }
 0x433   : > { %4840 = vrcp.f32 %v1739_v16  ;;  %4200 = vmatmul.mubr.bf16.vlgmr.msra.gmra.mrb[68].mxu1 %v1787_v33  ;;  %v4827_v59 = vpop.eup %4826  ;;  %v1775_v10 = vmul.f32 %v4825_v12, %v6193_v38  ;;  %v7205_v33 = vld [vmem:[#allocation59_spill] sm:$0xff]  ;;  %v7209_v16 = vld [vmem:[#allocation30_spill] sm:$0xff]  ;;  %v7210_v12 = vld [vmem:[#allocation24_spill] sm:$0xff] }
 0x434   : > { %4248 = vmatpush3.bf16.msra.mxu1 %v6147_v2  ;;  %2228 = vadd.xlane.f32.xlu0 %v6411_v39  ;;  %4842 = vpow2.f32 %v2208_v9  ;;  %v1777_v18 = vmul.f32 %v4827_v59, %v6174_v27  ;;  %v7211_v59 = vld [vmem:[#allocation29_spill] sm:$0xff] }
 0x435   : > { %v4829_v0 = vpop.eup %4828  ;;  %4249 = vmatprep.subr.bf16.mxu1 %v6168_v61 }
 0x436   : > { %v1751_v50 = vpop.xlane.xlu1 %1750  ;;  %v1774_v48 = vmul.f32 %v4829_v0, %v6313_v51  ;;  %v6419_v24 = vpop.eup %4830  ;;  %v1789_v47 = vpack.c.bf16 %v1777_v18, %v1776_v30  ;;  %v7213_v0 = vld [vmem:[#allocation28_spill] sm:$0xff] }
 0x437   : > { %4844 = vrcp.f32 %v1751_v50  ;;  %v4833_v15 = vpop.eup %4832  ;;  %v7214_v30 = vld [vmem:[#allocation32_spill] sm:$0xff]  ;;  %v7215_v50 = vld [vmem:[#allocation31_spill] sm:$0xff] }
 0x438   : > { %4250 = vmatpush3.bf16.msra.mxu1 %v6168_v61  ;;  %2238 = vadd.xlane.f32.xlu0 %v6419_v24  ;;  %v1788_v2 = vpack.c.bf16 %v1775_v10, %v1774_v48  ;;  %4846 = vrcp.f32 %v1749_v35  ;;  %v2175_v61 = vsub.f32 %v6119_v5, %v6371_v49  ;;  %v1779_v37 = vmul.f32 %v4833_v15, %v6234_v26  ;;  %v7216_v48 = vld [vmem:[#allocation25_spill] sm:$0xff] }
 0x439   : > { %4251 = vmatprep.subr.bf16.mxu1 %v6189_v57  ;;  %v4835_v63 = vpop.eup %4834  ;;  %4848 = vrcp.f32 %v1753_v43  ;;  %v7204_v43 = vld [vmem:[#allocation58_spill] sm:$0xff]  ;;  %v7217_v15 = vld [vmem:[#allocation33_spill] sm:$0xff] }
 0x43a   : > { %v1747_v51 = vpop.xlane.xlu1 %1746  ;;  %4203 = vmatprep.mubr.bf16.mxu1 %v1788_v2  ;;  %v6425_v38 = vpop.eup %4836  ;;  %v1780_v7 = vmul.f32 %v4835_v63, %v6318_v6  ;;  %v2204_v17 = vmul.f32 1.442695, %v2175_v61 }
 0x43b   : > { %4850 = vrcp.f32 %v1747_v51  ;;  %4204 = vmatmul.mubr.bf16.gmra.mrb[72].mxu1 %v1789_v47  ;;  %v4839_v27 = vpop.eup %4838 }
 0x43c   : > { %4252 = vmatpush3.bf16.msra.mxu1 %v6189_v57  ;;  %2234 = vadd.xlane.f32.xlu0 %v6425_v38  ;;  %v1781_v42 = vmul.f32 %v4839_v27, %v7202_v56  ;;  %4852 = vpow2.f32 %v2204_v17  ;;  %v2469_v56 = vsel %vm1474_vm0, %v6366_v55, 0 }
 0x43d   : > { %v4841_v4 = vpop.eup %4840  ;;  %4253 = vmatprep.subr.bf16.mxu1 %v6213_v14 }
 0x43e   : > { %v1778_v21 = vmul.f32 %v4841_v4, %v6323_v34  ;;  %v6435_v41 = vpop.eup %4842  ;;  %v1791_v5 = vpack.c.bf16 %v1781_v42, %v1780_v7  ;;  %v7220_v42 = vld [vmem:[#allocation55_spill] sm:$0xff] }
 0x440   : > { %4254 = vmatpush3.bf16.msra.mxu1 %v6213_v14  ;;  %2240 = vadd.xlane.f32.xlu0 %v6435_v41  ;;  %v1790_v57 = vpack.c.bf16 %v1779_v37, %v1778_v21 }
 0x441   : > { %4255 = vmatprep.subr.bf16.mxu1 %v6239_v45  ;;  %v4845_v49 = vpop.eup %4844 }
 0x442   : > { %4207 = vmatprep.mubr.bf16.mxu1 %v1790_v57  ;;  %v4847_v6 = vpop.eup %4846  ;;  %v1784_v44 = vmul.f32 %v4845_v49, %v6328_v31  ;;  %v7207_v31 = vld [vmem:[#allocation34_spill] sm:$0xff]  ;;  %v3872_v57 = vld [vmem:[%s7072_s8] ss:$0 sm:$0xff] }
 0x443   : > { %4208 = vmatmul.mubr.bf16.gmra.mrb[76].mxu1 %v1791_v5  ;;  %v4849_v34 = vpop.eup %4848  ;;  %v1783_v28 = vmul.f32 %v4847_v6, %v6285_v58  ;;  %v7206_v58 = vld [vmem:[#allocation53_spill] sm:$0xff] }
 0x444   : > { %4256 = vmatpush3.bf16.msra.mxu1 %v6239_v45  ;;  %v1785_v46 = vmul.f32 %v4849_v34, %v7204_v43  ;;  %v2475_v43 = vsel %vm1474_vm0, %v6342_v36, 0 }
 0x445   : > { %v4851_v26 = vpop.eup %4850  ;;  %4257 = vmatprep.subr.bf16.mxu1 %v7203_v20 }
 0x446   : > { %v1782_v14 = vmul.f32 %v4851_v26, %v6333_v25  ;;  %v1793_v13 = vpack.c.bf16 %v1785_v46, %v1784_v44  ;;  %v6451_v45 = vpop.eup %4852  ;;  %v7208_v25 = vld [vmem:[#allocation27_spill] sm:$0xff]  ;;  %v2472_v26 = vsel %vm1474_vm0, %v7220_v42, 0 }
 0x448   : > { %4258 = vmatpush3.bf16.msra.mxu1 %v7203_v20  ;;  %v1792_v9 = vpack.c.bf16 %v1783_v28, %v1782_v14 }
 0x449   : > { %4259 = vmatprep.subr.bf16.mxu1 %v7205_v33 }
 0x44a   : > { %4211 = vmatprep.mubr.bf16.mxu1 %v1792_v9 }
 0x44b   : > { %4212 = vmatmul.mubr.bf16.gmra.mrb[80].mxu1 %v1793_v13 }
 0x44c   : > { %4260 = vmatpush3.bf16.msra.mxu1 %v7205_v33 }
 0x44d   : > { %4261 = vmatprep.subr.bf16.mxu1 %v6297_v23 }
 0x44f   : > { %2236 = vadd.xlane.f32.xlu1 %v6451_v45 }
 0x450   : > { %4262 = vmatpush3.bf16.msra.mxu1 %v6297_v23  ;;  %v7212_v23 = vld [vmem:[#allocation26_spill] sm:$0xff] }
 0x451   : > { %4523 = vmatprep.subr.msk.bf16.mxu1 %vm1474_vm0, %v7206_v58 }
 0x456   : > { %2891 = vrot.lane.b32.xlu0 %v7207_v31, %s5289_s2 }
 0x45a   : > { %2405 = vrot.lane.b32.xlu0 %v7208_v25, %s5288_s28 }
 0x45e   : > { %2407 = vrot.lane.b32.xlu0 %v7209_v16, %s5288_s28 }
 0x460   : > { %2403 = vrot.lane.b32.xlu1 %v7210_v12, %s5288_s28 }
 0x462   : > { %2895 = vrot.lane.b32.xlu0 %v7211_v59, %s5289_s2 }
 0x464   : > { %2893 = vrot.lane.b32.xlu1 %v7212_v23, %s5289_s2 }
 0x466   : > { %2413 = vrot.lane.b32.xlu0 %v7213_v0, %s5288_s28 }
 0x468   : > { %2409 = vrot.lane.b32.xlu1 %v7214_v30, %s5288_s28  ;;  %v1450_v5 = vpop.f32.mrb[64].mxu1 }
 0x469   : > { %v1451_v49 = vadd.f32 %v3872_v57, %v1450_v5  ;;  %v4149_v6 = vpop.f32.mrb[65].mxu1 }
 0x46a   : > { %v2215_v35 = vpop.xlane.xlu1 %2214  ;;  %2415 = vrot.lane.b32.xlu0 %v7215_v50, %s5288_s28  ;;  %v1453_v34 = vpop.f32.mrb[66].mxu1 }
 0x46b   : > { %1456 = vst [vmem:[%s6527_s25] sm:$0xff] %v1451_v49 }
 0x46c   : > { %2411 = vrot.lane.b32.xlu1 %v7216_v48, %s5288_s28  ;;  %v2217_v10 = vpop.xlane.xlu0 %2216 }
 0x46d   : > { %4854 = vrcp.f32 %v2217_v10 }
 0x46e   : > { %v2211_v18 = vpop.xlane.xlu1 %2210  ;;  %2899 = vrot.lane.b32.xlu0 %v5775_v32, %s5289_s2 }
 0x46f   : > { %4856 = vrcp.f32 %v2211_v18 }
 0x470   : > { %4858 = vrcp.f32 %v2215_v35  ;;  %2897 = vrot.lane.b32.xlu1 %v5749_v60, %s5289_s2  ;;  %v2213_v2 = vpop.xlane.xlu0 %2212 }
 0x471   : > { %4860 = vrcp.f32 %v2213_v2 }
 0x472   : > { %2871 = vrot.lane.b32.xlu0 %v7208_v25, %s5289_s2 }
 0x474   : > { %2417 = vrot.lane.b32.xlu1 %v7217_v15, %s5288_s28  ;;  %v2432_v17 = vpop.permute.xlu0 %2431  ;;  %s3641_s28 = sshll.u32 %s6527_s25, 4  ;;  %s3642_s28 = int_to_ptr.vmem [resolvable:$true] %s3641_s28 }
 0x475   : > { %v2478_v13 = vsel %vm1474_vm0, %v2432_v17, 0  ;;  %s5163_s23 = scalar_lea.vmem %s3642_s28, 128  ;;  %p5170_p8 = scmp.lt.s32.totalorder %s3642_s28, %s5168_s5 }
 0x476   : > { %2875 = vrot.lane.b32.xlu0 %v7214_v30, %s5289_s2  ;;  %p5164_p1 = scmp.ne.s32.totalorder %s3642_s28, %s5163_s23  ;;  %p5171_p6 = scmp.lt.s32.totalorder %s5169_s13, %s5163_s23 }
 0x477   : > { %v4855_v47 = vpop.eup %4854 }
 0x478   : > { %2869 = vrot.lane.b32.xlu1 %v7210_v12, %s5289_s2  ;;  %v2261_v51 = vmul.f32 %v4855_v47, %v6351_v40  ;;  %v2460_v40 = vsel %vm1474_vm0, %v7206_v58, 0  ;;  %v2890_v20 = vpop.permute.xlu0 %2889  ;;  %p5165_p4 = pnand %p5164_p1, %p5494_p5  ;;  %p5172_p10 = por %p5171_p6, %p5170_p8 }
 0x479   : > { %v4857_v32 = vpop.eup %4856 }
 0x47a   : > { %v4859_v63 = vpop.eup %4858  ;;  %2879 = vrot.lane.b32.xlu0 %v7213_v0, %s5289_s2  ;;  %v2258_v27 = vmul.f32 %v4857_v32, %v6354_v53  ;;  %v7218_v53 = vld [vmem:[#allocation52_spill] sm:$0xff]  ;;  %v7221_v0 = vld [vmem:[#allocation35_spill] sm:$0xff]  ;;  %p5166_p0 = pneg %p5165_p4 }
 0x47b   : > { %v4861_v60 = vpop.eup %4860  ;;  %v2260_v4 = vmul.f32 %v4859_v63, %v6348_v62  ;;  %v2463_v62 = vsel %vm1474_vm0, %v7218_v53, 0 }
 0x47c   : > { %2873 = vrot.lane.b32.xlu1 %v7209_v16, %s5289_s2  ;;  %v2259_v61 = vmul.f32 %v4861_v60, %v6357_v3  ;;  %v7219_v3 = vld [vmem:[#allocation54_spill] sm:$0xff]  ;;  %v2434_v28 = vpop.permute.xlu0 %2433  ;;  %p5173_p3 = pnand %p5172_p10, %p5166_p0 }
 0x47d   : > { %v2275_v21 = vpack.c.bf16 %v2261_v51, %v2260_v4  ;;  %v2466_v37 = vsel %vm1474_vm0, %v7219_v3, 0  ;;  %v2481_v16 = vsel %vm1474_vm0, %v2434_v28, 0 }
 0x47e   : > { %2883 = vrot.lane.b32.xlu0 %v7217_v15, %s5289_s2  ;;  %v2274_v7 = vpack.c.bf16 %v2259_v61, %v2258_v27 }
 0x480   : > { %2877 = vrot.lane.b32.xlu1 %v7216_v48, %s5289_s2  ;;  %4263 = vmatprep.mubr.bf16.mxu1 %v2274_v7 }
 0x481   : > { %4264 = vmatmul.mubr.bf16.vlgmr.msra.gmra.mrb[68].mxu1 %v2275_v21 }
 0x482   : > { %4280 = vmatpush3.bf16.xpose.msra.mxu1 %v2460_v40 }
 0x483   : > { %4524 = vmatprep.subr.msk.bf16.mxu1 %vm1474_vm0, %v7218_v53 }
 0x484   : > { %2881 = vrot.lane.b32.xlu1 %v7215_v50, %s5289_s2  ;;  %s3615_s2 = scalar_lea.sflag [#allocation13], %s5586_s11 }
 0x48a   : > { %4282 = vmatpush3.bf16.xpose.msra.mxu1 %v2463_v62 }
 0x48b   : > { %4525 = vmatprep.subr.msk.bf16.mxu1 %vm1474_vm0, %v7219_v3 }
 0x492   : > { %4284 = vmatpush3.bf16.xpose.msra.mxu1 %v2466_v37 }
 0x493   : > { %4526 = vmatprep.subr.msk.bf16.mxu1 %vm1474_vm0, %v6366_v55  ;;  %v4150_v55 = vpop.f32.mrb[67].mxu1 }
 0x49a   : > { %4286 = vmatpush3.bf16.xpose.msra.mxu1 %v2469_v56 }
 0x49b   : > { %4527 = vmatprep.subr.msk.bf16.mxu1 %vm1474_vm0, %v7220_v42 }
 0x4a2   : > { %4288 = vmatpush3.bf16.xpose.msra.mxu1 %v2472_v26 }
 0x4a3   : > { %4528 = vmatprep.subr.msk.bf16.mxu1 %vm1474_vm0, %v6342_v36  ;;  %v2223_v44 = vpop.xlane.xlu1 %2222  ;;  %v2932_v36 = vsel %vm1474_vm0, %v2890_v20, 0 }
 0x4a7   : > { %v2219_v14 = vpop.xlane.xlu1 %2218 }
 0x4aa   : > { %4290 = vmatpush3.bf16.xpose.msra.mxu1 %v2475_v43 }
 0x4ab   : > { %4529 = vmatprep.subr.msk.bf16.mxu1 %vm1474_vm0, %v2432_v17  ;;  %v2888_v46 = vpop.permute.xlu1 %2887 }
 0x4ac   : > { %v2929_v9 = vsel %vm1474_vm0, %v2888_v46, 0  ;;  %4532 = vmatprep.subr.msk.bf16.mxu0 %vm1474_vm0, %v2888_v46  ;;  %v7222_v46 = vld [vmem:[#allocation37_spill] sm:$0xff] }
 0x4ad   : > { %4346 = vmatpush3.bf16.xpose.msra.mxu0 %v2929_v9  ;;  %v2225_v33 = vpop.xlane.xlu0 %2224 }
 0x4ae   : > { %4533 = vmatprep.subr.msk.bf16.mxu0 %vm1474_vm0, %v2890_v20  ;;  %4862 = vrcp.f32 %v2225_v33  ;;  %v7223_v33 = vld [vmem:[#allocation39_spill] sm:$0xff] }
 0x4af   : > { %4864 = vrcp.f32 %v2219_v14 }
 0x4b0   : > { %4866 = vrcp.f32 %v2223_v44 }
 0x4b1   : > { %v2221_v58 = vpop.xlane.xlu0 %2220 }
 0x4b2   : > { %4292 = vmatpush3.bf16.xpose.msra.mxu1 %v2478_v13  ;;  %4868 = vrcp.f32 %v2221_v58  ;;  %v7224_v58 = vld [vmem:[#allocation41_spill] sm:$0xff] }
 0x4b3   : > { %4530 = vmatprep.subr.msk.bf16.mxu1 %vm1474_vm0, %v2434_v28 }
 0x4b5   : > { %4348 = vmatpush3.bf16.xpose.msra.mxu0 %v2932_v36  ;;  %v2231_v31 = vpop.xlane.xlu0 %2230  ;;  %v7225_v36 = vld [vmem:[#allocation43_spill] sm:$0xff] }
 0x4b8   : > { %v4863_v25 = vpop.eup %4862 }
 0x4b9   : > { %v2227_v12 = vpop.xlane.xlu0 %2226  ;;  %v4865_v59 = vpop.eup %4864  ;;  %v2265_v35 = vmul.f32 %v4863_v25, %v6385_v1 }
 0x4ba   : > { %4294 = vmatpush3.bf16.xpose.msra.mxu1 %v2481_v16  ;;  %v4867_v23 = vpop.eup %4866  ;;  %v2262_v48 = vmul.f32 %v4865_v59, %v6380_v8  ;;  %v7226_v16 = vld [vmem:[#allocation45_spill] sm:$0xff] }
 0x4bb   : > { %4311 = vmatprep.subr.bf16.mxu1 %v7221_v0  ;;  %v2264_v18 = vmul.f32 %v4867_v23, %v6376_v52 }
 0x4bc   : > { %v4869_v30 = vpop.eup %4868 }
 0x4bd   : > { %v2233_v50 = vpop.xlane.xlu0 %2232  ;;  %v2263_v10 = vmul.f32 %v4869_v30, %v6389_v11  ;;  %v2277_v15 = vpack.c.bf16 %v2265_v35, %v2264_v18  ;;  %v7229_v30 = vld [vmem:[#allocation36_spill] sm:$0xff] }
 0x4be   : > { %4870 = vrcp.f32 %v2233_v50 }
 0x4bf   : > { %v2276_v2 = vpack.c.bf16 %v2263_v10, %v2262_v48  ;;  %4872 = vrcp.f32 %v2227_v12  ;;  %v7227_v12 = vld [vmem:[#allocation47_spill] sm:$0xff]  ;;  %v7230_v10 = vmov 0  }
 0x4c0   : > { %4874 = vrcp.f32 %v2231_v31 }
 0x4c1   : > { %4267 = vmatprep.mubr.bf16.mxu1 %v2276_v2  ;;  %v2229_v47 = vpop.xlane.xlu0 %2228 }
 0x4c2   : > { %4876 = vrcp.f32 %v2229_v47  ;;  %4268 = vmatmul.mubr.bf16.gmra.mrb[72].mxu1 %v2277_v15 }
 0x4c5   : > { %v2239_v32 = vpop.xlane.xlu0 %2238 }
 0x4c8   : > { %v4871_v63 = vpop.eup %4870 }
 0x4c9   : > { %v2235_v60 = vpop.xlane.xlu0 %2234  ;;  %v4873_v1 = vpop.eup %4872  ;;  %v2269_v8 = vmul.f32 %v4871_v63, %v6407_v54 }
 0x4ca   : > { %v4875_v51 = vpop.eup %4874  ;;  %v2266_v52 = vmul.f32 %v4873_v1, %v6397_v22 }
 0x4cb   : > { %v2268_v4 = vmul.f32 %v4875_v51, %v6393_v19 }
 0x4cc   : > { %v4877_v27 = vpop.eup %4876 }
 0x4cd   : > { %v2241_v11 = vpop.xlane.xlu0 %2240  ;;  %v2267_v61 = vmul.f32 %v4877_v27, %v6411_v39  ;;  %v2279_v21 = vpack.c.bf16 %v2269_v8, %v2268_v4 }
 0x4ce   : > { %4878 = vrcp.f32 %v2241_v11 }
 0x4cf   : > { %v2278_v7 = vpack.c.bf16 %v2267_v61, %v2266_v52  ;;  %4880 = vrcp.f32 %v2235_v60 }
 0x4d0   : > { %4882 = vrcp.f32 %v2239_v32 }
 0x4d1   : > { %4271 = vmatprep.mubr.bf16.mxu1 %v2278_v7  ;;  %v2892_v40 = vpop.permute.xlu0 %2891 }
 0x4d2   : > { %v2935_v53 = vsel %vm1474_vm0, %v2892_v40, 0  ;;  %4272 = vmatmul.mubr.bf16.gmra.mrb[76].mxu1 %v2279_v21  ;;  %4534 = vmatprep.subr.msk.bf16.mxu0 %vm1474_vm0, %v2892_v40 }
 0x4d3   : > { %4350 = vmatpush3.bf16.xpose.msra.mxu0 %v2935_v53 }
 0x4d5   : > { %v2406_v62 = vpop.permute.xlu0 %2405 }
 0x4d8   : > { %v4879_v3 = vpop.eup %4878 }
 0x4d9   : > { %v2408_v22 = vpop.permute.xlu0 %2407  ;;  %v4881_v37 = vpop.eup %4880  ;;  %v2273_v5 = vmul.f32 %v4879_v3, %v6435_v41 }
 0x4da   : > { %v4883_v17 = vpop.eup %4882  ;;  %v2270_v6 = vmul.f32 %v4881_v37, %v6425_v38 }
 0x4db   : > { %v2272_v26 = vmul.f32 %v4883_v17, %v6419_v24 }
 0x4dc   : > { %v2237_v54 = vpop.xlane.xlu1 %2236 }
 0x4dd   : > { %4884 = vrcp.f32 %v2237_v54  ;;  %v2896_v56 = vpop.permute.xlu0 %2895  ;;  %v2281_v44 = vpack.c.bf16 %v2273_v5, %v2272_v26 }
 0x4de   : > { %v2941_v28 = vsel %vm1474_vm0, %v2896_v56, 0 }
 0x4e0   : > { %v2404_v39 = vpop.permute.xlu1 %2403 }
 0x4e1   : > { %v2414_v20 = vpop.permute.xlu0 %2413 }
 0x4e4   : > { %v2894_v19 = vpop.permute.xlu1 %2893 }
 0x4e5   : > { %v2938_v42 = vsel %vm1474_vm0, %v2894_v19, 0  ;;  %4535 = vmatprep.subr.msk.bf16.mxu0 %vm1474_vm0, %v2894_v19  ;;  %v2416_v41 = vpop.permute.xlu0 %2415 }
 0x4e6   : > { %4352 = vmatpush3.bf16.xpose.msra.mxu0 %v2938_v42 }
 0x4e7   : > { %v4885_v57 = vpop.eup %4884  ;;  %4536 = vmatprep.subr.msk.bf16.mxu0 %vm1474_vm0, %v2896_v56 }
 0x4e8   : > { %v2410_v49 = vpop.permute.xlu1 %2409  ;;  %v2271_v34 = vmul.f32 %v4885_v57, %v6451_v45 }
 0x4e9   : > { %v2900_v45 = vpop.permute.xlu0 %2899 }
 0x4ea   : > { %v2280_v55 = vpack.c.bf16 %v2271_v34, %v2270_v6  ;;  %v2947_v13 = vsel %vm1474_vm0, %v2900_v45, 0 }
 0x4ec   : > { %v2412_v14 = vpop.permute.xlu1 %2411  ;;  %4275 = vmatprep.mubr.bf16.mxu1 %v2280_v55 }
 0x4ed   : > { %4276 = vmatmul.mubr.bf16.gmra.mrb[80].mxu1 %v2281_v44  ;;  %v2872_v31 = vpop.permute.xlu0 %2871 }
 0x4ee   : > { %4295 = vmatprep.mubr.msk.bf16.mxu1 %vm1474_vm0, %v2404_v39  ;;  %4354 = vmatpush3.bf16.xpose.msra.mxu0 %v2941_v28 }
 0x4f0   : > { %v2898_v43 = vpop.permute.xlu1 %2897 }
 0x4f1   : > { %4537 = vmatprep.subr.msk.bf16.mxu0 %vm1474_vm0, %v2898_v43  ;;  %v2944_v24 = vsel %vm1474_vm0, %v2898_v43, 0  ;;  %v2876_v59 = vpop.permute.xlu0 %2875 }
 0x4f4   : > { %v2418_v38 = vpop.permute.xlu1 %2417 }
 0x4f5   : > { %4296 = vmatmul.mubr.msk.bf16.vlgmr.msra.gmra.mrb[84].mxu1 %vm1474_vm0, %v2406_v62  ;;  %v2880_v35 = vpop.permute.xlu0 %2879 }
 0x4f6   : > { %4312 = vmatpush3.bf16.msra.mxu1 %v7221_v0  ;;  %4299 = vmatprep.mubr.msk.bf16.mxu1 %vm1474_vm0, %v2408_v22  ;;  %v7228_v0 = vld [vmem:[#allocation49_spill] sm:$0xff] }
 0x4f7   : > { %4313 = vmatprep.subr.bf16.mxu1 %v7222_v46  ;;  %4356 = vmatpush3.bf16.xpose.msra.mxu0 %v2944_v24 }
 0x4f8   : > { %4538 = vmatprep.subr.msk.bf16.mxu0 %vm1474_vm0, %v2900_v45  ;;  %v2870_v9 = vpop.permute.xlu1 %2869 }
 0x4f9   : > { %4359 = vmatprep.mubr.msk.bf16.mxu0 %vm1474_vm0, %v2870_v9  ;;  %v2884_v48 = vpop.permute.xlu0 %2883 }
 0x4fa   : > { %4314 = vmatpush3.bf16.msra.mxu1 %v7222_v46 }
 0x4fb   : > { %4315 = vmatprep.subr.bf16.mxu1 %v7223_v33 }
 0x4fc   : > { %v2874_v25 = vpop.permute.xlu1 %2873 }
 0x4fd   : > { %4300 = vmatmul.mubr.msk.bf16.gmra.mrb[88].mxu1 %vm1474_vm0, %v2410_v49 }
 0x4fe   : > { %4316 = vmatpush3.bf16.msra.mxu1 %v7223_v33  ;;  %4303 = vmatprep.mubr.msk.bf16.mxu1 %vm1474_vm0, %v2412_v14 }
 0x4ff   : > { %4317 = vmatprep.subr.bf16.mxu1 %v7224_v58  ;;  %4358 = vmatpush3.bf16.xpose.msra.mxu0 %v2947_v13 }
 0x500   : > { %v2878_v23 = vpop.permute.xlu1 %2877 }
 0x502   : > { %4318 = vmatpush3.bf16.msra.mxu1 %v7224_v58 }
 0x503   : > { %4319 = vmatprep.subr.bf16.mxu1 %v7225_v36 }
 0x504   : > { %v2882_v50 = vpop.permute.xlu1 %2881 }
 0x505   : > { %4304 = vmatmul.mubr.msk.bf16.gmra.mrb[92].mxu1 %vm1474_vm0, %v2414_v20 }
 0x506   : > { %4320 = vmatpush3.bf16.msra.mxu1 %v7225_v36  ;;  %4360 = vmatmul.mubr.msk.bf16.vlgmr.msra.gmra.mrb[80].mxu0 %vm1474_vm0, %v2872_v31 }
 0x507   : > { %4307 = vmatprep.mubr.msk.bf16.mxu1 %vm1474_vm0, %v2416_v41  ;;  %4321 = vmatprep.subr.bf16.mxu1 %v7226_v16 }
 0x508   : > { %4363 = vmatprep.mubr.msk.bf16.mxu0 %vm1474_vm0, %v2874_v25 }
 0x50a   : > { %4322 = vmatpush3.bf16.msra.mxu1 %v7226_v16 }
 0x50b   : > { %4323 = vmatprep.subr.bf16.mxu1 %v7227_v12 }
 0x50d   : > { %4308 = vmatmul.mubr.msk.bf16.gmra.mrb[96].mxu1 %vm1474_vm0, %v2418_v38 }
 0x50e   : > { %4324 = vmatpush3.bf16.msra.mxu1 %v7227_v12  ;;  %4364 = vmatmul.mubr.msk.bf16.gmra.mrb[84].mxu0 %vm1474_vm0, %v2876_v59 }
 0x50f   : > { %4325 = vmatprep.subr.bf16.mxu1 %v7228_v0  ;;  %4367 = vmatprep.mubr.msk.bf16.mxu0 %vm1474_vm0, %v2878_v23 }
 0x512   : > { %4326 = vmatpush3.bf16.msra.mxu1 %v7228_v0 }
 0x513   : > { %4375 = vmatprep.subr.bf16.mxu1 %v7229_v30 }
 0x516   : > { %4368 = vmatmul.mubr.msk.bf16.gmra.mrb[88].mxu0 %vm1474_vm0, %v2880_v35 }
 0x517   : > { %4371 = vmatprep.mubr.msk.bf16.mxu0 %vm1474_vm0, %v2882_v50 }
 0x51e   : > { %4372 = vmatmul.mubr.msk.bf16.gmra.mrb[92].mxu0 %vm1474_vm0, %v2884_v48 }
 0x51f   : > { %3483 = vmatprep.mubr.bf16.mxu0 %v7230_v10 }
 0x5c8   : > { %v4297_v18 = vpop.f32.mrb[84].mxu1 }
 0x5c9   : > { %v2517_v2 = vpop.f32.mrb[85].mxu1  ;;  %v6615_v51 = vsel %vm5959_vm2, -1e+30, %v4297_v18 }
 0x5ca   : > { %v6600_v47 = vsel %vm5959_vm2, -1e+30, %v2517_v2  ;;  %v4298_v32 = vpop.f32.mrb[86].mxu1 }
 0x5cb   : > { %2596 = vmax.xlane.f32.xlu1 %v6600_v47  ;;  %v2520_v63 = vpop.f32.mrb[87].mxu1  ;;  %v6610_v1 = vsel %vm5959_vm2, -1e+30, %v4298_v32 }
 0x5cc   : > { %v6605_v60 = vsel %vm5959_vm2, -1e+30, %v2520_v63 }
 0x5cd   : > { %2598 = vmax.xlane.f32.xlu0 %v6605_v60 }
 0x5cf   : > { %2602 = vmax.xlane.f32.xlu1 %v6610_v1 }
 0x5d0   : > { %v4301_v27 = vpop.f32.mrb[88].mxu1 }
 0x5d1   : > { %2600 = vmax.xlane.f32.xlu0 %v6615_v51  ;;  %v2533_v8 = vpop.f32.mrb[89].mxu1  ;;  %v6630_v7 = vsel %vm5959_vm2, -1e+30, %v4301_v27 }
 0x5d2   : > { %v4302_v11 = vpop.f32.mrb[90].mxu1  ;;  %v6620_v61 = vsel %vm5959_vm2, -1e+30, %v2533_v8 }
 0x5d3   : > { %v2536_v52 = vpop.f32.mrb[91].mxu1  ;;  %v6634_v21 = vsel %vm5959_vm2, -1e+30, %v4302_v11 }
 0x5d4   : > { %v6624_v4 = vsel %vm5959_vm2, -1e+30, %v2536_v52 }
 0x5d5   : > { %2604 = vmax.xlane.f32.xlu0 %v6620_v61  ;;  %2606 = vmax.xlane.f32.xlu1 %v6624_v4 }
 0x5d8   : > { %v4305_v40 = vpop.f32.mrb[92].mxu1 }
 0x5d9   : > { %v4361_v53 = vpop.f32.mrb[80].mxu0  ;;  %2608 = vmax.xlane.f32.xlu0 %v6630_v7  ;;  %2610 = vmax.xlane.f32.xlu1 %v6634_v21  ;;  %v2549_v62 = vpop.f32.mrb[93].mxu1  ;;  %v6650_v42 = vsel %vm5959_vm2, -1e+30, %v4305_v40 }
 0x5da   : > { %v2983_v54 = vpop.f32.mrb[81].mxu0  ;;  %v4306_v22 = vpop.f32.mrb[94].mxu1  ;;  %v6640_v19 = vsel %vm5959_vm2, -1e+30, %v2549_v62  ;;  %v6690_v33 = vsel %vm5959_vm2, -1e+30, %v4361_v53 }
 0x5db   : > { %v4362_v39 = vpop.f32.mrb[82].mxu0  ;;  %v2552_v3 = vpop.f32.mrb[95].mxu1  ;;  %v6654_v17 = vsel %vm5959_vm2, -1e+30, %v4306_v22  ;;  %v6680_v45 = vsel %vm5959_vm2, -1e+30, %v2983_v54 }
 0x5dc   : > { %v6644_v37 = vsel %vm5959_vm2, -1e+30, %v2552_v3  ;;  %v2986_v56 = vpop.f32.mrb[83].mxu0  ;;  %v6694_v13 = vsel %vm5959_vm2, -1e+30, %v4362_v39 }
 0x5dd   : > { %2612 = vmax.xlane.f32.xlu0 %v6640_v19  ;;  %2614 = vmax.xlane.f32.xlu1 %v6644_v37  ;;  %v6684_v46 = vsel %vm5959_vm2, -1e+30, %v2986_v56 }
 0x5e0   : > { %v4309_v57 = vpop.f32.mrb[96].mxu1 }
 0x5e1   : > { %v4365_v5 = vpop.f32.mrb[84].mxu0  ;;  %2616 = vmax.xlane.f32.xlu0 %v6650_v42  ;;  %2618 = vmax.xlane.f32.xlu1 %v6654_v17  ;;  %v2565_v49 = vpop.f32.mrb[97].mxu1  ;;  %v6670_v28 = vsel %vm5959_vm2, -1e+30, %v4309_v57 }
 0x5e2   : > { %v2999_v6 = vpop.f32.mrb[85].mxu0  ;;  %v4310_v34 = vpop.f32.mrb[98].mxu1  ;;  %v6660_v20 = vsel %vm5959_vm2, -1e+30, %v2565_v49  ;;  %v6710_v59 = vsel %vm5959_vm2, -1e+30, %v4365_v5 }
 0x5e3   : > { %v4366_v26 = vpop.f32.mrb[86].mxu0  ;;  %v2568_v55 = vpop.f32.mrb[99].mxu1  ;;  %v6674_v43 = vsel %vm5959_vm2, -1e+30, %v4310_v34  ;;  %v6700_v25 = vsel %vm5959_vm2, -1e+30, %v2999_v6 }
 0x5e4   : > { %v6664_v44 = vsel %vm5959_vm2, -1e+30, %v2568_v55  ;;  %v3002_v14 = vpop.f32.mrb[87].mxu0  ;;  %v6714_v23 = vsel %vm5959_vm2, -1e+30, %v4366_v26 }
 0x5e5   : > { %2620 = vmax.xlane.f32.xlu0 %v6660_v20  ;;  %2622 = vmax.xlane.f32.xlu1 %v6664_v44  ;;  %v6704_v16 = vsel %vm5959_vm2, -1e+30, %v3002_v14 }
 0x5e9   : > { %v4369_v41 = vpop.f32.mrb[88].mxu0  ;;  %2624 = vmax.xlane.f32.xlu0 %v6670_v28  ;;  %2626 = vmax.xlane.f32.xlu1 %v6674_v43 }
 0x5ea   : > { %v3015_v38 = vpop.f32.mrb[89].mxu0  ;;  %v6730_v50 = vsel %vm5959_vm2, -1e+30, %v4369_v41 }
 0x5eb   : > { %v4370_v24 = vpop.f32.mrb[90].mxu0  ;;  %v6720_v0 = vsel %vm5959_vm2, -1e+30, %v3015_v38 }
 0x5ec   : > { %v3018_v9 = vpop.f32.mrb[91].mxu0  ;;  %v6734_v48 = vsel %vm5959_vm2, -1e+30, %v4370_v24 }
 0x5ed   : > { %3062 = vmax.xlane.f32.xlu0 %v6680_v45  ;;  %3064 = vmax.xlane.f32.xlu1 %v6684_v46  ;;  %v6724_v35 = vsel %vm5959_vm2, -1e+30, %v3018_v9 }
 0x5f1   : > { %v4373_v58 = vpop.f32.mrb[92].mxu0  ;;  %3066 = vmax.xlane.f32.xlu0 %v6690_v33  ;;  %3068 = vmax.xlane.f32.xlu1 %v6694_v13 }
 0x5f2   : > { %v3031_v36 = vpop.f32.mrb[93].mxu0  ;;  %v6750_v32 = vsel %vm5959_vm2, -1e+30, %v4373_v58 }
 0x5f3   : > { %v4374_v31 = vpop.f32.mrb[94].mxu0  ;;  %v6740_v18 = vsel %vm5959_vm2, -1e+30, %v3031_v36 }
 0x5f4   : > { %v3034_v12 = vpop.f32.mrb[95].mxu0  ;;  %v6754_v63 = vsel %vm5959_vm2, -1e+30, %v4374_v31 }
 0x5f5   : > { %3070 = vmax.xlane.f32.xlu0 %v6700_v25  ;;  %3072 = vmax.xlane.f32.xlu1 %v6704_v16  ;;  %v6744_v2 = vsel %vm5959_vm2, -1e+30, %v3034_v12 }
 0x5f9   : > { %3074 = vmax.xlane.f32.xlu0 %v6710_v59  ;;  %3076 = vmax.xlane.f32.xlu1 %v6714_v23 }
 0x5fd   : > { %3078 = vmax.xlane.f32.xlu0 %v6720_v0  ;;  %3080 = vmax.xlane.f32.xlu1 %v6724_v35 }
 0x601   : > { %3082 = vmax.xlane.f32.xlu0 %v6730_v50  ;;  %3084 = vmax.xlane.f32.xlu1 %v6734_v48 }
 0x605   : > { %3086 = vmax.xlane.f32.xlu0 %v6740_v18  ;;  %3088 = vmax.xlane.f32.xlu1 %v6744_v2 }
 0x609   : > { %3090 = vmax.xlane.f32.xlu0 %v6750_v32  ;;  %3092 = vmax.xlane.f32.xlu1 %v6754_v63 }
 0x658   : > { %v2597_v27 = vpop.xlane.xlu1 %2596 }
 0x659   : > { %v2628_v8 = vsub.f32 %v6600_v47, %v2597_v27 }
 0x65a   : > { %v2599_v11 = vpop.xlane.xlu0 %2598 }
 0x65b   : > { %v2644_v52 = vmul.f32 1.442695, %v2628_v8  ;;  %v2629_v40 = vsub.f32 %v6605_v60, %v2599_v11 }
 0x65c   : > { %v2603_v53 = vpop.xlane.xlu1 %2602 }
 0x65d   : > { %4886 = vpow2.f32 %v2644_v52  ;;  %v2646_v62 = vmul.f32 1.442695, %v2629_v40  ;;  %v2631_v54 = vsub.f32 %v6610_v1, %v2603_v53 }
 0x65e   : > { %v2601_v22 = vpop.xlane.xlu0 %2600 }
 0x65f   : > { %4888 = vpow2.f32 %v2646_v62  ;;  %v2650_v39 = vmul.f32 1.442695, %v2631_v54  ;;  %v2630_v3 = vsub.f32 %v6615_v51, %v2601_v22 }
 0x661   : > { %v2648_v56 = vmul.f32 1.442695, %v2630_v3  ;;  %4890 = vpow2.f32 %v2650_v39 }
 0x662   : > { %v2607_v57 = vpop.xlane.xlu1 %2606  ;;  %v2605_v5 = vpop.xlane.xlu0 %2604 }
 0x663   : > { %4892 = vpow2.f32 %v2648_v56  ;;  %v2633_v47 = vsub.f32 %v6624_v4, %v2607_v57  ;;  %v2632_v49 = vsub.f32 %v6620_v61, %v2605_v5 }
 0x665   : > { %v2654_v60 = vmul.f32 1.442695, %v2633_v47  ;;  %v2652_v6 = vmul.f32 1.442695, %v2632_v49 }
 0x666   : > { %v2611_v34 = vpop.xlane.xlu1 %2610  ;;  %v2609_v26 = vpop.xlane.xlu0 %2608 }
 0x667   : > { %v6764_v55 = vpop.eup %4886  ;;  %4894 = vpow2.f32 %v2654_v60  ;;  %v2635_v1 = vsub.f32 %v6634_v21, %v2611_v34  ;;  %v2634_v51 = vsub.f32 %v6630_v7, %v2609_v26 }
 0x668   : > { %4896 = vpow2.f32 %v2652_v6  ;;  %2676 = vadd.xlane.f32.xlu0 %v6764_v55 }
 0x669   : > { %v6769_v14 = vpop.eup %4888  ;;  %v2658_v41 = vmul.f32 1.442695, %v2635_v1  ;;  %v2656_v4 = vmul.f32 1.442695, %v2634_v51 }
 0x66a   : > { %v2615_v38 = vpop.xlane.xlu1 %2614  ;;  %2678 = vadd.xlane.f32.xlu1 %v6769_v14  ;;  %v2613_v61 = vpop.xlane.xlu0 %2612 }
 0x66b   : > { %4898 = vpow2.f32 %v2658_v41  ;;  %v2637_v24 = vsub.f32 %v6644_v37, %v2615_v38  ;;  %v2636_v9 = vsub.f32 %v6640_v19, %v2613_v61  ;;  %v6774_v58 = vpop.eup %4890 }
 0x66c   : > { %4900 = vpow2.f32 %v2656_v4 }
 0x66d   : > { %v6776_v7 = vpop.eup %4892  ;;  %v2662_v21 = vmul.f32 1.442695, %v2637_v24  ;;  %v2660_v36 = vmul.f32 1.442695, %v2636_v9 }
 0x66e   : > { %v2619_v31 = vpop.xlane.xlu1 %2618  ;;  %2682 = vadd.xlane.f32.xlu1 %v6774_v58  ;;  %2680 = vadd.xlane.f32.xlu0 %v6776_v7  ;;  %v2617_v12 = vpop.xlane.xlu0 %2616 }
 0x66f   : > { %4902 = vpow2.f32 %v2662_v21  ;;  %v2639_v27 = vsub.f32 %v6654_v17, %v2619_v31  ;;  %v2638_v37 = vsub.f32 %v6650_v42, %v2617_v12 }
 0x670   : > { %4904 = vpow2.f32 %v2660_v36 }
 0x671   : > { %v6782_v19 = vpop.eup %4894  ;;  %v2666_v8 = vmul.f32 1.442695, %v2639_v27  ;;  %v2664_v11 = vmul.f32 1.442695, %v2638_v37 }
 0x672   : > { %v6784_v52 = vpop.eup %4896  ;;  %v2623_v40 = vpop.xlane.xlu1 %2622  ;;  %2686 = vadd.xlane.f32.xlu1 %v6782_v19 }
 0x673   : > { %v2621_v53 = vpop.xlane.xlu0 %2620  ;;  %4906 = vpow2.f32 %v2666_v8  ;;  %v2641_v62 = vsub.f32 %v6664_v44, %v2623_v40  ;;  %2684 = vadd.xlane.f32.xlu0 %v6784_v52 }
 0x674   : > { %v2640_v17 = vsub.f32 %v6660_v20, %v2621_v53  ;;  %4908 = vpow2.f32 %v2664_v11 }
 0x675   : > { %v6790_v42 = vpop.eup %4898  ;;  %v2670_v54 = vmul.f32 1.442695, %v2641_v62 }
 0x676   : > { %v2668_v22 = vmul.f32 1.442695, %v2640_v17  ;;  %v6792_v39 = vpop.eup %4900  ;;  %v2627_v3 = vpop.xlane.xlu1 %2626  ;;  %2690 = vadd.xlane.f32.xlu1 %v6790_v42 }
 0x677   : > { %v2625_v56 = vpop.xlane.xlu0 %2624  ;;  %4910 = vpow2.f32 %v2670_v54  ;;  %v2643_v57 = vsub.f32 %v6674_v43, %v2627_v3  ;;  %2688 = vadd.xlane.f32.xlu0 %v6792_v39 }
 0x678   : > { %v2642_v44 = vsub.f32 %v6670_v28, %v2625_v56  ;;  %4912 = vpow2.f32 %v2668_v22 }
 0x679   : > { %v6798_v20 = vpop.eup %4902  ;;  %v2674_v5 = vmul.f32 1.442695, %v2643_v57 }
 0x67a   : > { %v2672_v47 = vmul.f32 1.442695, %v2642_v44  ;;  %v6800_v49 = vpop.eup %4904  ;;  %v3065_v60 = vpop.xlane.xlu1 %3064  ;;  %2694 = vadd.xlane.f32.xlu1 %v6798_v20 }
 0x67b   : > { %v3063_v6 = vpop.xlane.xlu0 %3062  ;;  %4914 = vpow2.f32 %v2674_v5  ;;  %v3095_v34 = vsub.f32 %v6684_v46, %v3065_v60  ;;  %2692 = vadd.xlane.f32.xlu0 %v6800_v49 }
 0x67c   : > { %v3094_v43 = vsub.f32 %v6680_v45, %v3063_v6  ;;  %4916 = vpow2.f32 %v2672_v47 }
 0x67d   : > { %v6806_v28 = vpop.eup %4906  ;;  %v3112_v26 = vmul.f32 1.442695, %v3095_v34 }
 0x67e   : > { %v3110_v1 = vmul.f32 1.442695, %v3094_v43  ;;  %v6808_v51 = vpop.eup %4908  ;;  %v3069_v41 = vpop.xlane.xlu1 %3068  ;;  %2698 = vadd.xlane.f32.xlu1 %v6806_v28 }
 0x67f   : > { %v3067_v4 = vpop.xlane.xlu0 %3066  ;;  %4918 = vpow2.f32 %v3112_v26  ;;  %v3097_v38 = vsub.f32 %v6694_v13, %v3069_v41  ;;  %2696 = vadd.xlane.f32.xlu0 %v6808_v51 }
 0x680   : > { %v3096_v46 = vsub.f32 %v6690_v33, %v3067_v4  ;;  %4920 = vpow2.f32 %v3110_v1 }
 0x681   : > { %v6814_v45 = vpop.eup %4910  ;;  %v3116_v61 = vmul.f32 1.442695, %v3097_v38 }
 0x682   : > { %v3114_v24 = vmul.f32 1.442695, %v3096_v46  ;;  %v6816_v9 = vpop.eup %4912  ;;  %v3073_v21 = vpop.xlane.xlu1 %3072  ;;  %2702 = vadd.xlane.f32.xlu1 %v6814_v45 }
 0x683   : > { %v3071_v36 = vpop.xlane.xlu0 %3070  ;;  %4922 = vpow2.f32 %v3116_v61  ;;  %v3099_v31 = vsub.f32 %v6704_v16, %v3073_v21  ;;  %2700 = vadd.xlane.f32.xlu0 %v6816_v9 }
 0x684   : > { %v3098_v13 = vsub.f32 %v6700_v25, %v3071_v36  ;;  %4924 = vpow2.f32 %v3114_v24 }
 0x685   : > { %v6822_v33 = vpop.eup %4914  ;;  %v3120_v12 = vmul.f32 1.442695, %v3099_v31 }
 0x686   : > { %v3118_v27 = vmul.f32 1.442695, %v3098_v13  ;;  %v6824_v37 = vpop.eup %4916  ;;  %v3077_v8 = vpop.xlane.xlu1 %3076  ;;  %2706 = vadd.xlane.f32.xlu1 %v6822_v33 }
 0x687   : > { %v3075_v11 = vpop.xlane.xlu0 %3074  ;;  %4926 = vpow2.f32 %v3120_v12  ;;  %v3101_v40 = vsub.f32 %v6714_v23, %v3077_v8  ;;  %2704 = vadd.xlane.f32.xlu0 %v6824_v37 }
 0x688   : > { %v3100_v16 = vsub.f32 %v6710_v59, %v3075_v11  ;;  %4928 = vpow2.f32 %v3118_v27 }
 0x689   : > { %v6830_v25 = vpop.eup %4918  ;;  %v3124_v53 = vmul.f32 1.442695, %v3101_v40  ;;  %v4734_v40 = vld [vmem:[#allocation8] ss:$8 sps:$4 sm:$0xff]  }
 0x68a   : > { %v3122_v62 = vmul.f32 1.442695, %v3100_v16  ;;  %v6832_v17 = vpop.eup %4920  ;;  %v3081_v54 = vpop.xlane.xlu1 %3080  ;;  %3144 = vadd.xlane.f32.xlu1 %v6830_v25  ;;  %v4736_v16 = vld [vmem:[#allocation8 + $0x4] ss:$8 sps:$4 sm:$0xff]  }
 0x68b   : > { %v3079_v22 = vpop.xlane.xlu0 %3078  ;;  %4930 = vpow2.f32 %v3124_v53  ;;  %v3103_v3 = vsub.f32 %v6724_v35, %v3081_v54  ;;  %3142 = vadd.xlane.f32.xlu0 %v6832_v17  ;;  %v4739_v53 = vld [vmem:[#allocation8 + $0x14] ss:$8 sps:$4 sm:$0xff]   ;;  %3451 = vmatprep.subr.bf16.mxu0 %v4736_v16  ;;  %v4742_v54 = vld [vmem:[#allocation8 + $0x24] ss:$8 sps:$4 sm:$0xff]  }
 0x68c   : > { %v3102_v23 = vsub.f32 %v6720_v0, %v3079_v22  ;;  %4932 = vpow2.f32 %v3122_v62  ;;  %3452 = vmatpush1.bf16.msra.mxu0 %v4734_v40  ;;  %v4737_v62 = vld [vmem:[#allocation8 + $0x10] ss:$8 sps:$4 sm:$0xff]   ;;  %v4740_v22 = vld [vmem:[#allocation8 + $0x20] ss:$8 sps:$4 sm:$0xff]  }
 0x68d   : > { %v6838_v59 = vpop.eup %4922  ;;  %v3128_v56 = vmul.f32 1.442695, %v3103_v3  ;;  %3453 = vmatprep.subr.bf16.mxu0 %v4739_v53  ;;  %v4745_v3 = vld [vmem:[#allocation8 + $0x34] ss:$8 sps:$4 sm:$0xff]  }
 0x68e   : > { %v3126_v57 = vmul.f32 1.442695, %v3102_v23  ;;  %v6840_v44 = vpop.eup %4924  ;;  %v3085_v5 = vpop.xlane.xlu1 %3084  ;;  %3148 = vadd.xlane.f32.xlu1 %v6838_v59  ;;  %v4743_v23 = vld [vmem:[#allocation8 + $0x30] ss:$8 sps:$4 sm:$0xff]  }
 0x68f   : > { %v3083_v47 = vpop.xlane.xlu0 %3082  ;;  %4934 = vpow2.f32 %v3128_v56  ;;  %v3105_v60 = vsub.f32 %v6734_v48, %v3085_v5  ;;  %3146 = vadd.xlane.f32.xlu0 %v6840_v44  ;;  %v4748_v56 = vld [vmem:[#allocation8 + $0x44] ss:$8 sps:$4 sm:$0xff]   ;;  %v4751_v5 = vld [vmem:[#allocation8 + $0x54] ss:$8 sps:$4 sm:$0xff]  }
 0x690   : > { %v3104_v35 = vsub.f32 %v6730_v50, %v3083_v47  ;;  %4936 = vpow2.f32 %v3126_v57  ;;  %3454 = vmatpush1.bf16.msra.mxu0 %v4737_v62  ;;  %v4746_v57 = vld [vmem:[#allocation8 + $0x40] ss:$8 sps:$4 sm:$0xff]   ;;  %v4749_v47 = vld [vmem:[#allocation8 + $0x50] ss:$8 sps:$4 sm:$0xff]  }
 0x691   : > { %v6846_v0 = vpop.eup %4926  ;;  %v3132_v6 = vmul.f32 1.442695, %v3105_v60  ;;  %3455 = vmatprep.subr.bf16.mxu0 %v4742_v54 }
 0x692   : > { %v3130_v34 = vmul.f32 1.442695, %v3104_v35  ;;  %v6848_v43 = vpop.eup %4928  ;;  %v3089_v26 = vpop.xlane.xlu1 %3088  ;;  %3152 = vadd.xlane.f32.xlu1 %v6846_v0 }
 0x693   : > { %v3087_v1 = vpop.xlane.xlu0 %3086  ;;  %4938 = vpow2.f32 %v3132_v6  ;;  %v3107_v41 = vsub.f32 %v6744_v2, %v3089_v26  ;;  %3150 = vadd.xlane.f32.xlu0 %v6848_v43 }
 0x694   : > { %v3106_v48 = vsub.f32 %v6740_v18, %v3087_v1  ;;  %4940 = vpow2.f32 %v3130_v34  ;;  %3456 = vmatpush1.bf16.msra.mxu0 %v4740_v22 }
 0x695   : > { %v6854_v50 = vpop.eup %4930  ;;  %v3136_v4 = vmul.f32 1.442695, %v3107_v41  ;;  %3457 = vmatprep.subr.bf16.mxu0 %v4745_v3 }
 0x696   : > { %v3134_v38 = vmul.f32 1.442695, %v3106_v48  ;;  %v6856_v46 = vpop.eup %4932  ;;  %v3093_v61 = vpop.xlane.xlu1 %3092  ;;  %3156 = vadd.xlane.f32.xlu1 %v6854_v50 }
 0x697   : > { %v3091_v24 = vpop.xlane.xlu0 %3090  ;;  %4942 = vpow2.f32 %v3136_v4  ;;  %v3109_v21 = vsub.f32 %v6754_v63, %v3093_v61  ;;  %3154 = vadd.xlane.f32.xlu0 %v6856_v46 }
 0x698   : > { %v3108_v2 = vsub.f32 %v6750_v32, %v3091_v24  ;;  %4944 = vpow2.f32 %v3134_v38  ;;  %3458 = vmatpush1.bf16.msra.mxu0 %v4743_v23 }
 0x699   : > { %v6862_v18 = vpop.eup %4934  ;;  %v3140_v36 = vmul.f32 1.442695, %v3109_v21  ;;  %3459 = vmatprep.subr.bf16.mxu0 %v4748_v56  ;;  %v7232_v56 = vld [vmem:[#allocation38_spill] sm:$0xff] }
 0x69a   : > { %v3138_v31 = vmul.f32 1.442695, %v3108_v2  ;;  %v6864_v13 = vpop.eup %4936  ;;  %3160 = vadd.xlane.f32.xlu1 %v6862_v18 }
 0x69b   : > { %4946 = vpow2.f32 %v3140_v36  ;;  %3158 = vadd.xlane.f32.xlu0 %v6864_v13 }
 0x69c   : > { %4948 = vpow2.f32 %v3138_v31  ;;  %3460 = vmatpush1.bf16.msra.mxu0 %v4746_v57 }
 0x69d   : > { %v6868_v12 = vpop.eup %4938  ;;  %3461 = vmatprep.subr.bf16.mxu0 %v4751_v5 }
 0x69e   : > { %v6870_v63 = vpop.eup %4940  ;;  %3164 = vadd.xlane.f32.xlu1 %v6868_v12 }
 0x69f   : > { %3162 = vadd.xlane.f32.xlu0 %v6870_v63 }
 0x6a0   : > { %3462 = vmatpush1.bf16.msra.mxu0 %v4749_v47 }
 0x6a1   : > { %v6874_v32 = vpop.eup %4942 }
 0x6a2   : > { %v6876_v27 = vpop.eup %4944  ;;  %3168 = vadd.xlane.f32.xlu1 %v6874_v32 }
 0x6a3   : > { %3166 = vadd.xlane.f32.xlu0 %v6876_v27 }
 0x6a5   : > { %v6880_v8 = vpop.eup %4946 }
 0x6a6   : > { %v6882_v11 = vpop.eup %4948  ;;  %3172 = vadd.xlane.f32.xlu1 %v6880_v8 }
 0x6a7   : > { %3170 = vadd.xlane.f32.xlu0 %v6882_v11 }
 0x6f5   : > { %v2677_v60 = vpop.xlane.xlu0 %2676 }
 0x6f6   : > { %4950 = vrcp.f32 %v2677_v60 }
 0x6f7   : > { %v2679_v35 = vpop.xlane.xlu1 %2678 }
 0x6f8   : > { %4952 = vrcp.f32 %v2679_v35  ;;  %v7233_v35 = vld [vmem:[#allocation40_spill] sm:$0xff] }
 0x6fb   : > { %v2683_v6 = vpop.xlane.xlu1 %2682  ;;  %v2681_v34 = vpop.xlane.xlu0 %2680 }
 0x6fc   : > { %4954 = vrcp.f32 %v2683_v6 }
 0x6fd   : > { %4956 = vrcp.f32 %v2681_v34 }
 0x6ff   : > { %v2687_v26 = vpop.xlane.xlu1 %2686 }
 0x700   : > { %v4951_v1 = vpop.eup %4950  ;;  %4958 = vrcp.f32 %v2687_v26  ;;  %v2685_v41 = vpop.xlane.xlu0 %2684 }
 0x701   : > { %4960 = vrcp.f32 %v2685_v41  ;;  %v2724_v38 = vmul.f32 %v4951_v1, %v6764_v55  ;;  %v7234_v41 = vld [vmem:[#allocation42_spill] sm:$0xff] }
 0x702   : > { %v4953_v48 = vpop.eup %4952 }
 0x703   : > { %v2691_v4 = vpop.xlane.xlu1 %2690  ;;  %v2725_v61 = vmul.f32 %v4953_v48, %v6769_v14 }
 0x704   : > { %4962 = vrcp.f32 %v2691_v4  ;;  %v2689_v24 = vpop.xlane.xlu0 %2688 }
 0x705   : > { %4964 = vrcp.f32 %v2689_v24  ;;  %v2740_v21 = vpack.c.bf16 %v2725_v61, %v2724_v38 }
 0x706   : > { %v4955_v2 = vpop.eup %4954 }
 0x707   : > { %v4957_v36 = vpop.eup %4956  ;;  %v2727_v31 = vmul.f32 %v4955_v2, %v6774_v58  ;;  %v2695_v40 = vpop.xlane.xlu1 %2694  ;;  %4327 = vmatprep.mubr.bf16.mxu1 %v2740_v21  ;;  %v7235_v21 = vld [vmem:[#allocation44_spill] sm:$0xff] }
 0x708   : > { %v2726_v16 = vmul.f32 %v4957_v36, %v6776_v7  ;;  %4966 = vrcp.f32 %v2695_v40  ;;  %v2693_v53 = vpop.xlane.xlu0 %2692 }
 0x709   : > { %4968 = vrcp.f32 %v2693_v53  ;;  %v7236_v53 = vld [vmem:[#allocation46_spill] sm:$0xff] }
 0x70a   : > { %v4959_v62 = vpop.eup %4958  ;;  %v2741_v54 = vpack.c.bf16 %v2727_v31, %v2726_v16 }
 0x70b   : > { %v4961_v55 = vpop.eup %4960  ;;  %v2699_v22 = vpop.xlane.xlu1 %2698  ;;  %v2729_v14 = vmul.f32 %v4959_v62, %v6782_v19 }
 0x70c   : > { %4970 = vrcp.f32 %v2699_v22  ;;  %4328 = vmatmul.mubr.bf16.vlgmr.msra.gmra.mrb[68].mxu1 %v2741_v54  ;;  %v2697_v3 = vpop.xlane.xlu0 %2696  ;;  %v2728_v23 = vmul.f32 %v4961_v55, %v6784_v52 }
 0x70d   : > { %4376 = vmatpush3.bf16.msra.mxu1 %v7229_v30  ;;  %4972 = vrcp.f32 %v2697_v3  ;;  %v7237_v3 = vld [vmem:[#allocation48_spill] sm:$0xff] }
 0x70e   : > { %v4963_v58 = vpop.eup %4962  ;;  %4377 = vmatprep.subr.bf16.mxu1 %v7232_v56  ;;  %v2742_v7 = vpack.c.bf16 %v2729_v14, %v2728_v23 }
 0x70f   : > { %v4965_v57 = vpop.eup %4964  ;;  %v2703_v5 = vpop.xlane.xlu1 %2702  ;;  %v2731_v47 = vmul.f32 %v4963_v58, %v6790_v42 }
 0x710   : > { %4974 = vrcp.f32 %v2703_v5  ;;  %4331 = vmatprep.mubr.bf16.mxu1 %v2742_v7  ;;  %v2701_v60 = vpop.xlane.xlu0 %2700  ;;  %v2730_v19 = vmul.f32 %v4965_v57, %v6792_v39  ;;  %v7238_v5 = vld [vmem:[#allocation50_spill] sm:$0xff] }
 0x711   : > { %4378 = vmatpush3.bf16.msra.mxu1 %v7232_v56  ;;  %4976 = vrcp.f32 %v2701_v60 }
 0x712   : > { %v4967_v52 = vpop.eup %4966  ;;  %4379 = vmatprep.subr.bf16.mxu1 %v7233_v35  ;;  %v2743_v30 = vpack.c.bf16 %v2731_v47, %v2730_v19 }
 0x713   : > { %v4969_v6 = vpop.eup %4968  ;;  %v2707_v34 = vpop.xlane.xlu1 %2706  ;;  %v2733_v26 = vmul.f32 %v4967_v52, %v6798_v20 }
 0x714   : > { %4978 = vrcp.f32 %v2707_v34  ;;  %4332 = vmatmul.mubr.bf16.gmra.mrb[72].mxu1 %v2743_v30  ;;  %v2705_v1 = vpop.xlane.xlu0 %2704  ;;  %v2732_v42 = vmul.f32 %v4969_v6, %v6800_v49 }
 0x715   : > { %4380 = vmatpush3.bf16.msra.mxu1 %v7233_v35  ;;  %4980 = vrcp.f32 %v2705_v1 }
 0x716   : > { %v4971_v39 = vpop.eup %4970  ;;  %4381 = vmatprep.subr.bf16.mxu1 %v7234_v41  ;;  %v2744_v48 = vpack.c.bf16 %v2733_v26, %v2732_v42 }
 0x717   : > { %v4973_v4 = vpop.eup %4972  ;;  %v3145_v38 = vpop.xlane.xlu1 %3144  ;;  %v2735_v61 = vmul.f32 %v4971_v39, %v6806_v28 }
 0x718   : > { %4982 = vrcp.f32 %v3145_v38  ;;  %4335 = vmatprep.mubr.bf16.mxu1 %v2744_v48  ;;  %v3143_v24 = vpop.xlane.xlu0 %3142  ;;  %v2734_v20 = vmul.f32 %v4973_v4, %v6808_v51 }
 0x719   : > { %4382 = vmatpush3.bf16.msra.mxu1 %v7234_v41  ;;  %4984 = vrcp.f32 %v3143_v24 }
 0x71a   : > { %v4975_v49 = vpop.eup %4974  ;;  %4383 = vmatprep.subr.bf16.mxu1 %v7235_v21  ;;  %v2745_v2 = vpack.c.bf16 %v2735_v61, %v2734_v20 }
 0x71b   : > { %v4977_v36 = vpop.eup %4976  ;;  %v3149_v31 = vpop.xlane.xlu1 %3148  ;;  %v2737_v40 = vmul.f32 %v4975_v49, %v6814_v45 }
 0x71c   : > { %4986 = vrcp.f32 %v3149_v31  ;;  %4336 = vmatmul.mubr.bf16.gmra.mrb[76].mxu1 %v2745_v2  ;;  %v3147_v16 = vpop.xlane.xlu0 %3146  ;;  %v2736_v28 = vmul.f32 %v4977_v36, %v6816_v9 }
 0x71d   : > { %4384 = vmatpush3.bf16.msra.mxu1 %v7235_v21  ;;  %4988 = vrcp.f32 %v3147_v16 }
 0x71e   : > { %v4979_v51 = vpop.eup %4978  ;;  %4385 = vmatprep.subr.bf16.mxu1 %v7236_v53  ;;  %v2746_v62 = vpack.c.bf16 %v2737_v40, %v2736_v28 }
 0x71f   : > { %v4981_v54 = vpop.eup %4980  ;;  %v3153_v55 = vpop.xlane.xlu1 %3152  ;;  %v2739_v22 = vmul.f32 %v4979_v51, %v6822_v33 }
 0x720   : > { %4990 = vrcp.f32 %v3153_v55  ;;  %4339 = vmatprep.mubr.bf16.mxu1 %v2746_v62  ;;  %v3151_v14 = vpop.xlane.xlu0 %3150  ;;  %v2738_v45 = vmul.f32 %v4981_v54, %v6824_v37 }
 0x721   : > { %4386 = vmatpush3.bf16.msra.mxu1 %v7236_v53  ;;  %4992 = vrcp.f32 %v3151_v14  ;;  %v4757_v14 = vld [vmem:[#allocation8 + $0x74] ss:$8 sps:$4 sm:$0xff]  }
 0x722   : > { %v4983_v9 = vpop.eup %4982  ;;  %4387 = vmatprep.subr.bf16.mxu1 %v7237_v3  ;;  %v2747_v23 = vpack.c.bf16 %v2739_v22, %v2738_v45  ;;  %v4754_v22 = vld [vmem:[#allocation8 + $0x64] ss:$8 sps:$4 sm:$0xff]   ;;  %v4755_v45 = vld [vmem:[#allocation8 + $0x70] ss:$8 sps:$4 sm:$0xff]  }
 0x723   : > { %v4985_v58 = vpop.eup %4984  ;;  %v3157_v56 = vpop.xlane.xlu1 %3156  ;;  %v3191_v7 = vmul.f32 %v4983_v9, %v6830_v25  ;;  %3463 = vmatprep.subr.bf16.mxu0 %v4754_v22 }
 0x724   : > { %4994 = vrcp.f32 %v3157_v56  ;;  %4340 = vmatmul.mubr.bf16.gmra.mrb[80].mxu1 %v2747_v23  ;;  %v3155_v57 = vpop.xlane.xlu0 %3154  ;;  %v3190_v33 = vmul.f32 %v4985_v58, %v6832_v17 }
 0x725   : > { %4388 = vmatpush3.bf16.msra.mxu1 %v7237_v3  ;;  %4996 = vrcp.f32 %v3155_v57 }
 0x726   : > { %v4987_v37 = vpop.eup %4986  ;;  %4389 = vmatprep.subr.bf16.mxu1 %v7238_v5  ;;  %v3206_v47 = vpack.c.bf16 %v3191_v7, %v3190_v33 }
 0x727   : > { %v4989_v60 = vpop.eup %4988  ;;  %v3193_v19 = vmul.f32 %v4987_v37, %v6838_v59  ;;  %v3161_v52 = vpop.xlane.xlu1 %3160 }
 0x728   : > { %v3192_v35 = vmul.f32 %v4989_v60, %v6840_v44  ;;  %4998 = vrcp.f32 %v3161_v52  ;;  %4391 = vmatprep.mubr.bf16.mxu1 %v3206_v47  ;;  %v3159_v25 = vpop.xlane.xlu0 %3158 }
 0x729   : > { %4390 = vmatpush3.bf16.msra.mxu1 %v7238_v5  ;;  %5000 = vrcp.f32 %v3159_v25 }
 0x72a   : > { %v4991_v17 = vpop.eup %4990  ;;  %v3207_v30 = vpack.c.bf16 %v3193_v19, %v3192_v35 }
 0x72b   : > { %v4993_v6 = vpop.eup %4992  ;;  %v3165_v34 = vpop.xlane.xlu1 %3164  ;;  %v3195_v26 = vmul.f32 %v4991_v17, %v6846_v0 }
 0x72c   : > { %5002 = vrcp.f32 %v3165_v34  ;;  %4392 = vmatmul.mubr.bf16.vlgmr.msra.gmra.mrb[68].mxu1 %v3207_v30  ;;  %v3163_v1 = vpop.xlane.xlu0 %3162  ;;  %v3194_v59 = vmul.f32 %v4993_v6, %v6848_v43 }
 0x72d   : > { %5004 = vrcp.f32 %v3163_v1 }
 0x72e   : > { %v4995_v42 = vpop.eup %4994  ;;  %v3208_v44 = vpack.c.bf16 %v3195_v26, %v3194_v59 }
 0x72f   : > { %v4997_v39 = vpop.eup %4996  ;;  %v3169_v41 = vpop.xlane.xlu1 %3168  ;;  %v3197_v48 = vmul.f32 %v4995_v42, %v6854_v50 }
 0x730   : > { %5006 = vrcp.f32 %v3169_v41  ;;  %4395 = vmatprep.mubr.bf16.mxu1 %v3208_v44  ;;  %v3167_v4 = vpop.xlane.xlu0 %3166  ;;  %v3196_v38 = vmul.f32 %v4997_v39, %v6856_v46 }
 0x731   : > { %5008 = vrcp.f32 %v3167_v4 }
 0x732   : > { %v4999_v61 = vpop.eup %4998  ;;  %v3209_v0 = vpack.c.bf16 %v3197_v48, %v3196_v38 }
 0x733   : > { %v5001_v24 = vpop.eup %5000  ;;  %v3173_v20 = vpop.xlane.xlu1 %3172  ;;  %v3199_v49 = vmul.f32 %v4999_v61, %v6862_v18 }
 0x734   : > { %5010 = vrcp.f32 %v3173_v20  ;;  %4396 = vmatmul.mubr.bf16.gmra.mrb[72].mxu1 %v3209_v0  ;;  %v3171_v43 = vpop.xlane.xlu0 %3170  ;;  %v3198_v21 = vmul.f32 %v5001_v24, %v6864_v13 }
 0x735   : > { %5012 = vrcp.f32 %v3171_v43 }
 0x736   : > { %v5003_v2 = vpop.eup %5002  ;;  %v3210_v50 = vpack.c.bf16 %v3199_v49, %v3198_v21 }
 0x737   : > { %v5005_v36 = vpop.eup %5004  ;;  %v3201_v31 = vmul.f32 %v5003_v2, %v6868_v12  ;;  %v6949_v2 = vld [vmem:[%s7070_s6] sm:$0x3] }
 0x738   : > { %4399 = vmatprep.mubr.bf16.mxu1 %v3210_v50  ;;  %v3200_v46 = vmul.f32 %v5005_v36, %v6870_v63  ;;  %v4752_v63 = vld [vmem:[#allocation8 + $0x60] ss:$8 sps:$4 sm:$0xff]  }
 0x739   : > { %3464 = vmatpush1.bf16.msra.mxu0 %v4752_v63  ;;  %v7239_v50 = vld [vmem:[#allocation22_spill] sm:$0xff] }
 0x73a   : > { %v5007_v40 = vpop.eup %5006  ;;  %v3211_v16 = vpack.c.bf16 %v3201_v31, %v3200_v46  ;;  %3465 = vmatprep.subr.bf16.mxu0 %v4757_v14  ;;  %v7240_v36 = vsub.s32 1, %v7239_v50 }
 0x73b   : > { %v5009_v28 = vpop.eup %5008  ;;  %v3203_v51 = vmul.f32 %v5007_v40, %v6874_v32  ;;  %v3889_v32 = vld [vmem:[%s7068_s4] ss:$0 sm:$0xff] }
 0x73c   : > { %4400 = vmatmul.mubr.bf16.gmra.mrb[76].mxu1 %v3211_v16  ;;  %v3202_v18 = vmul.f32 %v5009_v28, %v6876_v27  ;;  %v6954_v31 = vrot.slane %v6949_v2, %v7240_v36 }
 0x73d   : > { %3466 = vmatpush1.bf16.msra.mxu0 %v4755_v45 }
 0x73e   : > { %v5011_v53 = vpop.eup %5010  ;;  %v3212_v62 = vpack.c.bf16 %v3203_v51, %v3202_v18  ;;  %4407 = vmatprep.subr.bf16.mxu0 %v7196_v29 }
 0x73f   : > { %v5013_v13 = vpop.eup %5012  ;;  %v3205_v54 = vmul.f32 %v5011_v53, %v6880_v8 }
 0x740   : > { %4403 = vmatprep.mubr.bf16.mxu1 %v3212_v62  ;;  %v3204_v55 = vmul.f32 %v5013_v13, %v6882_v11 }
 0x742   : > { %v3213_v12 = vpack.c.bf16 %v3205_v54, %v3204_v55 }
 0x744   : > { %4404 = vmatmul.mubr.bf16.gmra.mrb[80].mxu1 %v3213_v12 }
 0x7ff   : > { %v4393_v27 = vpop.f32.mrb[68].mxu1 }
 0x800   : > { %v3256_v8 = vpop.f32.mrb[69].mxu1  ;;  %v4443_v11 = vadd.f32 %v4393_v27, %v3889_v32 }
 0x801   : > { %v4394_v9 = vpop.f32.mrb[70].mxu1  ;;  %v4444_v58 = vadd.f32 %v3889_v32, %v3256_v8 }
 0x802   : > { %v4445_v3 = vadd.f32 %v4394_v9, %v3889_v32  ;;  %v3259_v23 = vpop.f32.mrb[71].mxu1 }
 0x803   : > { %v4446_v56 = vadd.f32 %v3889_v32, %v3259_v23 }
 0x804   : > { %v3336_v7 = vpack.c.bf16 %v4445_v3, %v4443_v11 }
 0x805   : > { %v3335_v57 = vpack.c.bf16 %v4446_v56, %v4444_v58 }
 0x807   : > { %v4397_v33 = vpop.f32.mrb[72].mxu1  ;;  %3484 = vmatmul.mubr.bf16.vlgmr.msra.gmra.mrb[96].mxu0 %v3335_v57 }
 0x808   : > { %v3272_v37 = vpop.f32.mrb[73].mxu1  ;;  %3492 = vmatprep.mubr.bf16.mxu0 %v7230_v10  ;;  %v4447_v47 = vadd.f32 %v4397_v33, %v3889_v32 }
 0x809   : > { %v4398_v5 = vpop.f32.mrb[74].mxu1  ;;  %v4448_v52 = vadd.f32 %v3889_v32, %v3272_v37 }
 0x80a   : > { %v4449_v60 = vadd.f32 %v4398_v5, %v3889_v32  ;;  %v3275_v19 = vpop.f32.mrb[75].mxu1 }
 0x80b   : > { %v4450_v35 = vadd.f32 %v3889_v32, %v3275_v19 }
 0x80c   : > { %v3338_v25 = vpack.c.bf16 %v4449_v60, %v4447_v47 }
 0x80d   : > { %v3337_v17 = vpack.c.bf16 %v4450_v35, %v4448_v52 }
 0x80f   : > { %v4401_v30 = vpop.f32.mrb[76].mxu1  ;;  %3493 = vmatmul.mubr.bf16.gmra.mrb[100].mxu0 %v3336_v7 }
 0x810   : > { %v3288_v6 = vpop.f32.mrb[77].mxu1  ;;  %3500 = vmatprep.mubr.bf16.mxu0 %v7230_v10  ;;  %v4451_v26 = vadd.f32 %v4401_v30, %v3889_v32 }
 0x811   : > { %v4402_v34 = vpop.f32.mrb[78].mxu1  ;;  %v4452_v42 = vadd.f32 %v3889_v32, %v3288_v6 }
 0x812   : > { %v4453_v1 = vadd.f32 %v4402_v34, %v3889_v32  ;;  %v3291_v59 = vpop.f32.mrb[79].mxu1 }
 0x813   : > { %v4454_v44 = vadd.f32 %v3889_v32, %v3291_v59 }
 0x814   : > { %v3340_v39 = vpack.c.bf16 %v4453_v1, %v4451_v26 }
 0x815   : > { %v3339_v41 = vpack.c.bf16 %v4454_v44, %v4452_v42 }
 0x817   : > { %v4405_v48 = vpop.f32.mrb[80].mxu1  ;;  %3501 = vmatmul.mubr.bf16.gmra.mrb[104].mxu0 %v3337_v17 }
 0x818   : > { %v3304_v4 = vpop.f32.mrb[81].mxu1  ;;  %3508 = vmatprep.mubr.bf16.mxu0 %v7230_v10  ;;  %v4455_v61 = vadd.f32 %v4405_v48, %v3889_v32 }
 0x819   : > { %v4406_v38 = vpop.f32.mrb[82].mxu1  ;;  %v4456_v20 = vadd.f32 %v3889_v32, %v3304_v4 }
 0x81a   : > { %v4457_v0 = vadd.f32 %v4406_v38, %v3889_v32  ;;  %v3307_v24 = vpop.f32.mrb[83].mxu1 }
 0x81b   : > { %v4458_v49 = vadd.f32 %v3889_v32, %v3307_v24 }
 0x81c   : > { %v3342_v43 = vpack.c.bf16 %v4457_v0, %v4455_v61 }
 0x81d   : > { %v3341_v21 = vpack.c.bf16 %v4458_v49, %v4456_v20  ;;  %v7241_v49 = vld [vmem:[#allocation23_spill] sm:$0xff] }
 0x81f   : > { %3509 = vmatmul.mubr.bf16.gmra.mrb[108].mxu0 %v3338_v25 }
 0x820   : > { %3516 = vmatprep.mubr.bf16.mxu0 %v7230_v10 }
 0x827   : > { %3517 = vmatmul.mubr.bf16.gmra.mrb[112].mxu0 %v3339_v41 }
 0x828   : > { %3524 = vmatprep.mubr.bf16.mxu0 %v7230_v10 }
 0x82f   : > { %3525 = vmatmul.mubr.bf16.gmra.mrb[116].mxu0 %v3340_v39 }
 0x830   : > { %3532 = vmatprep.mubr.bf16.mxu0 %v7230_v10 }
 0x837   : > { %3533 = vmatmul.mubr.bf16.gmra.mrb[120].mxu0 %v3341_v21 }
 0x838   : > { %3540 = vmatprep.mubr.bf16.mxu0 %v7230_v10 }
 0x83f   : > { %3541 = vmatmul.mubr.bf16.gmra.mrb[124].mxu0 %v3342_v43  ;;  %v3364_v43 = vrot.slane %v6949_v2, %v7241_v49 }
 0x840   : > { %4423 = vmatprep.mubr.msk.bf16.mxu0 %vm5291_vm3, %v7196_v29 }
 0x8da   : > { %v6956_v46 = vpop.f32.mrb[96].mxu0 }
 0x8db   : > { %v3487_v40 = vpop.f32.mrb[97].mxu0  ;;  %v3486_v50 = vadd.f32 %v6956_v46, %v3364_v43 }
 0x8dc   : > { %v3489_v16 = vpop.f32.mrb[98].mxu0  ;;  %v3488_v10 = vadd.f32 %v3487_v40, %v6954_v31 }
 0x8dd   : > { %v3490_v28 = vpop.f32.mrb[99].mxu0  ;;  %v3549_v36 = vpack.c.bf16 %v3486_v50, %v3486_v50 }
 0x8de   : > { %v3491_v51 = vadd.f32 %v3490_v28, %v6954_v31 }
 0x8e0   : > { %v3550_v18 = vpack.c.bf16 %v3491_v51, %v3488_v10 }
 0x8e2   : > { %v3494_v53 = vpop.f32.mrb[100].mxu0  ;;  %4408 = vmatpush3.bf16.xpose.msra.mxu0 %v3550_v18 }
 0x8e3   : > { %v3495_v62 = vpop.f32.mrb[101].mxu0  ;;  %4409 = vmatprep.subr.bf16.mxu0 %v7196_v29 }
 0x8e4   : > { %v3497_v13 = vpop.f32.mrb[102].mxu0  ;;  %v3496_v55 = vadd.f32 %v3495_v62, %v6954_v31 }
 0x8e5   : > { %v3498_v54 = vpop.f32.mrb[103].mxu0 }
 0x8e6   : > { %v3499_v12 = vadd.f32 %v3498_v54, %v6954_v31 }
 0x8e8   : > { %v3551_v22 = vpack.c.bf16 %v3499_v12, %v3496_v55 }
 0x8ea   : > { %v3502_v63 = vpop.f32.mrb[104].mxu0  ;;  %4410 = vmatpush3.bf16.xpose.msra.mxu0 %v3551_v22 }
 0x8eb   : > { %v3503_v14 = vpop.f32.mrb[105].mxu0  ;;  %4411 = vmatprep.subr.bf16.mxu0 %v7196_v29 }
 0x8ec   : > { %v3505_v45 = vpop.f32.mrb[106].mxu0  ;;  %v3504_v27 = vadd.f32 %v3503_v14, %v6954_v31 }
 0x8ed   : > { %v3506_v32 = vpop.f32.mrb[107].mxu0 }
 0x8ee   : > { %v3507_v8 = vadd.f32 %v3506_v32, %v6954_v31 }
 0x8f0   : > { %v3552_v9 = vpack.c.bf16 %v3507_v8, %v3504_v27 }
 0x8f2   : > { %v3510_v11 = vpop.f32.mrb[108].mxu0  ;;  %4412 = vmatpush3.bf16.xpose.msra.mxu0 %v3552_v9 }
 0x8f3   : > { %v3511_v3 = vpop.f32.mrb[109].mxu0  ;;  %4413 = vmatprep.subr.bf16.mxu0 %v7196_v29 }
 0x8f4   : > { %v3513_v23 = vpop.f32.mrb[110].mxu0  ;;  %v3512_v56 = vadd.f32 %v3511_v3, %v6954_v31 }
 0x8f5   : > { %v3514_v58 = vpop.f32.mrb[111].mxu0 }
 0x8f6   : > { %v3515_v7 = vadd.f32 %v3514_v58, %v6954_v31 }
 0x8f8   : > { %v3553_v57 = vpack.c.bf16 %v3515_v7, %v3512_v56 }
 0x8fa   : > { %v3518_v33 = vpop.f32.mrb[112].mxu0  ;;  %4414 = vmatpush3.bf16.xpose.msra.mxu0 %v3553_v57 }
 0x8fb   : > { %v3519_v37 = vpop.f32.mrb[113].mxu0  ;;  %4415 = vmatprep.subr.bf16.mxu0 %v7196_v29 }
 0x8fc   : > { %v3521_v5 = vpop.f32.mrb[114].mxu0  ;;  %v3520_v60 = vadd.f32 %v3519_v37, %v6954_v31 }
 0x8fd   : > { %v3522_v47 = vpop.f32.mrb[115].mxu0 }
 0x8fe   : > { %v3523_v19 = vadd.f32 %v3522_v47, %v6954_v31 }
 0x900   : > { %v3554_v52 = vpack.c.bf16 %v3523_v19, %v3520_v60 }
 0x902   : > { %v3526_v35 = vpop.f32.mrb[116].mxu0  ;;  %4416 = vmatpush3.bf16.xpose.msra.mxu0 %v3554_v52 }
 0x903   : > { %v3527_v25 = vpop.f32.mrb[117].mxu0  ;;  %4417 = vmatprep.subr.bf16.mxu0 %v7196_v29 }
 0x904   : > { %v3529_v17 = vpop.f32.mrb[118].mxu0  ;;  %v3528_v6 = vadd.f32 %v3527_v25, %v6954_v31 }
 0x905   : > { %v3530_v30 = vpop.f32.mrb[119].mxu0 }
 0x906   : > { %v3531_v34 = vadd.f32 %v3530_v30, %v6954_v31 }
 0x908   : > { %v3555_v26 = vpack.c.bf16 %v3531_v34, %v3528_v6 }
 0x90a   : > { %v3534_v1 = vpop.f32.mrb[120].mxu0  ;;  %4418 = vmatpush3.bf16.xpose.msra.mxu0 %v3555_v26 }
 0x90b   : > { %v3535_v59 = vpop.f32.mrb[121].mxu0  ;;  %4419 = vmatprep.subr.bf16.mxu0 %v7196_v29 }
 0x90c   : > { %v3537_v42 = vpop.f32.mrb[122].mxu0  ;;  %v3536_v39 = vadd.f32 %v3535_v59, %v6954_v31 }
 0x90d   : > { %v3538_v44 = vpop.f32.mrb[123].mxu0 }
 0x90e   : > { %v3539_v41 = vadd.f32 %v3538_v44, %v6954_v31 }
 0x910   : > { %v3556_v48 = vpack.c.bf16 %v3539_v41, %v3536_v39 }
 0x912   : > { %v3542_v4 = vpop.f32.mrb[124].mxu0  ;;  %4420 = vmatpush3.bf16.xpose.msra.mxu0 %v3556_v48 }
 0x913   : > { %v3543_v38 = vpop.f32.mrb[125].mxu0  ;;  %4421 = vmatprep.subr.bf16.mxu0 %v7196_v29 }
 0x914   : > { %v3545_v61 = vpop.f32.mrb[126].mxu0  ;;  %v3544_v24 = vadd.f32 %v3543_v38, %v6954_v31 }
 0x915   : > { %v3546_v0 = vpop.f32.mrb[127].mxu0 }
 0x916   : > { %v3547_v20 = vadd.f32 %v3546_v0, %v6954_v31 }
 0x918   : > { %v3557_v21 = vpack.c.bf16 %v3547_v20, %v3544_v24 }
 0x91a   : > { %4422 = vmatpush3.bf16.xpose.msra.mxu0 %v3557_v21 }
 0x921   : > { %4424 = vmatmul.mubr.bf16.vlgmr.msra.gmra.mrb[128].mxu0 %v3549_v36 }
 0x9f4   : > { %v3592_v40 = vpop.f32.mrb[128].mxu0 }
 0x9f5   : > { %v3598_v29 = vsel %vm5959_vm2, -1e+30, %v3592_v40  ;;  %v4425_v16 = vpop.f32.mrb[129].mxu0 }
 0x9f6   : > { %3599 = vmax.xlane.f32.xlu0 %v3598_v29  ;;  %v3595_v31 = vpop.f32.mrb[130].mxu0 }
 0x9f7   : > { %v4426_v28 = vpop.f32.mrb[131].mxu0 }
 0xa83   : > { %v3600_v2 = vpop.xlane.xlu0 %3599 }
 0xa84   : > { %v3601_v10 = vsub.f32 %v3598_v29, %v3600_v2 }
 0xa86   : > { %v3602_v51 = vmul.f32 1.442695, %v3601_v10 }
 0xa88   : > { %5014 = vpow2.f32 %v3602_v51 }
 0xa92   : > { %v5015_v18 = vpop.eup %5014 }
 0xa93   : > { %3604 = vadd.xlane.f32.xlu1 %v5015_v18 }
 0xa94   : > { %5176 = shalt.err (!%p5173_p3)
}
 0xa95   : > { %s5177_s25 = scalar_lea.hbm %s6992_s9, 128  ;;  %s5181_s12 = scalar_lea.hbm %s7074_s10, 256 }
 0xa96   : > { %p5178_p9 = scmp.ne.s32.totalorder %s6992_s9, %s5177_s25  ;;  %p5182_p7 = scmp.lt.u32.totalorder %s6992_s9, %s7074_s10 }
 0xa97   : > { %p5183_p12 = scmp.lt.u32.totalorder %s5181_s12, %s5177_s25  ;;  %p5185_p1 = scmp.lt.u32.totalorder %s5177_s25, %s6992_s9 }
 0xa98   : > { %p5179_p13 = pnand %p5178_p9, %p5494_p5 }
 0xa99   : > { %p5184_p2 = por %p5183_p12, %p5182_p7 }
 0xa9a   : > { %p5180_p11 = pneg %p5179_p13 }
 0xa9b   : > { %p5186_p4 = por %p5185_p1, %p5184_p2 }
 0xa9d   : > { %p5187_p0 = pnand %p5186_p4, %p5180_p11 }
 0xa9f   : > { %5190 = shalt.err (!%p5187_p0)
}
 0xaa0   : > { %4556 = dma.vmem_to_hbm [thread:$0]  (%p5494_p5), %s3642_s28, 128, %s6992_s9, %s3615_s2  }
 0xaa1   : > { %s458_s22 = scalar_lea.vmem [#allocation11], %s3806_s27  ;;  %s7242_s13 = sld [smem:[#allocation63_spill]] }
 0xaa2   : > { %s3628_s23 = sshll.u32 %s458_s22, 4  ;;  %s3610_s9 = scalar_lea.sflag [#allocation4], %s5586_s11  ;;  %s7022_s23 = int_to_ptr.vmem [resolvable:$true] %s3628_s23 }
 0xaa3   : > { %s5191_s28 = scalar_lea.vmem %s7022_s23, 128  ;;  %s5293_s27 = smov [#allocation11]  }
 0xaa4   : > { %p5192_p8 = scmp.ne.s32.totalorder %s7022_s23, %s5191_s28  ;;  %s5195_s2 = sshll.u32 %s5293_s27, 4  ;;  %s5196_s2 = int_to_ptr.vmem [resolvable:$false] %s5195_s2 }
 0xaa5   : > { %s5197_s17 = scalar_lea.vmem %s5196_s2, 256  ;;  %p5198_p3 = scmp.lt.s32.totalorder %s7022_s23, %s5196_s2 }
 0xaa6   : > { %p5193_p6 = pnand %p5192_p8, %p5494_p5  ;;  %p5199_p9 = scmp.lt.s32.totalorder %s5197_s17, %s5191_s28 }
 0xaa7   : > { %s7243_s25 = smov %s7242_s13  ;;  %s7020_s26 = scalar_lea.hbm %s7242_s13, %s3932_s18 }
 0xaa8   : > { %p5194_p10 = pneg %p5193_p6  ;;  %p5200_p13 = por %p5199_p9, %p5198_p3 }
 0xaaa   : > { %p5201_p11 = pnand %p5200_p13, %p5194_p10 }
 0xb20   : > { %v3605_v15 = vpop.xlane.xlu1 %3604 }
 0xb21   : > { %5016 = vrcp.f32 %v3605_v15 }
 0xb2b   : > { %v5017_v46 = vpop.eup %5016 }
 0xb2c   : > { %v3607_v53 = vmul.f32 %v5017_v46, %v5015_v18 }
 0xb2e   : > { %3608 = vst [vmem:[%s458_s22] sm:$0xff] %v3607_v53 }
 0xb2f   : > { %5204 = shalt.err (!%p5201_p11)
}
 0xb30   : > { %s5205_s11 = scalar_lea.hbm %s7020_s26, 128  ;;  %s5209_s12 = scalar_lea.hbm %s7243_s25, 256 }
 0xb31   : > { %p5206_p7 = scmp.ne.s32.totalorder %s7020_s26, %s5205_s11  ;;  %p5210_p1 = scmp.lt.u32.totalorder %s7020_s26, %s7243_s25 }
 0xb32   : > { %p5211_p4 = scmp.lt.u32.totalorder %s5209_s12, %s5205_s11  ;;  %p5213_p8 = scmp.lt.u32.totalorder %s5205_s11, %s7020_s26 }
 0xb33   : > { %p5207_p12 = pnand %p5206_p7, %p5494_p5 }
 0xb34   : > { %p5212_p0 = por %p5211_p4, %p5210_p1 }
 0xb35   : > { %p5208_p2 = pneg %p5207_p12 }
 0xb36   : > { %p5214_p6 = por %p5213_p8, %p5212_p0 }
 0xb38   : > { %p5215_p10 = pnand %p5214_p6, %p5208_p2 }
 0xb3a   : > { %5218 = shalt.err (!%p5215_p10)
}
 0xb3b   : > { %4555 = dma.vmem_to_hbm [thread:$0]  (%p5494_p5), %s7022_s23, 128, %s7020_s26, %s3610_s9  }
 0xb3c PF: > { %s7244_s22 = sld [smem:[#allocation20_spill]]  ;;  %s7245_s29 = sld [smem:[#allocation21_spill]] }
 0xb3d   : > { %p7247_p9 = scmp.ge.s32.totalorder %s5273_s16, 2 }
 0xb42   : > { %s3653_s5 = sand.u32 1, %s7244_s22   ;;  %p7246_p3 = scmp.ne.s32.totalorder %s7245_s29, 0 }
 0xb43   : > { %s3654_s13 = scalar_lea.sflag [#allocation4], %s3653_s5 }
 0xb44   : > { %p4577_p13 = pnand %p7247_p9, %p7246_p3 }
 0xb46   : > { %5252 = dma.done.wait (!%p4577_p13), %s3654_s13, 128  }
 0xb47   : > { %5254 = vsyncadd (!%p4577_p13), %s3654_s13, 4294967168  ;;  %s3663_s28 = scalar_lea.sflag [#allocation13], %s3653_s5 }
 0xb48   : > { %5256 = dma.done.wait (!%p4577_p13), %s3663_s28, 128  }
 0xb49   : > { %5258 = vsyncadd (!%p4577_p13), %s3663_s28, 4294967168  ;;  %p31_p5 = scmp.ge.s32.totalorder %s5480_s20, 4   ;;  %s7248_s13 = smov %s5265_s14 }
 0xb4a   : > { %s7249_s14 = smov %s5269_s15  ;;  %s7250_s15 = smov %s5490_s30 }
 0xb4b   : > { %s7251_s16 = smov %s5480_s20  ;;  %33 = sbr.rel (!%p31_p5) target bundleno = 15 (0xf), region = 143 }
 0xb52   :  { %3668 = vsyncpa [#allocation3], 1 }
 0xb53   :  { %3670 = vsyncpa [#allocation3 + $0x1], 1 }
 0xb54   :  { %3671 = vsyncpa [#allocation6], 1 }
 0xb55   :  { %3673 = vsyncpa [#allocation6 + $0x1], 1 }
 0xb56   :  { %3674 = vsyncpa [#allocation9], 1 }
 0xb57   :  { %3675 = vsyncpa [#allocation4], 1 }
 0xb58   :  { %3677 = vsyncpa [#allocation4 + $0x1], 1 }
 0xb59   :  { %3678 = vsyncpa [#allocation13], 1 }
 0xb5a   :  { %3680 = vsyncpa [#allocation13 + $0x1], 1 }

</bundles_post_ra>
